<compile_context>
chip_gen: v7x
topology: tpu7x:2x2x1
jax: 0.10.0
libtpu: 0.0.40
codegen_flags: <defaults>
</compile_context>

<pallas_src>
import functools
import math

import jax
import jax.numpy as jnp
from jax import lax
from jax.experimental import pallas as pl
from jax.experimental.pallas import tpu as pltpu

BN_EPS = 1e-5


def _round_up(v, m):
    return ((v + m - 1) // m) * m


def _resblock_kernel(nb, S, Wp, guard, H, W, Cin, Cout, Ppool, Ppool_pad,
                     x_ref, w1_ref, b1_ref, w2_ref, b2_ref, wres_ref,
                     sdc1_ref, tdc1_ref, sres_ref, tres_ref, mask_ref, sel_ref,
                     out_ref, pool_ref,
                     aext_ref, a2ext_ref):
    """One batch block per grid step; channels on sublanes, flat padded spatial on lanes."""
    f32 = jnp.float32
    D = guard                                    # data offset inside the guarded scratches

    # ---- zero only the guard strips (tiny, aligned) each step ------------------
    aext_ref[:, :guard] = jnp.zeros((Cin, guard), f32)
    aext_ref[:, D + S:] = jnp.zeros((Cin, guard), f32)
    a2ext_ref[:, :guard] = jnp.zeros((Cout, guard), f32)
    a2ext_ref[:, D + S:] = jnp.zeros((Cout, guard), f32)

    inside = mask_ref[...] > 0.5                 # (1, S): 1 inside the image, 0 on pad ring
    b1 = b1_ref[...]
    b2 = b2_ref[...]
    w_res = wres_ref[...]
    s1 = sdc1_ref[...]
    t1 = tdc1_ref[...]
    s_res = sres_ref[...]
    t_res = tres_ref[...]
    sel = sel_ref[...]                           # (W, W//2) even-column selector

    taps = [(dy - 1) * Wp + (dx - 1) for dy in range(3) for dx in range(3)]
    Wh = W // 2

    for j in range(nb):
        x_j = x_ref[j]                           # (Cin, S)

        # ---- double_conv.bn1 (folded affine) + relu1, pad ring forced to zero --
        a = jnp.where(inside, jnp.maximum(x_j * s1 + t1, 0.0), 0.0)
        aext_ref[:, D:D + S] = a

        # ---- conv1: 3x3 pad=1 as 9 accumulating per-tap matmuls (no im2col) ----
        y1 = None
        for k, off in enumerate(taps):
            t = jnp.dot(w1_ref[k], aext_ref[:, pl.ds(D + off, S)],
                        preferred_element_type=f32)
            y1 = t if y1 is None else y1 + t

        # ---- relu2 (bn2 is unused on the IPCPA='False' path), re-zero pad ring -
        a2 = jnp.where(inside, jnp.maximum(y1 + b1, 0.0), 0.0)
        a2ext_ref[:, D:D + S] = a2

        # ---- conv2: 3x3 pad=1, same per-tap accumulation ------------------------
        y2 = None
        for k, off in enumerate(taps):
            t = jnp.dot(w2_ref[k], a2ext_ref[:, pl.ds(D + off, S)],
                        preferred_element_type=f32)
            y2 = t if y2 is None else y2 + t

        # ---- residual branch: 1x1 conv (bias=False) + bn1 (folded affine) ------
        ident = jnp.dot(w_res, x_j, preferred_element_type=f32) * s_res + t_res

        out_j = y2 + b2 + ident                  # (Cout, S), padded-grid layout
        out_ref[j] = out_j                       # single lane-dense store

        # ---- MaxPool2d(2): per pooled row, 4 window reads + max + tiny selector
        rows = []
        for i in range(H // 2):
            r0 = (2 * i + 1) * Wp + 1
            top = out_ref[j, :, pl.ds(r0, W)]
            top1 = out_ref[j, :, pl.ds(r0 + 1, W)]
            bot = out_ref[j, :, pl.ds(r0 + Wp, W)]
            bot1 = out_ref[j, :, pl.ds(r0 + Wp + 1, W)]
            m_row = jnp.maximum(jnp.maximum(top, top1), jnp.maximum(bot, bot1))
            rows.append(jnp.dot(m_row, sel, preferred_element_type=f32))  # (Cout, Wh)
        pooled = jnp.concatenate(rows, axis=1)   # (Cout, Ppool)
        if Ppool_pad > Ppool:
            pooled = jnp.concatenate(
                [pooled, jnp.zeros((Cout, Ppool_pad - Ppool), f32)], axis=1)
        pool_ref[j] = pooled                     # one lane-dense pooled store per image


def preactivate_resblock(x_nchw, params, *, batch_block=None):
    """Returns (down_sampled, out) like the PyTorch module, both in NCHW."""
    x = x_nchw.astype(jnp.float32)
    N, Cin, H, W = x.shape
    Cout = params["w_res"].shape[-1]
    assert H % 2 == 0 and W % 2 == 0

    # nb=1 -> grid length N (>= 2 for N >= 2), so the "parallel" axis can shard
    # across both v7x TensorCores and per-step VMEM stays small.
    nb = batch_block if batch_block is not None else 1
    assert N % nb == 0

    # Padded-grid geometry: image at origin (1,1); S = Hp*Wp is a multiple of 128
    # so every full-row store/load stays lane dense and tile aligned.
    Wp = _round_up(W + 2, 32)
    Hp = _round_up(H + 2, max(1, 128 // math.gcd(Wp, 128)))
    S = Hp * Wp
    guard = _round_up(Wp + 1, 128)
    Ppool = (H // 2) * (W // 2)
    Ppool_pad = _round_up(Ppool, 128)

    def fold_bn(g, b, m, v):
        s = g / jnp.sqrt(v + BN_EPS)
        t = b - m * s
        return (s.reshape(-1, 1).astype(jnp.float32),
                t.reshape(-1, 1).astype(jnp.float32))

    s_dc1, t_dc1 = fold_bn(params["dc_bn1_gamma"], params["dc_bn1_beta"],
                           params["dc_bn1_mean"], params["dc_bn1_var"])
    s_res, t_res = fold_bn(params["res_bn_gamma"], params["res_bn_beta"],
                           params["res_bn_mean"], params["res_bn_var"])

    # Per-tap weight layout (9, Cout, Cin): tap k = kh*3 + kw, weight[o, i].
    w1_taps = jnp.transpose(params["w1"], (0, 1, 3, 2)).reshape(9, Cout, Cin).astype(jnp.float32)
    w2_taps = jnp.transpose(params["w2"], (0, 1, 3, 2)).reshape(9, Cout, Cout).astype(jnp.float32)
    wres_mat = jnp.transpose(params["w_res"]).astype(jnp.float32)            # (Cout, Cin)
    b1 = params["b1"].reshape(Cout, 1).astype(jnp.float32)
    b2 = params["b2"].reshape(Cout, 1).astype(jnp.float32)

    # Input path: zero-pad into the padded grid and flatten spatial -> NO transpose.
    x_flat = jnp.pad(x, ((0, 0), (0, 0), (1, Hp - H - 1), (1, Wp - W - 1))).reshape(N, Cin, S)

    # Pad-ring mask (1 inside the HxW image, 0 elsewhere), tiny constant input.
    ri = jnp.arange(Hp)
    ci = jnp.arange(Wp)
    m2 = ((ri[:, None] >= 1) & (ri[:, None] <= H) &
          (ci[None, :] >= 1) & (ci[None, :] <= W))
    mask = m2.reshape(1, S).astype(jnp.float32)

    # Tiny per-row maxpool column selector: picks even columns of the row max.
    sel = (jnp.arange(W)[:, None] == 2 * jnp.arange(W // 2)[None, :]).astype(jnp.float32)

    kernel = functools.partial(_resblock_kernel, nb, S, Wp, guard, H, W,
                               Cin, Cout, Ppool, Ppool_pad)

    # Explicit VMEM budget (x/out blocks double-buffered + guarded scratches + consts).
    vmem_est = 4 * (2 * nb * Cin * S + 2 * nb * Cout * S + 2 * nb * Cout * Ppool_pad
                    + Cin * (S + 2 * guard) + Cout * (S + 2 * guard)
                    + 2 * (9 * Cout * Cin + 9 * Cout * Cout + Cout * Cin
                           + 4 * Cout + 2 * Cin + S + W * (W // 2)))
    vmem_limit = int(min(64 << 20, max(32 << 20, 2 * vmem_est)))

    def _build(single_buffer_consts):
        cmode = {"pipeline_mode": pl.Buffered(1)} if single_buffer_consts else {}

        def const_spec(shape):
            nd = len(shape)
            return pl.BlockSpec(shape, lambda b, _nd=nd: (0,) * _nd, **cmode)

        grid_spec = pltpu.PrefetchScalarGridSpec(
            num_scalar_prefetch=0,
            grid=(N // nb,),
            in_specs=[
                pl.BlockSpec((nb, Cin, S), lambda b: (b, 0, 0)),   # x (padded grid, flat)
                const_spec((9, Cout, Cin)),                        # w1 taps
                const_spec((Cout, 1)),                             # b1
                const_spec((9, Cout, Cout)),                       # w2 taps
                const_spec((Cout, 1)),                             # b2
                const_spec((Cout, Cin)),                           # w_res (1x1)
                const_spec((Cin, 1)),                              # bn(dc1) scale
                const_spec((Cin, 1)),                              # bn(dc1) shift
                const_spec((Cout, 1)),                             # bn(res) scale
                const_spec((Cout, 1)),                             # bn(res) shift
                const_spec((1, S)),                                # pad-ring mask
                const_spec((W, W // 2)),                           # pool column selector
            ],
            out_specs=[
                pl.BlockSpec((nb, Cout, S), lambda b: (b, 0, 0)),          # full-res out
                pl.BlockSpec((nb, Cout, Ppool_pad), lambda b: (b, 0, 0)),  # pooled out
            ],
            scratch_shapes=[
                pltpu.VMEM((Cin, S + 2 * guard), jnp.float32),     # guarded act (conv1)
                pltpu.VMEM((Cout, S + 2 * guard), jnp.float32),    # guarded act (conv2)
            ],
        )
        return pl.pallas_call(
            kernel,
            out_shape=(jax.ShapeDtypeStruct((N, Cout, S), jnp.float32),
                       jax.ShapeDtypeStruct((N, Cout, Ppool_pad), jnp.float32)),
            grid_spec=grid_spec,
            compiler_params=pltpu.CompilerParams(
                dimension_semantics=("parallel",),
                vmem_limit_bytes=vmem_limit),
        )

    args = (x_flat, w1_taps, b1, w2_taps, b2, wres_mat,
            s_dc1, t_dc1, s_res, t_res, mask, sel)

    out_flat = pooled = None
    for single in (True, False):
        try:
            out_flat, pooled = _build(single)(*args)
            jax.block_until_ready((out_flat, pooled))
            break
        except Exception:
            if not single:      # fallback (default double-buffered consts) also failed
                raise

    # Peel the padding / restore NCHW (reshape + slice only, no transposes).
    out_nchw = out_flat.reshape(N, Cout, Hp, Wp)[:, :, 1:H + 1, 1:W + 1]
    pooled_nchw = pooled[:, :, :Ppool].reshape(N, Cout, H // 2, W // 2)
    return pooled_nchw, out_nchw


def ref_forward(x_nchw, params):
    """Pure-JAX reference (XLA convs) for verification."""
    x = jnp.transpose(x_nchw, (0, 2, 3, 1)).astype(jnp.float32)
    dn = ("NHWC", "HWIO", "NHWC")

    def bn(v, g, b, m, var):
        return (v - m) / jnp.sqrt(var + BN_EPS) * g + b

    a = jnp.maximum(bn(x, params["dc_bn1_gamma"], params["dc_bn1_beta"],
                       params["dc_bn1_mean"], params["dc_bn1_var"]), 0.0)
    y1 = lax.conv_general_dilated(a, params["w1"], (1, 1), "SAME",
                                  dimension_numbers=dn) + params["b1"]
    a2 = jnp.maximum(y1, 0.0)
    y2 = lax.conv_general_dilated(a2, params["w2"], (1, 1), "SAME",
                                  dimension_numbers=dn) + params["b2"]
    ident = lax.conv_general_dilated(x, params["w_res"][None, None], (1, 1), "VALID",
                                     dimension_numbers=dn)
    ident = bn(ident, params["res_bn_gamma"], params["res_bn_beta"],
               params["res_bn_mean"], params["res_bn_var"])
    out = y2 + ident
    pooled = lax.reduce_window(out, -jnp.inf, lax.max,
                               (1, 2, 2, 1), (1, 2, 2, 1), "VALID")
    return (jnp.transpose(pooled, (0, 3, 1, 2)), jnp.transpose(out, (0, 3, 1, 2)))


def init_params(key, in_channels, out_channels):
    ks = jax.random.split(key, 13)
    nrm = lambda k, shape, s: (s * jax.random.normal(k, shape)).astype(jnp.float32)
    uni = lambda k, shape, lo, hi: jax.random.uniform(k, shape, jnp.float32, lo, hi)
    return dict(
        # double_conv conv1 / conv2 (HWIO)
        w1=nrm(ks[0], (3, 3, in_channels, out_channels), 0.25),
        b1=nrm(ks[1], (out_channels,), 0.1),
        w2=nrm(ks[2], (3, 3, out_channels, out_channels), 0.2),
        b2=nrm(ks[3], (out_channels,), 0.1),
        # residual 1x1 conv (bias=False)
        w_res=nrm(ks[4], (in_channels, out_channels), 0.3),
        # double_conv.bn1 (over in_channels)
        dc_bn1_gamma=uni(ks[5], (in_channels,), 0.5, 1.5),
        dc_bn1_beta=nrm(ks[6], (in_channels,), 0.1),
        dc_bn1_mean=nrm(ks[7], (in_channels,), 0.1),
        dc_bn1_var=uni(ks[8], (in_channels,), 0.5, 1.5),
        # resblock bn1 (over out_channels)
        res_bn_gamma=uni(ks[9], (out_channels,), 0.5, 1.5),
        res_bn_beta=nrm(ks[10], (out_channels,), 0.1),
        res_bn_mean=nrm(ks[11], (out_channels,), 0.1),
        res_bn_var=uni(ks[12], (out_channels,), 0.5, 1.5),
    )


if __name__ == "__main__":
    N, Cin, Cout, H, W = 2, 4, 8, 16, 16
    key = jax.random.PRNGKey(0)
    kx, kp = jax.random.split(key)
    x = jax.random.normal(kx, (N, Cin, H, W), jnp.float32)     # NCHW like PyTorch
    params = init_params(kp, Cin, Cout)

    pooled, full = preactivate_resblock(x, params)
    pooled = jax.block_until_ready(pooled)
    full = jax.block_until_ready(full)

    assert pooled.shape == (N, Cout, H // 2, W // 2)
    assert full.shape == (N, Cout, H, W)

    pooled_ref, full_ref = ref_forward(x, params)
    err_full = float(jnp.max(jnp.abs(full - full_ref)))
    err_pool = float(jnp.max(jnp.abs(pooled - pooled_ref)))
    if err_full > 5e-2 or err_pool > 5e-2:
        raise AssertionError(f"mismatch vs reference: full={err_full}, pooled={err_pool}")

    print("KERNEL_OK")
</pallas_src>

<mosaic_0001>
module attributes {stable_mosaic.version = 11 : i64} {
  func.func @_resblock_kernel(%arg0: i32, %arg1: memref<1x4x640xf32, #tpu.memory_space<vmem>>, %arg2: memref<9x8x4xf32, #tpu.memory_space<vmem>>, %arg3: memref<8x1xf32, #tpu.memory_space<vmem>>, %arg4: memref<9x8x8xf32, #tpu.memory_space<vmem>>, %arg5: memref<8x1xf32, #tpu.memory_space<vmem>>, %arg6: memref<8x4xf32, #tpu.memory_space<vmem>>, %arg7: memref<4x1xf32, #tpu.memory_space<vmem>>, %arg8: memref<4x1xf32, #tpu.memory_space<vmem>>, %arg9: memref<8x1xf32, #tpu.memory_space<vmem>>, %arg10: memref<8x1xf32, #tpu.memory_space<vmem>>, %arg11: memref<1x640xf32, #tpu.memory_space<vmem>>, %arg12: memref<16x8xf32, #tpu.memory_space<vmem>>, %arg13: memref<1x8x640xf32, #tpu.memory_space<vmem>>, %arg14: memref<1x8x128xf32, #tpu.memory_space<vmem>>, %arg15: memref<4x896xf32, #tpu.memory_space<vmem>>, %arg16: memref<8x896xf32, #tpu.memory_space<vmem>>) attributes {dimension_semantics = [#tpu.dimension_semantics<parallel>], iteration_bounds = array<i64: 2>, scalar_prefetch = 0 : i64, scratch_operands = 2 : i64, tpu.core_type = #tpu.core_type<tc>, window_params = [{transform_indices = @transform_0, window_bounds = array<i64: 1, 4, 640>}, {pipeline_mode = #tpu.pipeline_mode<synchronous>, transform_indices = @transform_1, window_bounds = array<i64: 9, 8, 4>}, {pipeline_mode = #tpu.pipeline_mode<synchronous>, transform_indices = @transform_2, window_bounds = array<i64: 8, 1>}, {pipeline_mode = #tpu.pipeline_mode<synchronous>, transform_indices = @transform_3, window_bounds = array<i64: 9, 8, 8>}, {pipeline_mode = #tpu.pipeline_mode<synchronous>, transform_indices = @transform_4, window_bounds = array<i64: 8, 1>}, {pipeline_mode = #tpu.pipeline_mode<synchronous>, transform_indices = @transform_5, window_bounds = array<i64: 8, 4>}, {pipeline_mode = #tpu.pipeline_mode<synchronous>, transform_indices = @transform_6, window_bounds = array<i64: 4, 1>}, {pipeline_mode = #tpu.pipeline_mode<synchronous>, transform_indices = @transform_7, window_bounds = array<i64: 4, 1>}, {pipeline_mode = #tpu.pipeline_mode<synchronous>, transform_indices = @transform_8, window_bounds = array<i64: 8, 1>}, {pipeline_mode = #tpu.pipeline_mode<synchronous>, transform_indices = @transform_9, window_bounds = array<i64: 8, 1>}, {pipeline_mode = #tpu.pipeline_mode<synchronous>, transform_indices = @transform_10, window_bounds = array<i64: 1, 640>}, {pipeline_mode = #tpu.pipeline_mode<synchronous>, transform_indices = @transform_11, window_bounds = array<i64: 16, 8>}, {transform_indices = @transform_12, window_bounds = array<i64: 1, 8, 640>}, {transform_indices = @transform_13, window_bounds = array<i64: 1, 8, 128>}]} {
    %cst = arith.constant 0.000000e+00 : f32
    %0 = vector.broadcast %cst : f32 to vector<4x128xf32>
    %c0 = arith.constant 0 : index
    %c0_0 = arith.constant 0 : index
    %1 = vector.load %arg15[%c0, %c0_0] : memref<4x896xf32, #tpu.memory_space<vmem>>, vector<4x128xf32>
    tpu.vector_store %arg15[%c0, %c0_0], %0 {strides = array<i32>} : memref<4x896xf32, #tpu.memory_space<vmem>>, vector<4x128xf32>,
    %cst_1 = arith.constant 0.000000e+00 : f32
    %2 = vector.broadcast %cst_1 : f32 to vector<4x128xf32>
    %c0_2 = arith.constant 0 : index
    %c768 = arith.constant 768 : index
    %3 = vector.load %arg15[%c0_2, %c768] : memref<4x896xf32, #tpu.memory_space<vmem>>, vector<4x128xf32>
    tpu.vector_store %arg15[%c0_2, %c768], %2 {strides = array<i32>} : memref<4x896xf32, #tpu.memory_space<vmem>>, vector<4x128xf32>,
    %cst_3 = arith.constant 0.000000e+00 : f32
    %4 = vector.broadcast %cst_3 : f32 to vector<8x128xf32>
    %c0_4 = arith.constant 0 : index
    %c0_5 = arith.constant 0 : index
    %5 = vector.load %arg16[%c0_4, %c0_5] : memref<8x896xf32, #tpu.memory_space<vmem>>, vector<8x128xf32>
    tpu.vector_store %arg16[%c0_4, %c0_5], %4 {strides = array<i32>} : memref<8x896xf32, #tpu.memory_space<vmem>>, vector<8x128xf32>,
    %cst_6 = arith.constant 0.000000e+00 : f32
    %6 = vector.broadcast %cst_6 : f32 to vector<8x128xf32>
    %c0_7 = arith.constant 0 : index
    %c768_8 = arith.constant 768 : index
    %7 = vector.load %arg16[%c0_7, %c768_8] : memref<8x896xf32, #tpu.memory_space<vmem>>, vector<8x128xf32>
    tpu.vector_store %arg16[%c0_7, %c768_8], %6 {strides = array<i32>} : memref<8x896xf32, #tpu.memory_space<vmem>>, vector<8x128xf32>,
    %c0_9 = arith.constant 0 : index
    %c0_10 = arith.constant 0 : index
    %8 = vector.load %arg11[%c0_9, %c0_10] : memref<1x640xf32, #tpu.memory_space<vmem>>, vector<1x640xf32>
    %cst_11 = arith.constant 5.000000e-01 : f32
    %9 = vector.broadcast %cst_11 : f32 to vector<1x640xf32>
    %10 = arith.cmpf ogt, %8, %9 : vector<1x640xf32>
    %c0_12 = arith.constant 0 : index
    %c0_13 = arith.constant 0 : index
    %11 = vector.load %arg3[%c0_12, %c0_13] : memref<8x1xf32, #tpu.memory_space<vmem>>, vector<8x1xf32>
    %c0_14 = arith.constant 0 : index
    %c0_15 = arith.constant 0 : index
    %12 = vector.load %arg5[%c0_14, %c0_15] : memref<8x1xf32, #tpu.memory_space<vmem>>, vector<8x1xf32>
    %c0_16 = arith.constant 0 : index
    %c0_17 = arith.constant 0 : index
    %13 = vector.load %arg6[%c0_16, %c0_17] : memref<8x4xf32, #tpu.memory_space<vmem>>, vector<8x4xf32>
    %c0_18 = arith.constant 0 : index
    %c0_19 = arith.constant 0 : index
    %14 = vector.load %arg7[%c0_18, %c0_19] : memref<4x1xf32, #tpu.memory_space<vmem>>, vector<4x1xf32>
    %c0_20 = arith.constant 0 : index
    %c0_21 = arith.constant 0 : index
    %15 = vector.load %arg8[%c0_20, %c0_21] : memref<4x1xf32, #tpu.memory_space<vmem>>, vector<4x1xf32>
    %c0_22 = arith.constant 0 : index
    %c0_23 = arith.constant 0 : index
    %16 = vector.load %arg9[%c0_22, %c0_23] : memref<8x1xf32, #tpu.memory_space<vmem>>, vector<8x1xf32>
    %c0_24 = arith.constant 0 : index
    %c0_25 = arith.constant 0 : index
    %17 = vector.load %arg10[%c0_24, %c0_25] : memref<8x1xf32, #tpu.memory_space<vmem>>, vector<8x1xf32>
    %c0_26 = arith.constant 0 : index
    %c0_27 = arith.constant 0 : index
    %18 = vector.load %arg12[%c0_26, %c0_27] : memref<16x8xf32, #tpu.memory_space<vmem>>, vector<16x8xf32>
    %c0_28 = arith.constant 0 : index
    %c0_29 = arith.constant 0 : index
    %c0_30 = arith.constant 0 : index
    %19 = vector.load %arg1[%c0_28, %c0_29, %c0_30] : memref<1x4x640xf32, #tpu.memory_space<vmem>>, vector<1x4x640xf32>
    %20 = vector.shape_cast %19 : vector<1x4x640xf32> to vector<4x640xf32>
    %21 = vector.broadcast %14 : vector<4x1xf32> to vector<4x640xf32>
    %22 = arith.mulf %20, %21 : vector<4x640xf32>
    %23 = vector.broadcast %15 : vector<4x1xf32> to vector<4x640xf32>
    %24 = arith.addf %22, %23 : vector<4x640xf32>
    %cst_31 = arith.constant 0.000000e+00 : f32
    %25 = vector.broadcast %cst_31 : f32 to vector<4x640xf32>
    %26 = arith.maximumf %24, %25 : vector<4x640xf32>
    %cst_32 = arith.constant 0.000000e+00 : f32
    %27 = vector.shape_cast %10 : vector<1x640xi1> to vector<1x640xi1>
    %28 = vector.broadcast %27 : vector<1x640xi1> to vector<4x640xi1>
    %29 = vector.broadcast %cst_32 : f32 to vector<4x640xf32>
    %30 = arith.select %28, %26, %29 : vector<4x640xi1>, vector<4x640xf32>
    %c0_33 = arith.constant 0 : index
    %c128 = arith.constant 128 : index
    %31 = vector.load %arg15[%c0_33, %c128] : memref<4x896xf32, #tpu.memory_space<vmem>>, vector<4x640xf32>
    tpu.vector_store %arg15[%c0_33, %c128], %30 {strides = array<i32>} : memref<4x896xf32, #tpu.memory_space<vmem>>, vector<4x640xf32>,
    %c0_34 = arith.constant 0 : index
    %c0_35 = arith.constant 0 : index
    %c0_36 = arith.constant 0 : index
    %32 = vector.load %arg2[%c0_34, %c0_35, %c0_36] : memref<9x8x4xf32, #tpu.memory_space<vmem>>, vector<1x8x4xf32>
    %33 = vector.shape_cast %32 : vector<1x8x4xf32> to vector<8x4xf32>
    %c0_37 = arith.constant 0 : index
    %c95 = arith.constant 95 : index
    %34 = vector.load %arg15[%c0_37, %c95] : memref<4x896xf32, #tpu.memory_space<vmem>>, vector<4x640xf32>
    %cst_38 = arith.constant dense<0.000000e+00> : vector<8x640xf32>
    %35 = tpu.matmul %33, %34, %cst_38 {dimension_numbers = #tpu.dot_dimension_numbers<[1], [0], [0], [1], [0, 0, 1, 1], [], []>} : vector<8x4xf32>, vector<4x640xf32>, vector<8x640xf32> -> vector<8x640xf32>
    %c1 = arith.constant 1 : index
    %c0_39 = arith.constant 0 : index
    %c0_40 = arith.constant 0 : index
    %36 = vector.load %arg2[%c1, %c0_39, %c0_40] : memref<9x8x4xf32, #tpu.memory_space<vmem>>, vector<1x8x4xf32>
    %37 = vector.shape_cast %36 : vector<1x8x4xf32> to vector<8x4xf32>
    %c0_41 = arith.constant 0 : index
    %c96 = arith.constant 96 : index
    %38 = vector.load %arg15[%c0_41, %c96] : memref<4x896xf32, #tpu.memory_space<vmem>>, vector<4x640xf32>
    %cst_42 = arith.constant dense<0.000000e+00> : vector<8x640xf32>
    %39 = tpu.matmul %37, %38, %cst_42 {dimension_numbers = #tpu.dot_dimension_numbers<[1], [0], [0], [1], [0, 0, 1, 1], [], []>} : vector<8x4xf32>, vector<4x640xf32>, vector<8x640xf32> -> vector<8x640xf32>
    %40 = arith.addf %35, %39 : vector<8x640xf32>
    %c2 = arith.constant 2 : index
    %c0_43 = arith.constant 0 : index
    %c0_44 = arith.constant 0 : index
    %41 = vector.load %arg2[%c2, %c0_43, %c0_44] : memref<9x8x4xf32, #tpu.memory_space<vmem>>, vector<1x8x4xf32>
    %42 = vector.shape_cast %41 : vector<1x8x4xf32> to vector<8x4xf32>
    %c0_45 = arith.constant 0 : index
    %c97 = arith.constant 97 : index
    %43 = vector.load %arg15[%c0_45, %c97] : memref<4x896xf32, #tpu.memory_space<vmem>>, vector<4x640xf32>
    %cst_46 = arith.constant dense<0.000000e+00> : vector<8x640xf32>
    %44 = tpu.matmul %42, %43, %cst_46 {dimension_numbers = #tpu.dot_dimension_numbers<[1], [0], [0], [1], [0, 0, 1, 1], [], []>} : vector<8x4xf32>, vector<4x640xf32>, vector<8x640xf32> -> vector<8x640xf32>
    %45 = arith.addf %40, %44 : vector<8x640xf32>
    %c3 = arith.constant 3 : index
    %c0_47 = arith.constant 0 : index
    %c0_48 = arith.constant 0 : index
    %46 = vector.load %arg2[%c3, %c0_47, %c0_48] : memref<9x8x4xf32, #tpu.memory_space<vmem>>, vector<1x8x4xf32>
    %47 = vector.shape_cast %46 : vector<1x8x4xf32> to vector<8x4xf32>
    %c0_49 = arith.constant 0 : index
    %c127 = arith.constant 127 : index
    %48 = vector.load %arg15[%c0_49, %c127] : memref<4x896xf32, #tpu.memory_space<vmem>>, vector<4x640xf32>
    %cst_50 = arith.constant dense<0.000000e+00> : vector<8x640xf32>
    %49 = tpu.matmul %47, %48, %cst_50 {dimension_numbers = #tpu.dot_dimension_numbers<[1], [0], [0], [1], [0, 0, 1, 1], [], []>} : vector<8x4xf32>, vector<4x640xf32>, vector<8x640xf32> -> vector<8x640xf32>
    %50 = arith.addf %45, %49 : vector<8x640xf32>
    %c4 = arith.constant 4 : index
    %c0_51 = arith.constant 0 : index
    %c0_52 = arith.constant 0 : index
    %51 = vector.load %arg2[%c4, %c0_51, %c0_52] : memref<9x8x4xf32, #tpu.memory_space<vmem>>, vector<1x8x4xf32>
    %52 = vector.shape_cast %51 : vector<1x8x4xf32> to vector<8x4xf32>
    %c0_53 = arith.constant 0 : index
    %c128_54 = arith.constant 128 : index
    %53 = vector.load %arg15[%c0_53, %c128_54] : memref<4x896xf32, #tpu.memory_space<vmem>>, vector<4x640xf32>
    %cst_55 = arith.constant dense<0.000000e+00> : vector<8x640xf32>
    %54 = tpu.matmul %52, %53, %cst_55 {dimension_numbers = #tpu.dot_dimension_numbers<[1], [0], [0], [1], [0, 0, 1, 1], [], []>} : vector<8x4xf32>, vector<4x640xf32>, vector<8x640xf32> -> vector<8x640xf32>
    %55 = arith.addf %50, %54 : vector<8x640xf32>
    %c5 = arith.constant 5 : index
    %c0_56 = arith.constant 0 : index
    %c0_57 = arith.constant 0 : index
    %56 = vector.load %arg2[%c5, %c0_56, %c0_57] : memref<9x8x4xf32, #tpu.memory_space<vmem>>, vector<1x8x4xf32>
    %57 = vector.shape_cast %56 : vector<1x8x4xf32> to vector<8x4xf32>
    %c0_58 = arith.constant 0 : index
    %c129 = arith.constant 129 : index
    %58 = vector.load %arg15[%c0_58, %c129] : memref<4x896xf32, #tpu.memory_space<vmem>>, vector<4x640xf32>
    %cst_59 = arith.constant dense<0.000000e+00> : vector<8x640xf32>
    %59 = tpu.matmul %57, %58, %cst_59 {dimension_numbers = #tpu.dot_dimension_numbers<[1], [0], [0], [1], [0, 0, 1, 1], [], []>} : vector<8x4xf32>, vector<4x640xf32>, vector<8x640xf32> -> vector<8x640xf32>
    %60 = arith.addf %55, %59 : vector<8x640xf32>
    %c6 = arith.constant 6 : index
    %c0_60 = arith.constant 0 : index
    %c0_61 = arith.constant 0 : index
    %61 = vector.load %arg2[%c6, %c0_60, %c0_61] : memref<9x8x4xf32, #tpu.memory_space<vmem>>, vector<1x8x4xf32>
    %62 = vector.shape_cast %61 : vector<1x8x4xf32> to vector<8x4xf32>
    %c0_62 = arith.constant 0 : index
    %c159 = arith.constant 159 : index
    %63 = vector.load %arg15[%c0_62, %c159] : memref<4x896xf32, #tpu.memory_space<vmem>>, vector<4x640xf32>
    %cst_63 = arith.constant dense<0.000000e+00> : vector<8x640xf32>
    %64 = tpu.matmul %62, %63, %cst_63 {dimension_numbers = #tpu.dot_dimension_numbers<[1], [0], [0], [1], [0, 0, 1, 1], [], []>} : vector<8x4xf32>, vector<4x640xf32>, vector<8x640xf32> -> vector<8x640xf32>
    %65 = arith.addf %60, %64 : vector<8x640xf32>
    %c7 = arith.constant 7 : index
    %c0_64 = arith.constant 0 : index
    %c0_65 = arith.constant 0 : index
    %66 = vector.load %arg2[%c7, %c0_64, %c0_65] : memref<9x8x4xf32, #tpu.memory_space<vmem>>, vector<1x8x4xf32>
    %67 = vector.shape_cast %66 : vector<1x8x4xf32> to vector<8x4xf32>
    %c0_66 = arith.constant 0 : index
    %c160 = arith.constant 160 : index
    %68 = vector.load %arg15[%c0_66, %c160] : memref<4x896xf32, #tpu.memory_space<vmem>>, vector<4x640xf32>
    %cst_67 = arith.constant dense<0.000000e+00> : vector<8x640xf32>
    %69 = tpu.matmul %67, %68, %cst_67 {dimension_numbers = #tpu.dot_dimension_numbers<[1], [0], [0], [1], [0, 0, 1, 1], [], []>} : vector<8x4xf32>, vector<4x640xf32>, vector<8x640xf32> -> vector<8x640xf32>
    %70 = arith.addf %65, %69 : vector<8x640xf32>
    %c8 = arith.constant 8 : index
    %c0_68 = arith.constant 0 : index
    %c0_69 = arith.constant 0 : index
    %71 = vector.load %arg2[%c8, %c0_68, %c0_69] : memref<9x8x4xf32, #tpu.memory_space<vmem>>, vector<1x8x4xf32>
    %72 = vector.shape_cast %71 : vector<1x8x4xf32> to vector<8x4xf32>
    %c0_70 = arith.constant 0 : index
    %c161 = arith.constant 161 : index
    %73 = vector.load %arg15[%c0_70, %c161] : memref<4x896xf32, #tpu.memory_space<vmem>>, vector<4x640xf32>
    %cst_71 = arith.constant dense<0.000000e+00> : vector<8x640xf32>
    %74 = tpu.matmul %72, %73, %cst_71 {dimension_numbers = #tpu.dot_dimension_numbers<[1], [0], [0], [1], [0, 0, 1, 1], [], []>} : vector<8x4xf32>, vector<4x640xf32>, vector<8x640xf32> -> vector<8x640xf32>
    %75 = arith.addf %70, %74 : vector<8x640xf32>
    %76 = vector.broadcast %11 : vector<8x1xf32> to vector<8x640xf32>
    %77 = arith.addf %75, %76 : vector<8x640xf32>
    %cst_72 = arith.constant 0.000000e+00 : f32
    %78 = vector.broadcast %cst_72 : f32 to vector<8x640xf32>
    %79 = arith.maximumf %77, %78 : vector<8x640xf32>
    %cst_73 = arith.constant 0.000000e+00 : f32
    %80 = vector.shape_cast %10 : vector<1x640xi1> to vector<1x640xi1>
    %81 = vector.broadcast %80 : vector<1x640xi1> to vector<8x640xi1>
    %82 = vector.broadcast %cst_73 : f32 to vector<8x640xf32>
    %83 = arith.select %81, %79, %82 : vector<8x640xi1>, vector<8x640xf32>
    %c0_74 = arith.constant 0 : index
    %c128_75 = arith.constant 128 : index
    %84 = vector.load %arg16[%c0_74, %c128_75] : memref<8x896xf32, #tpu.memory_space<vmem>>, vector<8x640xf32>
    tpu.vector_store %arg16[%c0_74, %c128_75], %83 {strides = array<i32>} : memref<8x896xf32, #tpu.memory_space<vmem>>, vector<8x640xf32>,
    %c0_76 = arith.constant 0 : index
    %c0_77 = arith.constant 0 : index
    %c0_78 = arith.constant 0 : index
    %85 = vector.load %arg4[%c0_76, %c0_77, %c0_78] : memref<9x8x8xf32, #tpu.memory_space<vmem>>, vector<1x8x8xf32>
    %86 = vector.shape_cast %85 : vector<1x8x8xf32> to vector<8x8xf32>
    %c0_79 = arith.constant 0 : index
    %c95_80 = arith.constant 95 : index
    %87 = vector.load %arg16[%c0_79, %c95_80] : memref<8x896xf32, #tpu.memory_space<vmem>>, vector<8x640xf32>
    %cst_81 = arith.constant dense<0.000000e+00> : vector<8x640xf32>
    %88 = tpu.matmul %86, %87, %cst_81 {dimension_numbers = #tpu.dot_dimension_numbers<[1], [0], [0], [1], [0, 0, 1, 1], [], []>} : vector<8x8xf32>, vector<8x640xf32>, vector<8x640xf32> -> vector<8x640xf32>
    %c1_82 = arith.constant 1 : index
    %c0_83 = arith.constant 0 : index
    %c0_84 = arith.constant 0 : index
    %89 = vector.load %arg4[%c1_82, %c0_83, %c0_84] : memref<9x8x8xf32, #tpu.memory_space<vmem>>, vector<1x8x8xf32>
    %90 = vector.shape_cast %89 : vector<1x8x8xf32> to vector<8x8xf32>
    %c0_85 = arith.constant 0 : index
    %c96_86 = arith.constant 96 : index
    %91 = vector.load %arg16[%c0_85, %c96_86] : memref<8x896xf32, #tpu.memory_space<vmem>>, vector<8x640xf32>
    %cst_87 = arith.constant dense<0.000000e+00> : vector<8x640xf32>
    %92 = tpu.matmul %90, %91, %cst_87 {dimension_numbers = #tpu.dot_dimension_numbers<[1], [0], [0], [1], [0, 0, 1, 1], [], []>} : vector<8x8xf32>, vector<8x640xf32>, vector<8x640xf32> -> vector<8x640xf32>
    %93 = arith.addf %88, %92 : vector<8x640xf32>
    %c2_88 = arith.constant 2 : index
    %c0_89 = arith.constant 0 : index
    %c0_90 = arith.constant 0 : index
    %94 = vector.load %arg4[%c2_88, %c0_89, %c0_90] : memref<9x8x8xf32, #tpu.memory_space<vmem>>, vector<1x8x8xf32>
    %95 = vector.shape_cast %94 : vector<1x8x8xf32> to vector<8x8xf32>
    %c0_91 = arith.constant 0 : index
    %c97_92 = arith.constant 97 : index
    %96 = vector.load %arg16[%c0_91, %c97_92] : memref<8x896xf32, #tpu.memory_space<vmem>>, vector<8x640xf32>
    %cst_93 = arith.constant dense<0.000000e+00> : vector<8x640xf32>
    %97 = tpu.matmul %95, %96, %cst_93 {dimension_numbers = #tpu.dot_dimension_numbers<[1], [0], [0], [1], [0, 0, 1, 1], [], []>} : vector<8x8xf32>, vector<8x640xf32>, vector<8x640xf32> -> vector<8x640xf32>
    %98 = arith.addf %93, %97 : vector<8x640xf32>
    %c3_94 = arith.constant 3 : index
    %c0_95 = arith.constant 0 : index
    %c0_96 = arith.constant 0 : index
    %99 = vector.load %arg4[%c3_94, %c0_95, %c0_96] : memref<9x8x8xf32, #tpu.memory_space<vmem>>, vector<1x8x8xf32>
    %100 = vector.shape_cast %99 : vector<1x8x8xf32> to vector<8x8xf32>
    %c0_97 = arith.constant 0 : index
    %c127_98 = arith.constant 127 : index
    %101 = vector.load %arg16[%c0_97, %c127_98] : memref<8x896xf32, #tpu.memory_space<vmem>>, vector<8x640xf32>
    %cst_99 = arith.constant dense<0.000000e+00> : vector<8x640xf32>
    %102 = tpu.matmul %100, %101, %cst_99 {dimension_numbers = #tpu.dot_dimension_numbers<[1], [0], [0], [1], [0, 0, 1, 1], [], []>} : vector<8x8xf32>, vector<8x640xf32>, vector<8x640xf32> -> vector<8x640xf32>
    %103 = arith.addf %98, %102 : vector<8x640xf32>
    %c4_100 = arith.constant 4 : index
    %c0_101 = arith.constant 0 : index
    %c0_102 = arith.constant 0 : index
    %104 = vector.load %arg4[%c4_100, %c0_101, %c0_102] : memref<9x8x8xf32, #tpu.memory_space<vmem>>, vector<1x8x8xf32>
    %105 = vector.shape_cast %104 : vector<1x8x8xf32> to vector<8x8xf32>
    %c0_103 = arith.constant 0 : index
    %c128_104 = arith.constant 128 : index
    %106 = vector.load %arg16[%c0_103, %c128_104] : memref<8x896xf32, #tpu.memory_space<vmem>>, vector<8x640xf32>
    %cst_105 = arith.constant dense<0.000000e+00> : vector<8x640xf32>
    %107 = tpu.matmul %105, %106, %cst_105 {dimension_numbers = #tpu.dot_dimension_numbers<[1], [0], [0], [1], [0, 0, 1, 1], [], []>} : vector<8x8xf32>, vector<8x640xf32>, vector<8x640xf32> -> vector<8x640xf32>
    %108 = arith.addf %103, %107 : vector<8x640xf32>
    %c5_106 = arith.constant 5 : index
    %c0_107 = arith.constant 0 : index
    %c0_108 = arith.constant 0 : index
    %109 = vector.load %arg4[%c5_106, %c0_107, %c0_108] : memref<9x8x8xf32, #tpu.memory_space<vmem>>, vector<1x8x8xf32>
    %110 = vector.shape_cast %109 : vector<1x8x8xf32> to vector<8x8xf32>
    %c0_109 = arith.constant 0 : index
    %c129_110 = arith.constant 129 : index
    %111 = vector.load %arg16[%c0_109, %c129_110] : memref<8x896xf32, #tpu.memory_space<vmem>>, vector<8x640xf32>
    %cst_111 = arith.constant dense<0.000000e+00> : vector<8x640xf32>
    %112 = tpu.matmul %110, %111, %cst_111 {dimension_numbers = #tpu.dot_dimension_numbers<[1], [0], [0], [1], [0, 0, 1, 1], [], []>} : vector<8x8xf32>, vector<8x640xf32>, vector<8x640xf32> -> vector<8x640xf32>
    %113 = arith.addf %108, %112 : vector<8x640xf32>
    %c6_112 = arith.constant 6 : index
    %c0_113 = arith.constant 0 : index
    %c0_114 = arith.constant 0 : index
    %114 = vector.load %arg4[%c6_112, %c0_113, %c0_114] : memref<9x8x8xf32, #tpu.memory_space<vmem>>, vector<1x8x8xf32>
    %115 = vector.shape_cast %114 : vector<1x8x8xf32> to vector<8x8xf32>
    %c0_115 = arith.constant 0 : index
    %c159_116 = arith.constant 159 : index
    %116 = vector.load %arg16[%c0_115, %c159_116] : memref<8x896xf32, #tpu.memory_space<vmem>>, vector<8x640xf32>
    %cst_117 = arith.constant dense<0.000000e+00> : vector<8x640xf32>
    %117 = tpu.matmul %115, %116, %cst_117 {dimension_numbers = #tpu.dot_dimension_numbers<[1], [0], [0], [1], [0, 0, 1, 1], [], []>} : vector<8x8xf32>, vector<8x640xf32>, vector<8x640xf32> -> vector<8x640xf32>
    %118 = arith.addf %113, %117 : vector<8x640xf32>
    %c7_118 = arith.constant 7 : index
    %c0_119 = arith.constant 0 : index
    %c0_120 = arith.constant 0 : index
    %119 = vector.load %arg4[%c7_118, %c0_119, %c0_120] : memref<9x8x8xf32, #tpu.memory_space<vmem>>, vector<1x8x8xf32>
    %120 = vector.shape_cast %119 : vector<1x8x8xf32> to vector<8x8xf32>
    %c0_121 = arith.constant 0 : index
    %c160_122 = arith.constant 160 : index
    %121 = vector.load %arg16[%c0_121, %c160_122] : memref<8x896xf32, #tpu.memory_space<vmem>>, vector<8x640xf32>
    %cst_123 = arith.constant dense<0.000000e+00> : vector<8x640xf32>
    %122 = tpu.matmul %120, %121, %cst_123 {dimension_numbers = #tpu.dot_dimension_numbers<[1], [0], [0], [1], [0, 0, 1, 1], [], []>} : vector<8x8xf32>, vector<8x640xf32>, vector<8x640xf32> -> vector<8x640xf32>
    %123 = arith.addf %118, %122 : vector<8x640xf32>
    %c8_124 = arith.constant 8 : index
    %c0_125 = arith.constant 0 : index
    %c0_126 = arith.constant 0 : index
    %124 = vector.load %arg4[%c8_124, %c0_125, %c0_126] : memref<9x8x8xf32, #tpu.memory_space<vmem>>, vector<1x8x8xf32>
    %125 = vector.shape_cast %124 : vector<1x8x8xf32> to vector<8x8xf32>
    %c0_127 = arith.constant 0 : index
    %c161_128 = arith.constant 161 : index
    %126 = vector.load %arg16[%c0_127, %c161_128] : memref<8x896xf32, #tpu.memory_space<vmem>>, vector<8x640xf32>
    %cst_129 = arith.constant dense<0.000000e+00> : vector<8x640xf32>
    %127 = tpu.matmul %125, %126, %cst_129 {dimension_numbers = #tpu.dot_dimension_numbers<[1], [0], [0], [1], [0, 0, 1, 1], [], []>} : vector<8x8xf32>, vector<8x640xf32>, vector<8x640xf32> -> vector<8x640xf32>
    %128 = arith.addf %123, %127 : vector<8x640xf32>
    %cst_130 = arith.constant dense<0.000000e+00> : vector<8x640xf32>
    %129 = tpu.matmul %13, %20, %cst_130 {dimension_numbers = #tpu.dot_dimension_numbers<[1], [0], [0], [1], [0, 0, 1, 1], [], []>} : vector<8x4xf32>, vector<4x640xf32>, vector<8x640xf32> -> vector<8x640xf32>
    %130 = vector.broadcast %16 : vector<8x1xf32> to vector<8x640xf32>
    %131 = arith.mulf %129, %130 : vector<8x640xf32>
    %132 = vector.broadcast %17 : vector<8x1xf32> to vector<8x640xf32>
    %133 = arith.addf %131, %132 : vector<8x640xf32>
    %134 = vector.broadcast %12 : vector<8x1xf32> to vector<8x640xf32>
    %135 = arith.addf %128, %134 : vector<8x640xf32>
    %136 = arith.addf %135, %133 : vector<8x640xf32>
    %c0_131 = arith.constant 0 : index
    %c0_132 = arith.constant 0 : index
    %c0_133 = arith.constant 0 : index
    %137 = vector.load %arg13[%c0_131, %c0_132, %c0_133] : memref<1x8x640xf32, #tpu.memory_space<vmem>>, vector<1x8x640xf32>
    %138 = vector.shape_cast %137 : vector<1x8x640xf32> to vector<8x640xf32>
    %139 = vector.shape_cast %136 : vector<8x640xf32> to vector<1x8x640xf32>
    tpu.vector_store %arg13[%c0_131, %c0_132, %c0_133], %139 {strides = array<i32>} : memref<1x8x640xf32, #tpu.memory_space<vmem>>, vector<1x8x640xf32>,
    %c0_134 = arith.constant 0 : index
    %c0_135 = arith.constant 0 : index
    %c33 = arith.constant 33 : index
    %140 = vector.load %arg13[%c0_134, %c0_135, %c33] : memref<1x8x640xf32, #tpu.memory_space<vmem>>, vector<1x8x16xf32>
    %141 = vector.shape_cast %140 : vector<1x8x16xf32> to vector<8x16xf32>
    %c0_136 = arith.constant 0 : index
    %c0_137 = arith.constant 0 : index
    %c34 = arith.constant 34 : index
    %142 = vector.load %arg13[%c0_136, %c0_137, %c34] : memref<1x8x640xf32, #tpu.memory_space<vmem>>, vector<1x8x16xf32>
    %143 = vector.shape_cast %142 : vector<1x8x16xf32> to vector<8x16xf32>
    %c0_138 = arith.constant 0 : index
    %c0_139 = arith.constant 0 : index
    %c65 = arith.constant 65 : index
    %144 = vector.load %arg13[%c0_138, %c0_139, %c65] : memref<1x8x640xf32, #tpu.memory_space<vmem>>, vector<1x8x16xf32>
    %145 = vector.shape_cast %144 : vector<1x8x16xf32> to vector<8x16xf32>
    %c0_140 = arith.constant 0 : index
    %c0_141 = arith.constant 0 : index
    %c66 = arith.constant 66 : index
    %146 = vector.load %arg13[%c0_140, %c0_141, %c66] : memref<1x8x640xf32, #tpu.memory_space<vmem>>, vector<1x8x16xf32>
    %147 = vector.shape_cast %146 : vector<1x8x16xf32> to vector<8x16xf32>
    %148 = arith.maximumf %141, %143 : vector<8x16xf32>
    %149 = arith.maximumf %145, %147 : vector<8x16xf32>
    %150 = arith.maximumf %148, %149 : vector<8x16xf32>
    %cst_142 = arith.constant dense<0.000000e+00> : vector<8x8xf32>
    %151 = tpu.matmul %150, %18, %cst_142 {dimension_numbers = #tpu.dot_dimension_numbers<[1], [0], [0], [1], [0, 0, 1, 1], [], []>} : vector<8x16xf32>, vector<16x8xf32>, vector<8x8xf32> -> vector<8x8xf32>
    %c0_143 = arith.constant 0 : index
    %c0_144 = arith.constant 0 : index
    %c97_145 = arith.constant 97 : index
    %152 = vector.load %arg13[%c0_143, %c0_144, %c97_145] : memref<1x8x640xf32, #tpu.memory_space<vmem>>, vector<1x8x16xf32>
    %153 = vector.shape_cast %152 : vector<1x8x16xf32> to vector<8x16xf32>
    %c0_146 = arith.constant 0 : index
    %c0_147 = arith.constant 0 : index
    %c98 = arith.constant 98 : index
    %154 = vector.load %arg13[%c0_146, %c0_147, %c98] : memref<1x8x640xf32, #tpu.memory_space<vmem>>, vector<1x8x16xf32>
    %155 = vector.shape_cast %154 : vector<1x8x16xf32> to vector<8x16xf32>
    %c0_148 = arith.constant 0 : index
    %c0_149 = arith.constant 0 : index
    %c129_150 = arith.constant 129 : index
    %156 = vector.load %arg13[%c0_148, %c0_149, %c129_150] : memref<1x8x640xf32, #tpu.memory_space<vmem>>, vector<1x8x16xf32>
    %157 = vector.shape_cast %156 : vector<1x8x16xf32> to vector<8x16xf32>
    %c0_151 = arith.constant 0 : index
    %c0_152 = arith.constant 0 : index
    %c130 = arith.constant 130 : index
    %158 = vector.load %arg13[%c0_151, %c0_152, %c130] : memref<1x8x640xf32, #tpu.memory_space<vmem>>, vector<1x8x16xf32>
    %159 = vector.shape_cast %158 : vector<1x8x16xf32> to vector<8x16xf32>
    %160 = arith.maximumf %153, %155 : vector<8x16xf32>
    %161 = arith.maximumf %157, %159 : vector<8x16xf32>
    %162 = arith.maximumf %160, %161 : vector<8x16xf32>
    %cst_153 = arith.constant dense<0.000000e+00> : vector<8x8xf32>
    %163 = tpu.matmul %162, %18, %cst_153 {dimension_numbers = #tpu.dot_dimension_numbers<[1], [0], [0], [1], [0, 0, 1, 1], [], []>} : vector<8x16xf32>, vector<16x8xf32>, vector<8x8xf32> -> vector<8x8xf32>
    %c0_154 = arith.constant 0 : index
    %c0_155 = arith.constant 0 : index
    %c161_156 = arith.constant 161 : index
    %164 = vector.load %arg13[%c0_154, %c0_155, %c161_156] : memref<1x8x640xf32, #tpu.memory_space<vmem>>, vector<1x8x16xf32>
    %165 = vector.shape_cast %164 : vector<1x8x16xf32> to vector<8x16xf32>
    %c0_157 = arith.constant 0 : index
    %c0_158 = arith.constant 0 : index
    %c162 = arith.constant 162 : index
    %166 = vector.load %arg13[%c0_157, %c0_158, %c162] : memref<1x8x640xf32, #tpu.memory_space<vmem>>, vector<1x8x16xf32>
    %167 = vector.shape_cast %166 : vector<1x8x16xf32> to vector<8x16xf32>
    %c0_159 = arith.constant 0 : index
    %c0_160 = arith.constant 0 : index
    %c193 = arith.constant 193 : index
    %168 = vector.load %arg13[%c0_159, %c0_160, %c193] : memref<1x8x640xf32, #tpu.memory_space<vmem>>, vector<1x8x16xf32>
    %169 = vector.shape_cast %168 : vector<1x8x16xf32> to vector<8x16xf32>
    %c0_161 = arith.constant 0 : index
    %c0_162 = arith.constant 0 : index
    %c194 = arith.constant 194 : index
    %170 = vector.load %arg13[%c0_161, %c0_162, %c194] : memref<1x8x640xf32, #tpu.memory_space<vmem>>, vector<1x8x16xf32>
    %171 = vector.shape_cast %170 : vector<1x8x16xf32> to vector<8x16xf32>
    %172 = arith.maximumf %165, %167 : vector<8x16xf32>
    %173 = arith.maximumf %169, %171 : vector<8x16xf32>
    %174 = arith.maximumf %172, %173 : vector<8x16xf32>
    %cst_163 = arith.constant dense<0.000000e+00> : vector<8x8xf32>
    %175 = tpu.matmul %174, %18, %cst_163 {dimension_numbers = #tpu.dot_dimension_numbers<[1], [0], [0], [1], [0, 0, 1, 1], [], []>} : vector<8x16xf32>, vector<16x8xf32>, vector<8x8xf32> -> vector<8x8xf32>
    %c0_164 = arith.constant 0 : index
    %c0_165 = arith.constant 0 : index
    %c225 = arith.constant 225 : index
    %176 = vector.load %arg13[%c0_164, %c0_165, %c225] : memref<1x8x640xf32, #tpu.memory_space<vmem>>, vector<1x8x16xf32>
    %177 = vector.shape_cast %176 : vector<1x8x16xf32> to vector<8x16xf32>
    %c0_166 = arith.constant 0 : index
    %c0_167 = arith.constant 0 : index
    %c226 = arith.constant 226 : index
    %178 = vector.load %arg13[%c0_166, %c0_167, %c226] : memref<1x8x640xf32, #tpu.memory_space<vmem>>, vector<1x8x16xf32>
    %179 = vector.shape_cast %178 : vector<1x8x16xf32> to vector<8x16xf32>
    %c0_168 = arith.constant 0 : index
    %c0_169 = arith.constant 0 : index
    %c257 = arith.constant 257 : index
    %180 = vector.load %arg13[%c0_168, %c0_169, %c257] : memref<1x8x640xf32, #tpu.memory_space<vmem>>, vector<1x8x16xf32>
    %181 = vector.shape_cast %180 : vector<1x8x16xf32> to vector<8x16xf32>
    %c0_170 = arith.constant 0 : index
    %c0_171 = arith.constant 0 : index
    %c258 = arith.constant 258 : index
    %182 = vector.load %arg13[%c0_170, %c0_171, %c258] : memref<1x8x640xf32, #tpu.memory_space<vmem>>, vector<1x8x16xf32>
    %183 = vector.shape_cast %182 : vector<1x8x16xf32> to vector<8x16xf32>
    %184 = arith.maximumf %177, %179 : vector<8x16xf32>
    %185 = arith.maximumf %181, %183 : vector<8x16xf32>
    %186 = arith.maximumf %184, %185 : vector<8x16xf32>
    %cst_172 = arith.constant dense<0.000000e+00> : vector<8x8xf32>
    %187 = tpu.matmul %186, %18, %cst_172 {dimension_numbers = #tpu.dot_dimension_numbers<[1], [0], [0], [1], [0, 0, 1, 1], [], []>} : vector<8x16xf32>, vector<16x8xf32>, vector<8x8xf32> -> vector<8x8xf32>
    %c0_173 = arith.constant 0 : index
    %c0_174 = arith.constant 0 : index
    %c289 = arith.constant 289 : index
    %188 = vector.load %arg13[%c0_173, %c0_174, %c289] : memref<1x8x640xf32, #tpu.memory_space<vmem>>, vector<1x8x16xf32>
    %189 = vector.shape_cast %188 : vector<1x8x16xf32> to vector<8x16xf32>
    %c0_175 = arith.constant 0 : index
    %c0_176 = arith.constant 0 : index
    %c290 = arith.constant 290 : index
    %190 = vector.load %arg13[%c0_175, %c0_176, %c290] : memref<1x8x640xf32, #tpu.memory_space<vmem>>, vector<1x8x16xf32>
    %191 = vector.shape_cast %190 : vector<1x8x16xf32> to vector<8x16xf32>
    %c0_177 = arith.constant 0 : index
    %c0_178 = arith.constant 0 : index
    %c321 = arith.constant 321 : index
    %192 = vector.load %arg13[%c0_177, %c0_178, %c321] : memref<1x8x640xf32, #tpu.memory_space<vmem>>, vector<1x8x16xf32>
    %193 = vector.shape_cast %192 : vector<1x8x16xf32> to vector<8x16xf32>
    %c0_179 = arith.constant 0 : index
    %c0_180 = arith.constant 0 : index
    %c322 = arith.constant 322 : index
    %194 = vector.load %arg13[%c0_179, %c0_180, %c322] : memref<1x8x640xf32, #tpu.memory_space<vmem>>, vector<1x8x16xf32>
    %195 = vector.shape_cast %194 : vector<1x8x16xf32> to vector<8x16xf32>
    %196 = arith.maximumf %189, %191 : vector<8x16xf32>
    %197 = arith.maximumf %193, %195 : vector<8x16xf32>
    %198 = arith.maximumf %196, %197 : vector<8x16xf32>
    %cst_181 = arith.constant dense<0.000000e+00> : vector<8x8xf32>
    %199 = tpu.matmul %198, %18, %cst_181 {dimension_numbers = #tpu.dot_dimension_numbers<[1], [0], [0], [1], [0, 0, 1, 1], [], []>} : vector<8x16xf32>, vector<16x8xf32>, vector<8x8xf32> -> vector<8x8xf32>
    %c0_182 = arith.constant 0 : index
    %c0_183 = arith.constant 0 : index
    %c353 = arith.constant 353 : index
    %200 = vector.load %arg13[%c0_182, %c0_183, %c353] : memref<1x8x640xf32, #tpu.memory_space<vmem>>, vector<1x8x16xf32>
    %201 = vector.shape_cast %200 : vector<1x8x16xf32> to vector<8x16xf32>
    %c0_184 = arith.constant 0 : index
    %c0_185 = arith.constant 0 : index
    %c354 = arith.constant 354 : index
    %202 = vector.load %arg13[%c0_184, %c0_185, %c354] : memref<1x8x640xf32, #tpu.memory_space<vmem>>, vector<1x8x16xf32>
    %203 = vector.shape_cast %202 : vector<1x8x16xf32> to vector<8x16xf32>
    %c0_186 = arith.constant 0 : index
    %c0_187 = arith.constant 0 : index
    %c385 = arith.constant 385 : index
    %204 = vector.load %arg13[%c0_186, %c0_187, %c385] : memref<1x8x640xf32, #tpu.memory_space<vmem>>, vector<1x8x16xf32>
    %205 = vector.shape_cast %204 : vector<1x8x16xf32> to vector<8x16xf32>
    %c0_188 = arith.constant 0 : index
    %c0_189 = arith.constant 0 : index
    %c386 = arith.constant 386 : index
    %206 = vector.load %arg13[%c0_188, %c0_189, %c386] : memref<1x8x640xf32, #tpu.memory_space<vmem>>, vector<1x8x16xf32>
    %207 = vector.shape_cast %206 : vector<1x8x16xf32> to vector<8x16xf32>
    %208 = arith.maximumf %201, %203 : vector<8x16xf32>
    %209 = arith.maximumf %205, %207 : vector<8x16xf32>
    %210 = arith.maximumf %208, %209 : vector<8x16xf32>
    %cst_190 = arith.constant dense<0.000000e+00> : vector<8x8xf32>
    %211 = tpu.matmul %210, %18, %cst_190 {dimension_numbers = #tpu.dot_dimension_numbers<[1], [0], [0], [1], [0, 0, 1, 1], [], []>} : vector<8x16xf32>, vector<16x8xf32>, vector<8x8xf32> -> vector<8x8xf32>
    %c0_191 = arith.constant 0 : index
    %c0_192 = arith.constant 0 : index
    %c417 = arith.constant 417 : index
    %212 = vector.load %arg13[%c0_191, %c0_192, %c417] : memref<1x8x640xf32, #tpu.memory_space<vmem>>, vector<1x8x16xf32>
    %213 = vector.shape_cast %212 : vector<1x8x16xf32> to vector<8x16xf32>
    %c0_193 = arith.constant 0 : index
    %c0_194 = arith.constant 0 : index
    %c418 = arith.constant 418 : index
    %214 = vector.load %arg13[%c0_193, %c0_194, %c418] : memref<1x8x640xf32, #tpu.memory_space<vmem>>, vector<1x8x16xf32>
    %215 = vector.shape_cast %214 : vector<1x8x16xf32> to vector<8x16xf32>
    %c0_195 = arith.constant 0 : index
    %c0_196 = arith.constant 0 : index
    %c449 = arith.constant 449 : index
    %216 = vector.load %arg13[%c0_195, %c0_196, %c449] : memref<1x8x640xf32, #tpu.memory_space<vmem>>, vector<1x8x16xf32>
    %217 = vector.shape_cast %216 : vector<1x8x16xf32> to vector<8x16xf32>
    %c0_197 = arith.constant 0 : index
    %c0_198 = arith.constant 0 : index
    %c450 = arith.constant 450 : index
    %218 = vector.load %arg13[%c0_197, %c0_198, %c450] : memref<1x8x640xf32, #tpu.memory_space<vmem>>, vector<1x8x16xf32>
    %219 = vector.shape_cast %218 : vector<1x8x16xf32> to vector<8x16xf32>
    %220 = arith.maximumf %213, %215 : vector<8x16xf32>
    %221 = arith.maximumf %217, %219 : vector<8x16xf32>
    %222 = arith.maximumf %220, %221 : vector<8x16xf32>
    %cst_199 = arith.constant dense<0.000000e+00> : vector<8x8xf32>
    %223 = tpu.matmul %222, %18, %cst_199 {dimension_numbers = #tpu.dot_dimension_numbers<[1], [0], [0], [1], [0, 0, 1, 1], [], []>} : vector<8x16xf32>, vector<16x8xf32>, vector<8x8xf32> -> vector<8x8xf32>
    %c0_200 = arith.constant 0 : index
    %c0_201 = arith.constant 0 : index
    %c481 = arith.constant 481 : index
    %224 = vector.load %arg13[%c0_200, %c0_201, %c481] : memref<1x8x640xf32, #tpu.memory_space<vmem>>, vector<1x8x16xf32>
    %225 = vector.shape_cast %224 : vector<1x8x16xf32> to vector<8x16xf32>
    %c0_202 = arith.constant 0 : index
    %c0_203 = arith.constant 0 : index
    %c482 = arith.constant 482 : index
    %226 = vector.load %arg13[%c0_202, %c0_203, %c482] : memref<1x8x640xf32, #tpu.memory_space<vmem>>, vector<1x8x16xf32>
    %227 = vector.shape_cast %226 : vector<1x8x16xf32> to vector<8x16xf32>
    %c0_204 = arith.constant 0 : index
    %c0_205 = arith.constant 0 : index
    %c513 = arith.constant 513 : index
    %228 = vector.load %arg13[%c0_204, %c0_205, %c513] : memref<1x8x640xf32, #tpu.memory_space<vmem>>, vector<1x8x16xf32>
    %229 = vector.shape_cast %228 : vector<1x8x16xf32> to vector<8x16xf32>
    %c0_206 = arith.constant 0 : index
    %c0_207 = arith.constant 0 : index
    %c514 = arith.constant 514 : index
    %230 = vector.load %arg13[%c0_206, %c0_207, %c514] : memref<1x8x640xf32, #tpu.memory_space<vmem>>, vector<1x8x16xf32>
    %231 = vector.shape_cast %230 : vector<1x8x16xf32> to vector<8x16xf32>
    %232 = arith.maximumf %225, %227 : vector<8x16xf32>
    %233 = arith.maximumf %229, %231 : vector<8x16xf32>
    %234 = arith.maximumf %232, %233 : vector<8x16xf32>
    %cst_208 = arith.constant dense<0.000000e+00> : vector<8x8xf32>
    %235 = tpu.matmul %234, %18, %cst_208 {dimension_numbers = #tpu.dot_dimension_numbers<[1], [0], [0], [1], [0, 0, 1, 1], [], []>} : vector<8x16xf32>, vector<16x8xf32>, vector<8x8xf32> -> vector<8x8xf32>
    %236 = tpu.concatenate %151, %163, %175, %187, %199, %211, %223, %235 in 1 : vector<8x8xf32>, vector<8x8xf32>, vector<8x8xf32>, vector<8x8xf32>, vector<8x8xf32>, vector<8x8xf32>, vector<8x8xf32>, vector<8x8xf32> -> vector<8x64xf32>
    %cst_209 = arith.constant 0.000000e+00 : f32
    %237 = vector.broadcast %cst_209 : f32 to vector<8x64xf32>
    %238 = tpu.concatenate %236, %237 in 1 : vector<8x64xf32>, vector<8x64xf32> -> vector<8x128xf32>
    %c0_210 = arith.constant 0 : index
    %c0_211 = arith.constant 0 : index
    %c0_212 = arith.constant 0 : index
    %239 = vector.load %arg14[%c0_210, %c0_211, %c0_212] : memref<1x8x128xf32, #tpu.memory_space<vmem>>, vector<1x8x128xf32>
    %240 = vector.shape_cast %239 : vector<1x8x128xf32> to vector<8x128xf32>
    %241 = vector.shape_cast %238 : vector<8x128xf32> to vector<1x8x128xf32>
    tpu.vector_store %arg14[%c0_210, %c0_211, %c0_212], %241 {strides = array<i32>} : memref<1x8x128xf32, #tpu.memory_space<vmem>>, vector<1x8x128xf32>,
    return
  }
  func.func @transform_0(%arg0: i32) -> (i32, i32, i32) {
    %c0_i32 = arith.constant 0 : i32
    %c0_i32_0 = arith.constant 0 : i32
    %c0_i32_1 = arith.constant 0 : i32
    return %arg0, %c0_i32, %c0_i32_0 : i32, i32, i32
  }
  func.func @transform_1(%arg0: i32) -> (i32, i32, i32) {
    %c0_i32 = arith.constant 0 : i32
    %c0_i32_0 = arith.constant 0 : i32
    %c0_i32_1 = arith.constant 0 : i32
    %c0_i32_2 = arith.constant 0 : i32
    return %c0_i32, %c0_i32_0, %c0_i32_1 : i32, i32, i32
  }
  func.func @transform_2(%arg0: i32) -> (i32, i32) {
    %c0_i32 = arith.constant 0 : i32
    %c0_i32_0 = arith.constant 0 : i32
    %c0_i32_1 = arith.constant 0 : i32
    return %c0_i32, %c0_i32_0 : i32, i32
  }
  func.func @transform_3(%arg0: i32) -> (i32, i32, i32) {
    %c0_i32 = arith.constant 0 : i32
    %c0_i32_0 = arith.constant 0 : i32
    %c0_i32_1 = arith.constant 0 : i32
    %c0_i32_2 = arith.constant 0 : i32
    return %c0_i32, %c0_i32_0, %c0_i32_1 : i32, i32, i32
  }
  func.func @transform_4(%arg0: i32) -> (i32, i32) {
    %c0_i32 = arith.constant 0 : i32
    %c0_i32_0 = arith.constant 0 : i32
    %c0_i32_1 = arith.constant 0 : i32
    return %c0_i32, %c0_i32_0 : i32, i32
  }
  func.func @transform_5(%arg0: i32) -> (i32, i32) {
    %c0_i32 = arith.constant 0 : i32
    %c0_i32_0 = arith.constant 0 : i32
    %c0_i32_1 = arith.constant 0 : i32
    return %c0_i32, %c0_i32_0 : i32, i32
  }
  func.func @transform_6(%arg0: i32) -> (i32, i32) {
    %c0_i32 = arith.constant 0 : i32
    %c0_i32_0 = arith.constant 0 : i32
    %c0_i32_1 = arith.constant 0 : i32
    return %c0_i32, %c0_i32_0 : i32, i32
  }
  func.func @transform_7(%arg0: i32) -> (i32, i32) {
    %c0_i32 = arith.constant 0 : i32
    %c0_i32_0 = arith.constant 0 : i32
    %c0_i32_1 = arith.constant 0 : i32
    return %c0_i32, %c0_i32_0 : i32, i32
  }
  func.func @transform_8(%arg0: i32) -> (i32, i32) {
    %c0_i32 = arith.constant 0 : i32
    %c0_i32_0 = arith.constant 0 : i32
    %c0_i32_1 = arith.constant 0 : i32
    return %c0_i32, %c0_i32_0 : i32, i32
  }
  func.func @transform_9(%arg0: i32) -> (i32, i32) {
    %c0_i32 = arith.constant 0 : i32
    %c0_i32_0 = arith.constant 0 : i32
    %c0_i32_1 = arith.constant 0 : i32
    return %c0_i32, %c0_i32_0 : i32, i32
  }
  func.func @transform_10(%arg0: i32) -> (i32, i32) {
    %c0_i32 = arith.constant 0 : i32
    %c0_i32_0 = arith.constant 0 : i32
    %c0_i32_1 = arith.constant 0 : i32
    return %c0_i32, %c0_i32_0 : i32, i32
  }
  func.func @transform_11(%arg0: i32) -> (i32, i32) {
    %c0_i32 = arith.constant 0 : i32
    %c0_i32_0 = arith.constant 0 : i32
    %c0_i32_1 = arith.constant 0 : i32
    return %c0_i32, %c0_i32_0 : i32, i32
  }
  func.func @transform_12(%arg0: i32) -> (i32, i32, i32) {
    %c0_i32 = arith.constant 0 : i32
    %c0_i32_0 = arith.constant 0 : i32
    %c0_i32_1 = arith.constant 0 : i32
    return %arg0, %c0_i32, %c0_i32_0 : i32, i32, i32
  }
  func.func @transform_13(%arg0: i32) -> (i32, i32, i32) {
    %c0_i32 = arith.constant 0 : i32
    %c0_i32_0 = arith.constant 0 : i32
    %c0_i32_1 = arith.constant 0 : i32
    return %arg0, %c0_i32, %c0_i32_0 : i32, i32, i32
  }
}

module attributes {stable_mosaic.version = 11 : i64} {
  func.func @_resblock_kernel(%arg0: i32, %arg1: memref<1x4x640xf32, #tpu.memory_space<vmem>>, %arg2: memref<9x8x4xf32, #tpu.memory_space<vmem>>, %arg3: memref<8x1xf32, #tpu.memory_space<vmem>>, %arg4: memref<9x8x8xf32, #tpu.memory_space<vmem>>, %arg5: memref<8x1xf32, #tpu.memory_space<vmem>>, %arg6: memref<8x4xf32, #tpu.memory_space<vmem>>, %arg7: memref<4x1xf32, #tpu.memory_space<vmem>>, %arg8: memref<4x1xf32, #tpu.memory_space<vmem>>, %arg9: memref<8x1xf32, #tpu.memory_space<vmem>>, %arg10: memref<8x1xf32, #tpu.memory_space<vmem>>, %arg11: memref<1x640xf32, #tpu.memory_space<vmem>>, %arg12: memref<16x8xf32, #tpu.memory_space<vmem>>, %arg13: memref<1x8x640xf32, #tpu.memory_space<vmem>>, %arg14: memref<1x8x128xf32, #tpu.memory_space<vmem>>, %arg15: memref<4x896xf32, #tpu.memory_space<vmem>>, %arg16: memref<8x896xf32, #tpu.memory_space<vmem>>) attributes {dimension_semantics = [#tpu.dimension_semantics<parallel>], iteration_bounds = array<i64: 2>, scalar_prefetch = 0 : i64, scratch_operands = 2 : i64, tpu.core_type = #tpu.core_type<tc>, window_params = [{transform_indices = @transform_0, window_bounds = array<i64: 1, 4, 640>}, {pipeline_mode = #tpu.pipeline_mode<synchronous>, transform_indices = @transform_1, window_bounds = array<i64: 9, 8, 4>}, {pipeline_mode = #tpu.pipeline_mode<synchronous>, transform_indices = @transform_2, window_bounds = array<i64: 8, 1>}, {pipeline_mode = #tpu.pipeline_mode<synchronous>, transform_indices = @transform_3, window_bounds = array<i64: 9, 8, 8>}, {pipeline_mode = #tpu.pipeline_mode<synchronous>, transform_indices = @transform_4, window_bounds = array<i64: 8, 1>}, {pipeline_mode = #tpu.pipeline_mode<synchronous>, transform_indices = @transform_5, window_bounds = array<i64: 8, 4>}, {pipeline_mode = #tpu.pipeline_mode<synchronous>, transform_indices = @transform_6, window_bounds = array<i64: 4, 1>}, {pipeline_mode = #tpu.pipeline_mode<synchronous>, transform_indices = @transform_7, window_bounds = array<i64: 4, 1>}, {pipeline_mode = #tpu.pipeline_mode<synchronous>, transform_indices = @transform_8, window_bounds = array<i64: 8, 1>}, {pipeline_mode = #tpu.pipeline_mode<synchronous>, transform_indices = @transform_9, window_bounds = array<i64: 8, 1>}, {pipeline_mode = #tpu.pipeline_mode<synchronous>, transform_indices = @transform_10, window_bounds = array<i64: 1, 640>}, {pipeline_mode = #tpu.pipeline_mode<synchronous>, transform_indices = @transform_11, window_bounds = array<i64: 16, 8>}, {transform_indices = @transform_12, window_bounds = array<i64: 1, 8, 640>}, {transform_indices = @transform_13, window_bounds = array<i64: 1, 8, 128>}]} {
    %cst = arith.constant 0.000000e+00 : f32
    %0 = vector.broadcast %cst : f32 to vector<4x128xf32>
    %c0 = arith.constant 0 : index
    %c0_0 = arith.constant 0 : index
    %1 = vector.load %arg15[%c0, %c0_0] : memref<4x896xf32, #tpu.memory_space<vmem>>, vector<4x128xf32>
    tpu.vector_store %arg15[%c0, %c0_0], %0 {strides = array<i32>} : memref<4x896xf32, #tpu.memory_space<vmem>>, vector<4x128xf32>,
    %cst_1 = arith.constant 0.000000e+00 : f32
    %2 = vector.broadcast %cst_1 : f32 to vector<4x128xf32>
    %c0_2 = arith.constant 0 : index
    %c768 = arith.constant 768 : index
    %3 = vector.load %arg15[%c0_2, %c768] : memref<4x896xf32, #tpu.memory_space<vmem>>, vector<4x128xf32>
    tpu.vector_store %arg15[%c0_2, %c768], %2 {strides = array<i32>} : memref<4x896xf32, #tpu.memory_space<vmem>>, vector<4x128xf32>,
    %cst_3 = arith.constant 0.000000e+00 : f32
    %4 = vector.broadcast %cst_3 : f32 to vector<8x128xf32>
    %c0_4 = arith.constant 0 : index
    %c0_5 = arith.constant 0 : index
    %5 = vector.load %arg16[%c0_4, %c0_5] : memref<8x896xf32, #tpu.memory_space<vmem>>, vector<8x128xf32>
    tpu.vector_store %arg16[%c0_4, %c0_5], %4 {strides = array<i32>} : memref<8x896xf32, #tpu.memory_space<vmem>>, vector<8x128xf32>,
    %cst_6 = arith.constant 0.000000e+00 : f32
    %6 = vector.broadcast %cst_6 : f32 to vector<8x128xf32>
    %c0_7 = arith.constant 0 : index
    %c768_8 = arith.constant 768 : index
    %7 = vector.load %arg16[%c0_7, %c768_8] : memref<8x896xf32, #tpu.memory_space<vmem>>, vector<8x128xf32>
    tpu.vector_store %arg16[%c0_7, %c768_8], %6 {strides = array<i32>} : memref<8x896xf32, #tpu.memory_space<vmem>>, vector<8x128xf32>,
    %c0_9 = arith.constant 0 : index
    %c0_10 = arith.constant 0 : index
    %8 = vector.load %arg11[%c0_9, %c0_10] : memref<1x640xf32, #tpu.memory_space<vmem>>, vector<1x640xf32>
    %cst_11 = arith.constant 5.000000e-01 : f32
    %9 = vector.broadcast %cst_11 : f32 to vector<1x640xf32>
    %10 = arith.cmpf ogt, %8, %9 : vector<1x640xf32>
    %c0_12 = arith.constant 0 : index
    %c0_13 = arith.constant 0 : index
    %11 = vector.load %arg3[%c0_12, %c0_13] : memref<8x1xf32, #tpu.memory_space<vmem>>, vector<8x1xf32>
    %c0_14 = arith.constant 0 : index
    %c0_15 = arith.constant 0 : index
    %12 = vector.load %arg5[%c0_14, %c0_15] : memref<8x1xf32, #tpu.memory_space<vmem>>, vector<8x1xf32>
    %c0_16 = arith.constant 0 : index
    %c0_17 = arith.constant 0 : index
    %13 = vector.load %arg6[%c0_16, %c0_17] : memref<8x4xf32, #tpu.memory_space<vmem>>, vector<8x4xf32>
    %c0_18 = arith.constant 0 : index
    %c0_19 = arith.constant 0 : index
    %14 = vector.load %arg7[%c0_18, %c0_19] : memref<4x1xf32, #tpu.memory_space<vmem>>, vector<4x1xf32>
    %c0_20 = arith.constant 0 : index
    %c0_21 = arith.constant 0 : index
    %15 = vector.load %arg8[%c0_20, %c0_21] : memref<4x1xf32, #tpu.memory_space<vmem>>, vector<4x1xf32>
    %c0_22 = arith.constant 0 : index
    %c0_23 = arith.constant 0 : index
    %16 = vector.load %arg9[%c0_22, %c0_23] : memref<8x1xf32, #tpu.memory_space<vmem>>, vector<8x1xf32>
    %c0_24 = arith.constant 0 : index
    %c0_25 = arith.constant 0 : index
    %17 = vector.load %arg10[%c0_24, %c0_25] : memref<8x1xf32, #tpu.memory_space<vmem>>, vector<8x1xf32>
    %c0_26 = arith.constant 0 : index
    %c0_27 = arith.constant 0 : index
    %18 = vector.load %arg12[%c0_26, %c0_27] : memref<16x8xf32, #tpu.memory_space<vmem>>, vector<16x8xf32>
    %c0_28 = arith.constant 0 : index
    %c0_29 = arith.constant 0 : index
    %c0_30 = arith.constant 0 : index
    %19 = vector.load %arg1[%c0_28, %c0_29, %c0_30] : memref<1x4x640xf32, #tpu.memory_space<vmem>>, vector<1x4x640xf32>
    %20 = vector.shape_cast %19 : vector<1x4x640xf32> to vector<4x640xf32>
    %21 = vector.broadcast %14 : vector<4x1xf32> to vector<4x640xf32>
    %22 = arith.mulf %20, %21 : vector<4x640xf32>
    %23 = vector.broadcast %15 : vector<4x1xf32> to vector<4x640xf32>
    %24 = arith.addf %22, %23 : vector<4x640xf32>
    %cst_31 = arith.constant 0.000000e+00 : f32
    %25 = vector.broadcast %cst_31 : f32 to vector<4x640xf32>
    %26 = arith.maximumf %24, %25 : vector<4x640xf32>
    %cst_32 = arith.constant 0.000000e+00 : f32
    %27 = vector.shape_cast %10 : vector<1x640xi1> to vector<1x640xi1>
    %28 = vector.broadcast %27 : vector<1x640xi1> to vector<4x640xi1>
    %29 = vector.broadcast %cst_32 : f32 to vector<4x640xf32>
    %30 = arith.select %28, %26, %29 : vector<4x640xi1>, vector<4x640xf32>
    %c0_33 = arith.constant 0 : index
    %c128 = arith.constant 128 : index
    %31 = vector.load %arg15[%c0_33, %c128] : memref<4x896xf32, #tpu.memory_space<vmem>>, vector<4x640xf32>
    tpu.vector_store %arg15[%c0_33, %c128], %30 {strides = array<i32>} : memref<4x896xf32, #tpu.memory_space<vmem>>, vector<4x640xf32>,
    %c0_34 = arith.constant 0 : index
    %c0_35 = arith.constant 0 : index
    %c0_36 = arith.constant 0 : index
    %32 = vector.load %arg2[%c0_34, %c0_35, %c0_36] : memref<9x8x4xf32, #tpu.memory_space<vmem>>, vector<1x8x4xf32>
    %33 = vector.shape_cast %32 : vector<1x8x4xf32> to vector<8x4xf32>
    %c0_37 = arith.constant 0 : index
    %c95 = arith.constant 95 : index
    %34 = vector.load %arg15[%c0_37, %c95] : memref<4x896xf32, #tpu.memory_space<vmem>>, vector<4x640xf32>
    %cst_38 = arith.constant dense<0.000000e+00> : vector<8x640xf32>
    %35 = tpu.matmul %33, %34, %cst_38 {dimension_numbers = #tpu.dot_dimension_numbers<[1], [0], [0], [1], [0, 0, 1, 1], [], []>} : vector<8x4xf32>, vector<4x640xf32>, vector<8x640xf32> -> vector<8x640xf32>
    %c1 = arith.constant 1 : index
    %c0_39 = arith.constant 0 : index
    %c0_40 = arith.constant 0 : index
    %36 = vector.load %arg2[%c1, %c0_39, %c0_40] : memref<9x8x4xf32, #tpu.memory_space<vmem>>, vector<1x8x4xf32>
    %37 = vector.shape_cast %36 : vector<1x8x4xf32> to vector<8x4xf32>
    %c0_41 = arith.constant 0 : index
    %c96 = arith.constant 96 : index
    %38 = vector.load %arg15[%c0_41, %c96] : memref<4x896xf32, #tpu.memory_space<vmem>>, vector<4x640xf32>
    %cst_42 = arith.constant dense<0.000000e+00> : vector<8x640xf32>
    %39 = tpu.matmul %37, %38, %cst_42 {dimension_numbers = #tpu.dot_dimension_numbers<[1], [0], [0], [1], [0, 0, 1, 1], [], []>} : vector<8x4xf32>, vector<4x640xf32>, vector<8x640xf32> -> vector<8x640xf32>
    %40 = arith.addf %35, %39 : vector<8x640xf32>
    %c2 = arith.constant 2 : index
    %c0_43 = arith.constant 0 : index
    %c0_44 = arith.constant 0 : index
    %41 = vector.load %arg2[%c2, %c0_43, %c0_44] : memref<9x8x4xf32, #tpu.memory_space<vmem>>, vector<1x8x4xf32>
    %42 = vector.shape_cast %41 : vector<1x8x4xf32> to vector<8x4xf32>
    %c0_45 = arith.constant 0 : index
    %c97 = arith.constant 97 : index
    %43 = vector.load %arg15[%c0_45, %c97] : memref<4x896xf32, #tpu.memory_space<vmem>>, vector<4x640xf32>
    %cst_46 = arith.constant dense<0.000000e+00> : vector<8x640xf32>
    %44 = tpu.matmul %42, %43, %cst_46 {dimension_numbers = #tpu.dot_dimension_numbers<[1], [0], [0], [1], [0, 0, 1, 1], [], []>} : vector<8x4xf32>, vector<4x640xf32>, vector<8x640xf32> -> vector<8x640xf32>
    %45 = arith.addf %40, %44 : vector<8x640xf32>
    %c3 = arith.constant 3 : index
    %c0_47 = arith.constant 0 : index
    %c0_48 = arith.constant 0 : index
    %46 = vector.load %arg2[%c3, %c0_47, %c0_48] : memref<9x8x4xf32, #tpu.memory_space<vmem>>, vector<1x8x4xf32>
    %47 = vector.shape_cast %46 : vector<1x8x4xf32> to vector<8x4xf32>
    %c0_49 = arith.constant 0 : index
    %c127 = arith.constant 127 : index
    %48 = vector.load %arg15[%c0_49, %c127] : memref<4x896xf32, #tpu.memory_space<vmem>>, vector<4x640xf32>
    %cst_50 = arith.constant dense<0.000000e+00> : vector<8x640xf32>
    %49 = tpu.matmul %47, %48, %cst_50 {dimension_numbers = #tpu.dot_dimension_numbers<[1], [0], [0], [1], [0, 0, 1, 1], [], []>} : vector<8x4xf32>, vector<4x640xf32>, vector<8x640xf32> -> vector<8x640xf32>
    %50 = arith.addf %45, %49 : vector<8x640xf32>
    %c4 = arith.constant 4 : index
    %c0_51 = arith.constant 0 : index
    %c0_52 = arith.constant 0 : index
    %51 = vector.load %arg2[%c4, %c0_51, %c0_52] : memref<9x8x4xf32, #tpu.memory_space<vmem>>, vector<1x8x4xf32>
    %52 = vector.shape_cast %51 : vector<1x8x4xf32> to vector<8x4xf32>
    %c0_53 = arith.constant 0 : index
    %c128_54 = arith.constant 128 : index
    %53 = vector.load %arg15[%c0_53, %c128_54] : memref<4x896xf32, #tpu.memory_space<vmem>>, vector<4x640xf32>
    %cst_55 = arith.constant dense<0.000000e+00> : vector<8x640xf32>
    %54 = tpu.matmul %52, %53, %cst_55 {dimension_numbers = #tpu.dot_dimension_numbers<[1], [0], [0], [1], [0, 0, 1, 1], [], []>} : vector<8x4xf32>, vector<4x640xf32>, vector<8x640xf32> -> vector<8x640xf32>
    %55 = arith.addf %50, %54 : vector<8x640xf32>
    %c5 = arith.constant 5 : index
    %c0_56 = arith.constant 0 : index
    %c0_57 = arith.constant 0 : index
    %56 = vector.load %arg2[%c5, %c0_56, %c0_57] : memref<9x8x4xf32, #tpu.memory_space<vmem>>, vector<1x8x4xf32>
    %57 = vector.shape_cast %56 : vector<1x8x4xf32> to vector<8x4xf32>
    %c0_58 = arith.constant 0 : index
    %c129 = arith.constant 129 : index
    %58 = vector.load %arg15[%c0_58, %c129] : memref<4x896xf32, #tpu.memory_space<vmem>>, vector<4x640xf32>
    %cst_59 = arith.constant dense<0.000000e+00> : vector<8x640xf32>
    %59 = tpu.matmul %57, %58, %cst_59 {dimension_numbers = #tpu.dot_dimension_numbers<[1], [0], [0], [1], [0, 0, 1, 1], [], []>} : vector<8x4xf32>, vector<4x640xf32>, vector<8x640xf32> -> vector<8x640xf32>
    %60 = arith.addf %55, %59 : vector<8x640xf32>
    %c6 = arith.constant 6 : index
    %c0_60 = arith.constant 0 : index
    %c0_61 = arith.constant 0 : index
    %61 = vector.load %arg2[%c6, %c0_60, %c0_61] : memref<9x8x4xf32, #tpu.memory_space<vmem>>, vector<1x8x4xf32>
    %62 = vector.shape_cast %61 : vector<1x8x4xf32> to vector<8x4xf32>
    %c0_62 = arith.constant 0 : index
    %c159 = arith.constant 159 : index
    %63 = vector.load %arg15[%c0_62, %c159] : memref<4x896xf32, #tpu.memory_space<vmem>>, vector<4x640xf32>
    %cst_63 = arith.constant dense<0.000000e+00> : vector<8x640xf32>
    %64 = tpu.matmul %62, %63, %cst_63 {dimension_numbers = #tpu.dot_dimension_numbers<[1], [0], [0], [1], [0, 0, 1, 1], [], []>} : vector<8x4xf32>, vector<4x640xf32>, vector<8x640xf32> -> vector<8x640xf32>
    %65 = arith.addf %60, %64 : vector<8x640xf32>
    %c7 = arith.constant 7 : index
    %c0_64 = arith.constant 0 : index
    %c0_65 = arith.constant 0 : index
    %66 = vector.load %arg2[%c7, %c0_64, %c0_65] : memref<9x8x4xf32, #tpu.memory_space<vmem>>, vector<1x8x4xf32>
    %67 = vector.shape_cast %66 : vector<1x8x4xf32> to vector<8x4xf32>
    %c0_66 = arith.constant 0 : index
    %c160 = arith.constant 160 : index
    %68 = vector.load %arg15[%c0_66, %c160] : memref<4x896xf32, #tpu.memory_space<vmem>>, vector<4x640xf32>
    %cst_67 = arith.constant dense<0.000000e+00> : vector<8x640xf32>
    %69 = tpu.matmul %67, %68, %cst_67 {dimension_numbers = #tpu.dot_dimension_numbers<[1], [0], [0], [1], [0, 0, 1, 1], [], []>} : vector<8x4xf32>, vector<4x640xf32>, vector<8x640xf32> -> vector<8x640xf32>
    %70 = arith.addf %65, %69 : vector<8x640xf32>
    %c8 = arith.constant 8 : index
    %c0_68 = arith.constant 0 : index
    %c0_69 = arith.constant 0 : index
    %71 = vector.load %arg2[%c8, %c0_68, %c0_69] : memref<9x8x4xf32, #tpu.memory_space<vmem>>, vector<1x8x4xf32>
    %72 = vector.shape_cast %71 : vector<1x8x4xf32> to vector<8x4xf32>
    %c0_70 = arith.constant 0 : index
    %c161 = arith.constant 161 : index
    %73 = vector.load %arg15[%c0_70, %c161] : memref<4x896xf32, #tpu.memory_space<vmem>>, vector<4x640xf32>
    %cst_71 = arith.constant dense<0.000000e+00> : vector<8x640xf32>
    %74 = tpu.matmul %72, %73, %cst_71 {dimension_numbers = #tpu.dot_dimension_numbers<[1], [0], [0], [1], [0, 0, 1, 1], [], []>} : vector<8x4xf32>, vector<4x640xf32>, vector<8x640xf32> -> vector<8x640xf32>
    %75 = arith.addf %70, %74 : vector<8x640xf32>
    %76 = vector.broadcast %11 : vector<8x1xf32> to vector<8x640xf32>
    %77 = arith.addf %75, %76 : vector<8x640xf32>
    %cst_72 = arith.constant 0.000000e+00 : f32
    %78 = vector.broadcast %cst_72 : f32 to vector<8x640xf32>
    %79 = arith.maximumf %77, %78 : vector<8x640xf32>
    %cst_73 = arith.constant 0.000000e+00 : f32
    %80 = vector.shape_cast %10 : vector<1x640xi1> to vector<1x640xi1>
    %81 = vector.broadcast %80 : vector<1x640xi1> to vector<8x640xi1>
    %82 = vector.broadcast %cst_73 : f32 to vector<8x640xf32>
    %83 = arith.select %81, %79, %82 : vector<8x640xi1>, vector<8x640xf32>
    %c0_74 = arith.constant 0 : index
    %c128_75 = arith.constant 128 : index
    %84 = vector.load %arg16[%c0_74, %c128_75] : memref<8x896xf32, #tpu.memory_space<vmem>>, vector<8x640xf32>
    tpu.vector_store %arg16[%c0_74, %c128_75], %83 {strides = array<i32>} : memref<8x896xf32, #tpu.memory_space<vmem>>, vector<8x640xf32>,
    %c0_76 = arith.constant 0 : index
    %c0_77 = arith.constant 0 : index
    %c0_78 = arith.constant 0 : index
    %85 = vector.load %arg4[%c0_76, %c0_77, %c0_78] : memref<9x8x8xf32, #tpu.memory_space<vmem>>, vector<1x8x8xf32>
    %86 = vector.shape_cast %85 : vector<1x8x8xf32> to vector<8x8xf32>
    %c0_79 = arith.constant 0 : index
    %c95_80 = arith.constant 95 : index
    %87 = vector.load %arg16[%c0_79, %c95_80] : memref<8x896xf32, #tpu.memory_space<vmem>>, vector<8x640xf32>
    %cst_81 = arith.constant dense<0.000000e+00> : vector<8x640xf32>
    %88 = tpu.matmul %86, %87, %cst_81 {dimension_numbers = #tpu.dot_dimension_numbers<[1], [0], [0], [1], [0, 0, 1, 1], [], []>} : vector<8x8xf32>, vector<8x640xf32>, vector<8x640xf32> -> vector<8x640xf32>
    %c1_82 = arith.constant 1 : index
    %c0_83 = arith.constant 0 : index
    %c0_84 = arith.constant 0 : index
    %89 = vector.load %arg4[%c1_82, %c0_83, %c0_84] : memref<9x8x8xf32, #tpu.memory_space<vmem>>, vector<1x8x8xf32>
    %90 = vector.shape_cast %89 : vector<1x8x8xf32> to vector<8x8xf32>
    %c0_85 = arith.constant 0 : index
    %c96_86 = arith.constant 96 : index
    %91 = vector.load %arg16[%c0_85, %c96_86] : memref<8x896xf32, #tpu.memory_space<vmem>>, vector<8x640xf32>
    %cst_87 = arith.constant dense<0.000000e+00> : vector<8x640xf32>
    %92 = tpu.matmul %90, %91, %cst_87 {dimension_numbers = #tpu.dot_dimension_numbers<[1], [0], [0], [1], [0, 0, 1, 1], [], []>} : vector<8x8xf32>, vector<8x640xf32>, vector<8x640xf32> -> vector<8x640xf32>
    %93 = arith.addf %88, %92 : vector<8x640xf32>
    %c2_88 = arith.constant 2 : index
    %c0_89 = arith.constant 0 : index
    %c0_90 = arith.constant 0 : index
    %94 = vector.load %arg4[%c2_88, %c0_89, %c0_90] : memref<9x8x8xf32, #tpu.memory_space<vmem>>, vector<1x8x8xf32>
    %95 = vector.shape_cast %94 : vector<1x8x8xf32> to vector<8x8xf32>
    %c0_91 = arith.constant 0 : index
    %c97_92 = arith.constant 97 : index
    %96 = vector.load %arg16[%c0_91, %c97_92] : memref<8x896xf32, #tpu.memory_space<vmem>>, vector<8x640xf32>
    %cst_93 = arith.constant dense<0.000000e+00> : vector<8x640xf32>
    %97 = tpu.matmul %95, %96, %cst_93 {dimension_numbers = #tpu.dot_dimension_numbers<[1], [0], [0], [1], [0, 0, 1, 1], [], []>} : vector<8x8xf32>, vector<8x640xf32>, vector<8x640xf32> -> vector<8x640xf32>
    %98 = arith.addf %93, %97 : vector<8x640xf32>
    %c3_94 = arith.constant 3 : index
    %c0_95 = arith.constant 0 : index
    %c0_96 = arith.constant 0 : index
    %99 = vector.load %arg4[%c3_94, %c0_95, %c0_96] : memref<9x8x8xf32, #tpu.memory_space<vmem>>, vector<1x8x8xf32>
    %100 = vector.shape_cast %99 : vector<1x8x8xf32> to vector<8x8xf32>
    %c0_97 = arith.constant 0 : index
    %c127_98 = arith.constant 127 : index
    %101 = vector.load %arg16[%c0_97, %c127_98] : memref<8x896xf32, #tpu.memory_space<vmem>>, vector<8x640xf32>
    %cst_99 = arith.constant dense<0.000000e+00> : vector<8x640xf32>
    %102 = tpu.matmul %100, %101, %cst_99 {dimension_numbers = #tpu.dot_dimension_numbers<[1], [0], [0], [1], [0, 0, 1, 1], [], []>} : vector<8x8xf32>, vector<8x640xf32>, vector<8x640xf32> -> vector<8x640xf32>
    %103 = arith.addf %98, %102 : vector<8x640xf32>
    %c4_100 = arith.constant 4 : index
    %c0_101 = arith.constant 0 : index
    %c0_102 = arith.constant 0 : index
    %104 = vector.load %arg4[%c4_100, %c0_101, %c0_102] : memref<9x8x8xf32, #tpu.memory_space<vmem>>, vector<1x8x8xf32>
    %105 = vector.shape_cast %104 : vector<1x8x8xf32> to vector<8x8xf32>
    %c0_103 = arith.constant 0 : index
    %c128_104 = arith.constant 128 : index
    %106 = vector.load %arg16[%c0_103, %c128_104] : memref<8x896xf32, #tpu.memory_space<vmem>>, vector<8x640xf32>
    %cst_105 = arith.constant dense<0.000000e+00> : vector<8x640xf32>
    %107 = tpu.matmul %105, %106, %cst_105 {dimension_numbers = #tpu.dot_dimension_numbers<[1], [0], [0], [1], [0, 0, 1, 1], [], []>} : vector<8x8xf32>, vector<8x640xf32>, vector<8x640xf32> -> vector<8x640xf32>
    %108 = arith.addf %103, %107 : vector<8x640xf32>
    %c5_106 = arith.constant 5 : index
    %c0_107 = arith.constant 0 : index
    %c0_108 = arith.constant 0 : index
    %109 = vector.load %arg4[%c5_106, %c0_107, %c0_108] : memref<9x8x8xf32, #tpu.memory_space<vmem>>, vector<1x8x8xf32>
    %110 = vector.shape_cast %109 : vector<1x8x8xf32> to vector<8x8xf32>
    %c0_109 = arith.constant 0 : index
    %c129_110 = arith.constant 129 : index
    %111 = vector.load %arg16[%c0_109, %c129_110] : memref<8x896xf32, #tpu.memory_space<vmem>>, vector<8x640xf32>
    %cst_111 = arith.constant dense<0.000000e+00> : vector<8x640xf32>
    %112 = tpu.matmul %110, %111, %cst_111 {dimension_numbers = #tpu.dot_dimension_numbers<[1], [0], [0], [1], [0, 0, 1, 1], [], []>} : vector<8x8xf32>, vector<8x640xf32>, vector<8x640xf32> -> vector<8x640xf32>
    %113 = arith.addf %108, %112 : vector<8x640xf32>
    %c6_112 = arith.constant 6 : index
    %c0_113 = arith.constant 0 : index
    %c0_114 = arith.constant 0 : index
    %114 = vector.load %arg4[%c6_112, %c0_113, %c0_114] : memref<9x8x8xf32, #tpu.memory_space<vmem>>, vector<1x8x8xf32>
    %115 = vector.shape_cast %114 : vector<1x8x8xf32> to vector<8x8xf32>
    %c0_115 = arith.constant 0 : index
    %c159_116 = arith.constant 159 : index
    %116 = vector.load %arg16[%c0_115, %c159_116] : memref<8x896xf32, #tpu.memory_space<vmem>>, vector<8x640xf32>
    %cst_117 = arith.constant dense<0.000000e+00> : vector<8x640xf32>
    %117 = tpu.matmul %115, %116, %cst_117 {dimension_numbers = #tpu.dot_dimension_numbers<[1], [0], [0], [1], [0, 0, 1, 1], [], []>} : vector<8x8xf32>, vector<8x640xf32>, vector<8x640xf32> -> vector<8x640xf32>
    %118 = arith.addf %113, %117 : vector<8x640xf32>
    %c7_118 = arith.constant 7 : index
    %c0_119 = arith.constant 0 : index
    %c0_120 = arith.constant 0 : index
    %119 = vector.load %arg4[%c7_118, %c0_119, %c0_120] : memref<9x8x8xf32, #tpu.memory_space<vmem>>, vector<1x8x8xf32>
    %120 = vector.shape_cast %119 : vector<1x8x8xf32> to vector<8x8xf32>
    %c0_121 = arith.constant 0 : index
    %c160_122 = arith.constant 160 : index
    %121 = vector.load %arg16[%c0_121, %c160_122] : memref<8x896xf32, #tpu.memory_space<vmem>>, vector<8x640xf32>
    %cst_123 = arith.constant dense<0.000000e+00> : vector<8x640xf32>
    %122 = tpu.matmul %120, %121, %cst_123 {dimension_numbers = #tpu.dot_dimension_numbers<[1], [0], [0], [1], [0, 0, 1, 1], [], []>} : vector<8x8xf32>, vector<8x640xf32>, vector<8x640xf32> -> vector<8x640xf32>
    %123 = arith.addf %118, %122 : vector<8x640xf32>
    %c8_124 = arith.constant 8 : index
    %c0_125 = arith.constant 0 : index
    %c0_126 = arith.constant 0 : index
    %124 = vector.load %arg4[%c8_124, %c0_125, %c0_126] : memref<9x8x8xf32, #tpu.memory_space<vmem>>, vector<1x8x8xf32>
    %125 = vector.shape_cast %124 : vector<1x8x8xf32> to vector<8x8xf32>
    %c0_127 = arith.constant 0 : index
    %c161_128 = arith.constant 161 : index
    %126 = vector.load %arg16[%c0_127, %c161_128] : memref<8x896xf32, #tpu.memory_space<vmem>>, vector<8x640xf32>
    %cst_129 = arith.constant dense<0.000000e+00> : vector<8x640xf32>
    %127 = tpu.matmul %125, %126, %cst_129 {dimension_numbers = #tpu.dot_dimension_numbers<[1], [0], [0], [1], [0, 0, 1, 1], [], []>} : vector<8x8xf32>, vector<8x640xf32>, vector<8x640xf32> -> vector<8x640xf32>
    %128 = arith.addf %123, %127 : vector<8x640xf32>
    %cst_130 = arith.constant dense<0.000000e+00> : vector<8x640xf32>
    %129 = tpu.matmul %13, %20, %cst_130 {dimension_numbers = #tpu.dot_dimension_numbers<[1], [0], [0], [1], [0, 0, 1, 1], [], []>} : vector<8x4xf32>, vector<4x640xf32>, vector<8x640xf32> -> vector<8x640xf32>
    %130 = vector.broadcast %16 : vector<8x1xf32> to vector<8x640xf32>
    %131 = arith.mulf %129, %130 : vector<8x640xf32>
    %132 = vector.broadcast %17 : vector<8x1xf32> to vector<8x640xf32>
    %133 = arith.addf %131, %132 : vector<8x640xf32>
    %134 = vector.broadcast %12 : vector<8x1xf32> to vector<8x640xf32>
    %135 = arith.addf %128, %134 : vector<8x640xf32>
    %136 = arith.addf %135, %133 : vector<8x640xf32>
    %c0_131 = arith.constant 0 : index
    %c0_132 = arith.constant 0 : index
    %c0_133 = arith.constant 0 : index
    %137 = vector.load %arg13[%c0_131, %c0_132, %c0_133] : memref<1x8x640xf32, #tpu.memory_space<vmem>>, vector<1x8x640xf32>
    %138 = vector.shape_cast %137 : vector<1x8x640xf32> to vector<8x640xf32>
    %139 = vector.shape_cast %136 : vector<8x640xf32> to vector<1x8x640xf32>
    tpu.vector_store %arg13[%c0_131, %c0_132, %c0_133], %139 {strides = array<i32>} : memref<1x8x640xf32, #tpu.memory_space<vmem>>, vector<1x8x640xf32>,
    %c0_134 = arith.constant 0 : index
    %c0_135 = arith.constant 0 : index
    %c33 = arith.constant 33 : index
    %140 = vector.load %arg13[%c0_134, %c0_135, %c33] : memref<1x8x640xf32, #tpu.memory_space<vmem>>, vector<1x8x16xf32>
    %141 = vector.shape_cast %140 : vector<1x8x16xf32> to vector<8x16xf32>
    %c0_136 = arith.constant 0 : index
    %c0_137 = arith.constant 0 : index
    %c34 = arith.constant 34 : index
    %142 = vector.load %arg13[%c0_136, %c0_137, %c34] : memref<1x8x640xf32, #tpu.memory_space<vmem>>, vector<1x8x16xf32>
    %143 = vector.shape_cast %142 : vector<1x8x16xf32> to vector<8x16xf32>
    %c0_138 = arith.constant 0 : index
    %c0_139 = arith.constant 0 : index
    %c65 = arith.constant 65 : index
    %144 = vector.load %arg13[%c0_138, %c0_139, %c65] : memref<1x8x640xf32, #tpu.memory_space<vmem>>, vector<1x8x16xf32>
    %145 = vector.shape_cast %144 : vector<1x8x16xf32> to vector<8x16xf32>
    %c0_140 = arith.constant 0 : index
    %c0_141 = arith.constant 0 : index
    %c66 = arith.constant 66 : index
    %146 = vector.load %arg13[%c0_140, %c0_141, %c66] : memref<1x8x640xf32, #tpu.memory_space<vmem>>, vector<1x8x16xf32>
    %147 = vector.shape_cast %146 : vector<1x8x16xf32> to vector<8x16xf32>
    %148 = arith.maximumf %141, %143 : vector<8x16xf32>
    %149 = arith.maximumf %145, %147 : vector<8x16xf32>
    %150 = arith.maximumf %148, %149 : vector<8x16xf32>
    %cst_142 = arith.constant dense<0.000000e+00> : vector<8x8xf32>
    %151 = tpu.matmul %150, %18, %cst_142 {dimension_numbers = #tpu.dot_dimension_numbers<[1], [0], [0], [1], [0, 0, 1, 1], [], []>} : vector<8x16xf32>, vector<16x8xf32>, vector<8x8xf32> -> vector<8x8xf32>
    %c0_143 = arith.constant 0 : index
    %c0_144 = arith.constant 0 : index
    %c97_145 = arith.constant 97 : index
    %152 = vector.load %arg13[%c0_143, %c0_144, %c97_145] : memref<1x8x640xf32, #tpu.memory_space<vmem>>, vector<1x8x16xf32>
    %153 = vector.shape_cast %152 : vector<1x8x16xf32> to vector<8x16xf32>
    %c0_146 = arith.constant 0 : index
    %c0_147 = arith.constant 0 : index
    %c98 = arith.constant 98 : index
    %154 = vector.load %arg13[%c0_146, %c0_147, %c98] : memref<1x8x640xf32, #tpu.memory_space<vmem>>, vector<1x8x16xf32>
    %155 = vector.shape_cast %154 : vector<1x8x16xf32> to vector<8x16xf32>
    %c0_148 = arith.constant 0 : index
    %c0_149 = arith.constant 0 : index
    %c129_150 = arith.constant 129 : index
    %156 = vector.load %arg13[%c0_148, %c0_149, %c129_150] : memref<1x8x640xf32, #tpu.memory_space<vmem>>, vector<1x8x16xf32>
    %157 = vector.shape_cast %156 : vector<1x8x16xf32> to vector<8x16xf32>
    %c0_151 = arith.constant 0 : index
    %c0_152 = arith.constant 0 : index
    %c130 = arith.constant 130 : index
    %158 = vector.load %arg13[%c0_151, %c0_152, %c130] : memref<1x8x640xf32, #tpu.memory_space<vmem>>, vector<1x8x16xf32>
    %159 = vector.shape_cast %158 : vector<1x8x16xf32> to vector<8x16xf32>
    %160 = arith.maximumf %153, %155 : vector<8x16xf32>
    %161 = arith.maximumf %157, %159 : vector<8x16xf32>
    %162 = arith.maximumf %160, %161 : vector<8x16xf32>
    %cst_153 = arith.constant dense<0.000000e+00> : vector<8x8xf32>
    %163 = tpu.matmul %162, %18, %cst_153 {dimension_numbers = #tpu.dot_dimension_numbers<[1], [0], [0], [1], [0, 0, 1, 1], [], []>} : vector<8x16xf32>, vector<16x8xf32>, vector<8x8xf32> -> vector<8x8xf32>
    %c0_154 = arith.constant 0 : index
    %c0_155 = arith.constant 0 : index
    %c161_156 = arith.constant 161 : index
    %164 = vector.load %arg13[%c0_154, %c0_155, %c161_156] : memref<1x8x640xf32, #tpu.memory_space<vmem>>, vector<1x8x16xf32>
    %165 = vector.shape_cast %164 : vector<1x8x16xf32> to vector<8x16xf32>
    %c0_157 = arith.constant 0 : index
    %c0_158 = arith.constant 0 : index
    %c162 = arith.constant 162 : index
    %166 = vector.load %arg13[%c0_157, %c0_158, %c162] : memref<1x8x640xf32, #tpu.memory_space<vmem>>, vector<1x8x16xf32>
    %167 = vector.shape_cast %166 : vector<1x8x16xf32> to vector<8x16xf32>
    %c0_159 = arith.constant 0 : index
    %c0_160 = arith.constant 0 : index
    %c193 = arith.constant 193 : index
    %168 = vector.load %arg13[%c0_159, %c0_160, %c193] : memref<1x8x640xf32, #tpu.memory_space<vmem>>, vector<1x8x16xf32>
    %169 = vector.shape_cast %168 : vector<1x8x16xf32> to vector<8x16xf32>
    %c0_161 = arith.constant 0 : index
    %c0_162 = arith.constant 0 : index
    %c194 = arith.constant 194 : index
    %170 = vector.load %arg13[%c0_161, %c0_162, %c194] : memref<1x8x640xf32, #tpu.memory_space<vmem>>, vector<1x8x16xf32>
    %171 = vector.shape_cast %170 : vector<1x8x16xf32> to vector<8x16xf32>
    %172 = arith.maximumf %165, %167 : vector<8x16xf32>
    %173 = arith.maximumf %169, %171 : vector<8x16xf32>
    %174 = arith.maximumf %172, %173 : vector<8x16xf32>
    %cst_163 = arith.constant dense<0.000000e+00> : vector<8x8xf32>
    %175 = tpu.matmul %174, %18, %cst_163 {dimension_numbers = #tpu.dot_dimension_numbers<[1], [0], [0], [1], [0, 0, 1, 1], [], []>} : vector<8x16xf32>, vector<16x8xf32>, vector<8x8xf32> -> vector<8x8xf32>
    %c0_164 = arith.constant 0 : index
    %c0_165 = arith.constant 0 : index
    %c225 = arith.constant 225 : index
    %176 = vector.load %arg13[%c0_164, %c0_165, %c225] : memref<1x8x640xf32, #tpu.memory_space<vmem>>, vector<1x8x16xf32>
    %177 = vector.shape_cast %176 : vector<1x8x16xf32> to vector<8x16xf32>
    %c0_166 = arith.constant 0 : index
    %c0_167 = arith.constant 0 : index
    %c226 = arith.constant 226 : index
    %178 = vector.load %arg13[%c0_166, %c0_167, %c226] : memref<1x8x640xf32, #tpu.memory_space<vmem>>, vector<1x8x16xf32>
    %179 = vector.shape_cast %178 : vector<1x8x16xf32> to vector<8x16xf32>
    %c0_168 = arith.constant 0 : index
    %c0_169 = arith.constant 0 : index
    %c257 = arith.constant 257 : index
    %180 = vector.load %arg13[%c0_168, %c0_169, %c257] : memref<1x8x640xf32, #tpu.memory_space<vmem>>, vector<1x8x16xf32>
    %181 = vector.shape_cast %180 : vector<1x8x16xf32> to vector<8x16xf32>
    %c0_170 = arith.constant 0 : index
    %c0_171 = arith.constant 0 : index
    %c258 = arith.constant 258 : index
    %182 = vector.load %arg13[%c0_170, %c0_171, %c258] : memref<1x8x640xf32, #tpu.memory_space<vmem>>, vector<1x8x16xf32>
    %183 = vector.shape_cast %182 : vector<1x8x16xf32> to vector<8x16xf32>
    %184 = arith.maximumf %177, %179 : vector<8x16xf32>
    %185 = arith.maximumf %181, %183 : vector<8x16xf32>
    %186 = arith.maximumf %184, %185 : vector<8x16xf32>
    %cst_172 = arith.constant dense<0.000000e+00> : vector<8x8xf32>
    %187 = tpu.matmul %186, %18, %cst_172 {dimension_numbers = #tpu.dot_dimension_numbers<[1], [0], [0], [1], [0, 0, 1, 1], [], []>} : vector<8x16xf32>, vector<16x8xf32>, vector<8x8xf32> -> vector<8x8xf32>
    %c0_173 = arith.constant 0 : index
    %c0_174 = arith.constant 0 : index
    %c289 = arith.constant 289 : index
    %188 = vector.load %arg13[%c0_173, %c0_174, %c289] : memref<1x8x640xf32, #tpu.memory_space<vmem>>, vector<1x8x16xf32>
    %189 = vector.shape_cast %188 : vector<1x8x16xf32> to vector<8x16xf32>
    %c0_175 = arith.constant 0 : index
    %c0_176 = arith.constant 0 : index
    %c290 = arith.constant 290 : index
    %190 = vector.load %arg13[%c0_175, %c0_176, %c290] : memref<1x8x640xf32, #tpu.memory_space<vmem>>, vector<1x8x16xf32>
    %191 = vector.shape_cast %190 : vector<1x8x16xf32> to vector<8x16xf32>
    %c0_177 = arith.constant 0 : index
    %c0_178 = arith.constant 0 : index
    %c321 = arith.constant 321 : index
    %192 = vector.load %arg13[%c0_177, %c0_178, %c321] : memref<1x8x640xf32, #tpu.memory_space<vmem>>, vector<1x8x16xf32>
    %193 = vector.shape_cast %192 : vector<1x8x16xf32> to vector<8x16xf32>
    %c0_179 = arith.constant 0 : index
    %c0_180 = arith.constant 0 : index
    %c322 = arith.constant 322 : index
    %194 = vector.load %arg13[%c0_179, %c0_180, %c322] : memref<1x8x640xf32, #tpu.memory_space<vmem>>, vector<1x8x16xf32>
    %195 = vector.shape_cast %194 : vector<1x8x16xf32> to vector<8x16xf32>
    %196 = arith.maximumf %189, %191 : vector<8x16xf32>
    %197 = arith.maximumf %193, %195 : vector<8x16xf32>
    %198 = arith.maximumf %196, %197 : vector<8x16xf32>
    %cst_181 = arith.constant dense<0.000000e+00> : vector<8x8xf32>
    %199 = tpu.matmul %198, %18, %cst_181 {dimension_numbers = #tpu.dot_dimension_numbers<[1], [0], [0], [1], [0, 0, 1, 1], [], []>} : vector<8x16xf32>, vector<16x8xf32>, vector<8x8xf32> -> vector<8x8xf32>
    %c0_182 = arith.constant 0 : index
    %c0_183 = arith.constant 0 : index
    %c353 = arith.constant 353 : index
    %200 = vector.load %arg13[%c0_182, %c0_183, %c353] : memref<1x8x640xf32, #tpu.memory_space<vmem>>, vector<1x8x16xf32>
    %201 = vector.shape_cast %200 : vector<1x8x16xf32> to vector<8x16xf32>
    %c0_184 = arith.constant 0 : index
    %c0_185 = arith.constant 0 : index
    %c354 = arith.constant 354 : index
    %202 = vector.load %arg13[%c0_184, %c0_185, %c354] : memref<1x8x640xf32, #tpu.memory_space<vmem>>, vector<1x8x16xf32>
    %203 = vector.shape_cast %202 : vector<1x8x16xf32> to vector<8x16xf32>
    %c0_186 = arith.constant 0 : index
    %c0_187 = arith.constant 0 : index
    %c385 = arith.constant 385 : index
    %204 = vector.load %arg13[%c0_186, %c0_187, %c385] : memref<1x8x640xf32, #tpu.memory_space<vmem>>, vector<1x8x16xf32>
    %205 = vector.shape_cast %204 : vector<1x8x16xf32> to vector<8x16xf32>
    %c0_188 = arith.constant 0 : index
    %c0_189 = arith.constant 0 : index
    %c386 = arith.constant 386 : index
    %206 = vector.load %arg13[%c0_188, %c0_189, %c386] : memref<1x8x640xf32, #tpu.memory_space<vmem>>, vector<1x8x16xf32>
    %207 = vector.shape_cast %206 : vector<1x8x16xf32> to vector<8x16xf32>
    %208 = arith.maximumf %201, %203 : vector<8x16xf32>
    %209 = arith.maximumf %205, %207 : vector<8x16xf32>
    %210 = arith.maximumf %208, %209 : vector<8x16xf32>
    %cst_190 = arith.constant dense<0.000000e+00> : vector<8x8xf32>
    %211 = tpu.matmul %210, %18, %cst_190 {dimension_numbers = #tpu.dot_dimension_numbers<[1], [0], [0], [1], [0, 0, 1, 1], [], []>} : vector<8x16xf32>, vector<16x8xf32>, vector<8x8xf32> -> vector<8x8xf32>
    %c0_191 = arith.constant 0 : index
    %c0_192 = arith.constant 0 : index
    %c417 = arith.constant 417 : index
    %212 = vector.load %arg13[%c0_191, %c0_192, %c417] : memref<1x8x640xf32, #tpu.memory_space<vmem>>, vector<1x8x16xf32>
    %213 = vector.shape_cast %212 : vector<1x8x16xf32> to vector<8x16xf32>
    %c0_193 = arith.constant 0 : index
    %c0_194 = arith.constant 0 : index
    %c418 = arith.constant 418 : index
    %214 = vector.load %arg13[%c0_193, %c0_194, %c418] : memref<1x8x640xf32, #tpu.memory_space<vmem>>, vector<1x8x16xf32>
    %215 = vector.shape_cast %214 : vector<1x8x16xf32> to vector<8x16xf32>
    %c0_195 = arith.constant 0 : index
    %c0_196 = arith.constant 0 : index
    %c449 = arith.constant 449 : index
    %216 = vector.load %arg13[%c0_195, %c0_196, %c449] : memref<1x8x640xf32, #tpu.memory_space<vmem>>, vector<1x8x16xf32>
    %217 = vector.shape_cast %216 : vector<1x8x16xf32> to vector<8x16xf32>
    %c0_197 = arith.constant 0 : index
    %c0_198 = arith.constant 0 : index
    %c450 = arith.constant 450 : index
    %218 = vector.load %arg13[%c0_197, %c0_198, %c450] : memref<1x8x640xf32, #tpu.memory_space<vmem>>, vector<1x8x16xf32>
    %219 = vector.shape_cast %218 : vector<1x8x16xf32> to vector<8x16xf32>
    %220 = arith.maximumf %213, %215 : vector<8x16xf32>
    %221 = arith.maximumf %217, %219 : vector<8x16xf32>
    %222 = arith.maximumf %220, %221 : vector<8x16xf32>
    %cst_199 = arith.constant dense<0.000000e+00> : vector<8x8xf32>
    %223 = tpu.matmul %222, %18, %cst_199 {dimension_numbers = #tpu.dot_dimension_numbers<[1], [0], [0], [1], [0, 0, 1, 1], [], []>} : vector<8x16xf32>, vector<16x8xf32>, vector<8x8xf32> -> vector<8x8xf32>
    %c0_200 = arith.constant 0 : index
    %c0_201 = arith.constant 0 : index
    %c481 = arith.constant 481 : index
    %224 = vector.load %arg13[%c0_200, %c0_201, %c481] : memref<1x8x640xf32, #tpu.memory_space<vmem>>, vector<1x8x16xf32>
    %225 = vector.shape_cast %224 : vector<1x8x16xf32> to vector<8x16xf32>
    %c0_202 = arith.constant 0 : index
    %c0_203 = arith.constant 0 : index
    %c482 = arith.constant 482 : index
    %226 = vector.load %arg13[%c0_202, %c0_203, %c482] : memref<1x8x640xf32, #tpu.memory_space<vmem>>, vector<1x8x16xf32>
    %227 = vector.shape_cast %226 : vector<1x8x16xf32> to vector<8x16xf32>
    %c0_204 = arith.constant 0 : index
    %c0_205 = arith.constant 0 : index
    %c513 = arith.constant 513 : index
    %228 = vector.load %arg13[%c0_204, %c0_205, %c513] : memref<1x8x640xf32, #tpu.memory_space<vmem>>, vector<1x8x16xf32>
    %229 = vector.shape_cast %228 : vector<1x8x16xf32> to vector<8x16xf32>
    %c0_206 = arith.constant 0 : index
    %c0_207 = arith.constant 0 : index
    %c514 = arith.constant 514 : index
    %230 = vector.load %arg13[%c0_206, %c0_207, %c514] : memref<1x8x640xf32, #tpu.memory_space<vmem>>, vector<1x8x16xf32>
    %231 = vector.shape_cast %230 : vector<1x8x16xf32> to vector<8x16xf32>
    %232 = arith.maximumf %225, %227 : vector<8x16xf32>
    %233 = arith.maximumf %229, %231 : vector<8x16xf32>
    %234 = arith.maximumf %232, %233 : vector<8x16xf32>
    %cst_208 = arith.constant dense<0.000000e+00> : vector<8x8xf32>
    %235 = tpu.matmul %234, %18, %cst_208 {dimension_numbers = #tpu.dot_dimension_numbers<[1], [0], [0], [1], [0, 0, 1, 1], [], []>} : vector<8x16xf32>, vector<16x8xf32>, vector<8x8xf32> -> vector<8x8xf32>
    %236 = tpu.concatenate %151, %163, %175, %187, %199, %211, %223, %235 in 1 : vector<8x8xf32>, vector<8x8xf32>, vector<8x8xf32>, vector<8x8xf32>, vector<8x8xf32>, vector<8x8xf32>, vector<8x8xf32>, vector<8x8xf32> -> vector<8x64xf32>
    %cst_209 = arith.constant 0.000000e+00 : f32
    %237 = vector.broadcast %cst_209 : f32 to vector<8x64xf32>
    %238 = tpu.concatenate %236, %237 in 1 : vector<8x64xf32>, vector<8x64xf32> -> vector<8x128xf32>
    %c0_210 = arith.constant 0 : index
    %c0_211 = arith.constant 0 : index
    %c0_212 = arith.constant 0 : index
    %239 = vector.load %arg14[%c0_210, %c0_211, %c0_212] : memref<1x8x128xf32, #tpu.memory_space<vmem>>, vector<1x8x128xf32>
    %240 = vector.shape_cast %239 : vector<1x8x128xf32> to vector<8x128xf32>
    %241 = vector.shape_cast %238 : vector<8x128xf32> to vector<1x8x128xf32>
    tpu.vector_store %arg14[%c0_210, %c0_211, %c0_212], %241 {strides = array<i32>} : memref<1x8x128xf32, #tpu.memory_space<vmem>>, vector<1x8x128xf32>,
    return
  }
  func.func @transform_0(%arg0: i32) -> (i32, i32, i32) {
    %c0_i32 = arith.constant 0 : i32
    %c0_i32_0 = arith.constant 0 : i32
    %c0_i32_1 = arith.constant 0 : i32
    return %arg0, %c0_i32, %c0_i32_0 : i32, i32, i32
  }
  func.func @transform_1(%arg0: i32) -> (i32, i32, i32) {
    %c0_i32 = arith.constant 0 : i32
    %c0_i32_0 = arith.constant 0 : i32
    %c0_i32_1 = arith.constant 0 : i32
    %c0_i32_2 = arith.constant 0 : i32
    return %c0_i32, %c0_i32_0, %c0_i32_1 : i32, i32, i32
  }
  func.func @transform_2(%arg0: i32) -> (i32, i32) {
    %c0_i32 = arith.constant 0 : i32
    %c0_i32_0 = arith.constant 0 : i32
    %c0_i32_1 = arith.constant 0 : i32
    return %c0_i32, %c0_i32_0 : i32, i32
  }
  func.func @transform_3(%arg0: i32) -> (i32, i32, i32) {
    %c0_i32 = arith.constant 0 : i32
    %c0_i32_0 = arith.constant 0 : i32
    %c0_i32_1 = arith.constant 0 : i32
    %c0_i32_2 = arith.constant 0 : i32
    return %c0_i32, %c0_i32_0, %c0_i32_1 : i32, i32, i32
  }
  func.func @transform_4(%arg0: i32) -> (i32, i32) {
    %c0_i32 = arith.constant 0 : i32
    %c0_i32_0 = arith.constant 0 : i32
    %c0_i32_1 = arith.constant 0 : i32
    return %c0_i32, %c0_i32_0 : i32, i32
  }
  func.func @transform_5(%arg0: i32) -> (i32, i32) {
    %c0_i32 = arith.constant 0 : i32
    %c0_i32_0 = arith.constant 0 : i32
    %c0_i32_1 = arith.constant 0 : i32
    return %c0_i32, %c0_i32_0 : i32, i32
  }
  func.func @transform_6(%arg0: i32) -> (i32, i32) {
    %c0_i32 = arith.constant 0 : i32
    %c0_i32_0 = arith.constant 0 : i32
    %c0_i32_1 = arith.constant 0 : i32
    return %c0_i32, %c0_i32_0 : i32, i32
  }
  func.func @transform_7(%arg0: i32) -> (i32, i32) {
    %c0_i32 = arith.constant 0 : i32
    %c0_i32_0 = arith.constant 0 : i32
    %c0_i32_1 = arith.constant 0 : i32
    return %c0_i32, %c0_i32_0 : i32, i32
  }
  func.func @transform_8(%arg0: i32) -> (i32, i32) {
    %c0_i32 = arith.constant 0 : i32
    %c0_i32_0 = arith.constant 0 : i32
    %c0_i32_1 = arith.constant 0 : i32
    return %c0_i32, %c0_i32_0 : i32, i32
  }
  func.func @transform_9(%arg0: i32) -> (i32, i32) {
    %c0_i32 = arith.constant 0 : i32
    %c0_i32_0 = arith.constant 0 : i32
    %c0_i32_1 = arith.constant 0 : i32
    return %c0_i32, %c0_i32_0 : i32, i32
  }
  func.func @transform_10(%arg0: i32) -> (i32, i32) {
    %c0_i32 = arith.constant 0 : i32
    %c0_i32_0 = arith.constant 0 : i32
    %c0_i32_1 = arith.constant 0 : i32
    return %c0_i32, %c0_i32_0 : i32, i32
  }
  func.func @transform_11(%arg0: i32) -> (i32, i32) {
    %c0_i32 = arith.constant 0 : i32
    %c0_i32_0 = arith.constant 0 : i32
    %c0_i32_1 = arith.constant 0 : i32
    return %c0_i32, %c0_i32_0 : i32, i32
  }
  func.func @transform_12(%arg0: i32) -> (i32, i32, i32) {
    %c0_i32 = arith.constant 0 : i32
    %c0_i32_0 = arith.constant 0 : i32
    %c0_i32_1 = arith.constant 0 : i32
    return %arg0, %c0_i32, %c0_i32_0 : i32, i32, i32
  }
  func.func @transform_13(%arg0: i32) -> (i32, i32, i32) {
    %c0_i32 = arith.constant 0 : i32
    %c0_i32_0 = arith.constant 0 : i32
    %c0_i32_1 = arith.constant 0 : i32
    return %arg0, %c0_i32, %c0_i32_0 : i32, i32, i32
  }
}

</mosaic_0001>

<bundles_post_ra>
// kernel: tpu_custom_call.1
= control target key start
LH: loop header
LB: loop body
LE: loop exit
PB: predicated region body
PF: predicated region fallthrough
CT: control target
= control target key end

     0   :  { %s7673_s0 = inlined_call_operand.vmem [shape: f32[2,4,640], index: 0, kind: input, shape index: {}]   ;;  %s7674_s1 = inlined_call_operand.vmem [shape: f32[9,8,4], index: 1, kind: input, shape index: {}]   ;;  %s7675_s2 = inlined_call_operand.vmem [shape: f32[8,1], index: 2, kind: input, shape index: {}]   ;;  %s7676_s3 = inlined_call_operand.vmem [shape: f32[9,8,8], index: 3, kind: input, shape index: {}]   ;;  %s7677_s4 = inlined_call_operand.vmem [shape: f32[8,1], index: 4, kind: input, shape index: {}]   ;;  %s7678_s5 = inlined_call_operand.vmem [shape: f32[8,4], index: 5, kind: input, shape index: {}]   ;;  %s7679_s6 = inlined_call_operand.vmem [shape: f32[4,1], index: 6, kind: input, shape index: {}]   ;;  %s7680_s7 = inlined_call_operand.vmem [shape: f32[4,1], index: 7, kind: input, shape index: {}]   ;;  %s7681_s8 = inlined_call_operand.vmem [shape: f32[8,1], index: 8, kind: input, shape index: {}]   ;;  %s7682_s9 = inlined_call_operand.vmem [shape: f32[8,1], index: 9, kind: input, shape index: {}]   ;;  %s7683_s10 = inlined_call_operand.vmem [shape: f32[1,640], index: 10, kind: input, shape index: {}]   ;;  %s7684_s11 = inlined_call_operand.vmem [shape: f32[16,8], index: 11, kind: input, shape index: {}]   ;;  %s7685_s12 = inlined_call_operand.hbm [shape: f32[2,8,640], index: 12, kind: output, shape index: {0}]   ;;  %s7686_s13 = inlined_call_operand.hbm [shape: f32[2,8,128], index: 13, kind: output, shape index: {1}]  }
   0x1   :  { %7701 = sst [smem:[#allocation10_spill]] %s7673_s0 }
   0x2   :  { %7702 = sst [smem:[#allocation11_spill]] %s7674_s1 }
   0x3   :  { %7703 = sst [smem:[#allocation12_spill]] %s7675_s2 }
   0x4   :  { %7704 = sst [smem:[#allocation13_spill]] %s7676_s3 }
   0x5   :  { %19 = vsyncpa [#allocation5], 0 }
   0x6   :  { %21 = vsyncpa [#allocation5 + $0x1], 0 }
   0x7   :  { %22 = vsyncpa [#allocation7], 0 }
   0x8   :  { %24 = vsyncpa [#allocation7 + $0x1], 0  ;;  %s6865_s25 = smov 0   ;;  %s6867_s26 = smov 0  }
   0x9   :  { %s6869_s27 = smov 0   ;;  %s6871_s28 = smov 0  }
   0xa LB: > { %s6886_s29 = sadd.s32 4294967295, %s6772_s28   ;;  %s6151_s30 = sadd.s32 4294967294, %s6772_s28   ;;  %s6772_s28 = sphi %s6871_s28, %s7724_s28   ;;  %s6768_s27 = sphi %s6869_s27, %s7723_s27   ;;  %s6764_s26 = sphi %s6867_s26, %s7722_s26   ;;  %s6760_s25 = sphi %s6865_s25, %s7721_s25  }
   0xb   : > { %s6890_s14 = sadd.s32 1, %s6772_s28   ;;  %s294_s15 = sadd.s32 1, %s6768_s27 }
   0xc   : > { %s291_s16 = ssub.s32 %s6772_s28, %s6890_s14  ;;  %p304_p0 = scmp.ne.s32.totalorder %s6768_s27, %s6764_s26 }
   0xd   : > { %p292_p1 = scmp.eq.s32.totalorder %s291_s16, 0  ;;  %p305_p2 = scmp.eq.s32.totalorder %s6886_s29, 1 }
   0xe   : > { %p310_p3 = scmp.ne.s32.totalorder %s6764_s26, %s6760_s25  ;;  %p311_p4 = scmp.eq.s32.totalorder %s6151_s30, 1 }
   0xf   : > { %s6901_s17 = scalar_select %p292_p1, %s6768_s27, %s294_s15  }
  0x10   : > { %p6903_p5 = por %p305_p2, %p304_p0  ;;  %p6907_p6 = por %p311_p4, %p310_p3 }
  0x11   : > { %p6154_p7 = scmp.ge.s32.totalorder %s6772_s28, 1  ;;  %p396_p8 = scmp.lt.s32.totalorder %s6772_s28, 3 }
  0x13   : > { %p397_p9 = pnand %p6154_p7, %p396_p8 }
  0x14   : > { %v459_v0 = vld [vmem:[%s7679_s6] sm:$0xf] (!%p397_p9)  ;;  %v6774_v1 = vmov (!%p397_p9), 0   ;;  %v6775_v3 = vmov (!%p397_p9), 0.0   ;;  %p445_p10 = scmp.lt.s32.totalorder (!%p397_p9), %s6886_s29, 1  ;;  %v475_v4 = vlaneseq (!%p397_p9)  ;;  %s7707_s0 = sld [smem:[#allocation10_spill]] (!%p397_p9) }
  0x15   : > { %400 = sbr.rel (%p397_p9) target bundleno = 1750 (0x6d6), region = 68  ;;  %6665 = vset.pattern.permute.xlu0 (!%p397_p9), %v6774_v1  ;;  %6666 = vset.pattern.permute.xlu1 (!%p397_p9), %v6774_v1  ;;  %v460_v2 = vld [vmem:[%s7680_s7] sm:$0xf] (!%p397_p9)  ;;  %450 = vst [vmem:[#allocation2] sm:$0xf] (!%p397_p9), %v6775_v3  ;;  %s7695_s23 = smov (!%p397_p9), 32  }
  0x16   : > { %470 = vperm.xlu0 (!%p397_p9), %6665, %v459_v0   ;;  %451 = vst [vmem:[#allocation2 + $0x18] sm:$0xf] (!%p397_p9), %v6775_v3  ;;  %729 = vmatprep.mubr.f32.mxu1 (!%p397_p9), %v6775_v3  ;;  %v6776_v5 = vmov (!%p397_p9), 839922192   ;;  %v476_v7 = vshrl.u32 (!%p397_p9), %v475_v4, 7  ;;  %s7696_s30 = smov (!%p397_p9), 31  }
  0x17   : > { %658 = vmatprep.mubr.f32.mxu0 (!%p397_p9), %v6775_v3  ;;  %v473_v6 = vunpack.c.l.s4 (!%p397_p9), %v6776_v5  ;;  %v454_v9 = vld [vmem:[%s7683_s10] sm:$0x1f] (!%p397_p9)  ;;  %s7691_s15 = smov (!%p397_p9), 1   ;;  %s7689_s20 = smov (!%p397_p9), 97   ;;  %vm573_vm6 = vcmask (!%p397_p9), 261120   ;;  %vm583_vm7 = vcmask (!%p397_p9), 1043456  }
  0x18   : > { %vm455_vm0 = vcmp.gt.f32.partialorder (!%p397_p9), %v454_v9, 0.5  ;;  %v520_v11 = vsub.s32 (!%p397_p9), 4, %v476_v7  ;;  %v504_v13 = vsub.s32 (!%p397_p9), 0, %v476_v7  ;;  %v508_v14 = vsub.s32 (!%p397_p9), 1, %v476_v7  ;;  %s7698_s21 = smov (!%p397_p9), 96   ;;  %s7708_s2 = sld [smem:[#allocation12_spill]] (!%p397_p9) }
  0x19   : > { %v474_v8 = vunpack.c.0.s8 (!%p397_p9), %v473_v6  ;;  %v501_v15 = vsel (!%p397_p9), %vm455_vm0, 1, %v6774_v1  ;;  %v512_v17 = vsub.s32 (!%p397_p9), 2, %v476_v7  ;;  %v516_v18 = vsub.s32 (!%p397_p9), 3, %v476_v7  ;;  %s7709_s1 = sld [smem:[#allocation11_spill]] (!%p397_p9)  ;;  %s7714_s3 = sld [smem:[#allocation13_spill]] (!%p397_p9) }
  0x1a   : > { %485 = vperm.xlu0 (!%p397_p9), %6665, %v460_v2   ;;  %v6936_v22 = vrot.slane (!%p397_p9), %v501_v15, %v520_v11  ;;  %v6938_v28 = vrot.slane (!%p397_p9), %v501_v15, %v504_v13  ;;  %v6940_v29 = vrot.slane (!%p397_p9), %v501_v15, %v508_v14  ;;  %vm7700_vm8 = vcmask (!%p397_p9), 31744  }
  0x1b   : > { %v477_v10 = vsub.s32 (!%p397_p9), %v474_v8, %v476_v7  ;;  %v6942_v30 = vrot.slane (!%p397_p9), %v501_v15, %v512_v17  ;;  %v6944_v31 = vrot.slane (!%p397_p9), %v501_v15, %v516_v18  ;;  %vm6785_vm9 = vmmov (!%p397_p9), 0  }
  0x1c   : > { %s446_s24 = scalar_select %p445_p10, %s6886_s29, 1  ;;  %vm526_vm1 = vcmp.eq.s32.totalorder %v6936_v22, 1  ;;  %vm522_vm2 = vcmp.eq.s32.totalorder %v6938_v28, 1  ;;  %vm523_vm3 = vcmp.eq.s32.totalorder %v6940_v29, 1  ;;  %vm818_vm10 = vcmask 269312  }
  0x1d   : > { %vm524_vm4 = vcmp.eq.s32.totalorder %v6942_v30, 1  ;;  %vm525_vm5 = vcmp.eq.s32.totalorder %v6944_v31, 1  ;;  %vm1072_vm11 = vcmask 252928   ;;  %vm1331_vm12 = vcmask 7168  }
  0x1e   : > { %s6600_s16 = smul.u32 20, %s446_s24  ;;  %s6778_s24 = smov 33   ;;  %v456_v57 = vld [vmem:[%s7708_s2] sm:$0xff]  ;;  %vm1830_vm13 = vcmask 1039360   ;;  %vm2089_vm14 = vcmask 793600   ;;  %vm2348_vm15 = vcmask 785408  }
  0x1f   : > { %v6157_v5 = vld [vmem:[%s7709_s1 + $0x8] sm:$0xff]  ;;  %vm2607_vm0 = vcmask 777216  }
  0x20   : > { %s6931_s22 = scalar_lea.vmem %s7707_s0, %s6600_s16  ;;  %s7687_s16 = smov 127  }
  0x21   : > { %v465_v19 = vld [vmem:[%s6931_s22] sm:$0xff]  ;;  %v466_v20 = vld [vmem:[%s6931_s22 + $0x8] sm:$0xff]  ;;  %v467_v21 = vld [vmem:[%s6931_s22 + $0x10] sm:$0xf] }
  0x95   : > { %v471_v12 = vpop.permute.xlu0 %470 }
  0x96   : > { %v478_v16 = vrot.slane %v471_v12, %v477_v10 }
  0x98   : > { %v480_v24 = vmul.f32 %v478_v16, %v465_v19  ;;  %v481_v25 = vmul.f32 %v478_v16, %v466_v20  ;;  %v482_v26 = vmul.f32 %v478_v16, %v467_v21 }
  0x99   : > { %v486_v23 = vpop.permute.xlu0 %485 }
  0x9a   : > { %v493_v27 = vrot.slane %v486_v23, %v477_v10  ;;  %v549_v23 = vld [vmem:[%s7709_s1] sm:$0xff] }
  0x9c   : > { %v495_v32 = vadd.f32 %v493_v27, %v480_v24  ;;  %v496_v33 = vadd.f32 %v493_v27, %v481_v25  ;;  %v497_v34 = vadd.f32 %v493_v27, %v482_v26 }
  0x9e   : > { %v498_v35 = vmax.f32 %v495_v32, 0.0  ;;  %v499_v36 = vmax.f32 %v496_v33, 0.0  ;;  %v500_v37 = vmax.f32 %v497_v34, 0.0 }
  0xa0   : > { %v529_v38 = vcombine.high %v498_v35, %v498_v35  ;;  %v530_v39 = vcombine.high %v499_v36, %v499_v36  ;;  %v537_v40 = vsel %vm526_vm1, %v500_v37, 0.0  ;;  %v533_v41 = vsel %vm522_vm2, %v498_v35, 0.0 }
  0xa1   : > { %v535_v43 = vsel %vm524_vm4, %v499_v36, 0.0  ;;  %548 = vst [vmem:[#allocation2 + $0x14] sm:$0xf] %v537_v40 }
  0xa2   : > { %v534_v42 = vsel %vm523_vm3, %v529_v38, 0.0  ;;  %v536_v44 = vsel %vm525_vm5, %v530_v39, 0.0 }
  0xa3   : > { %v6961_v45 = vcombine.low %v533_v41, %v534_v42  ;;  %v6963_v46 = vcombine.low %v535_v43, %v536_v44  ;;  %v6999_v54 = vcombine.low %v536_v44, %v536_v44  ;;  %v7004_v55 = vcombine.low %v534_v42, %v534_v42  ;;  %v6174_v41 = vld [vmem:[%s7709_s1 + $0x10] sm:$0xff] }
  0xa5   : > { %546 = vst [vmem:[#allocation2 + $0x4] sm:$0xff] %v6961_v45  ;;  %547 = vst [vmem:[#allocation2 + $0xc] sm:$0xff] %v6963_v46 }
  0xa8   : > { %v1811_v53 = vld [vmem:[#allocation2 + $0x14] sm:$0xff] }
  0xa9   : > { %v1817_v56 = vcombine.high %v1811_v53, %v1811_v53 }
  0xac   : > { %v552_v47 = vld [vmem:[#allocation2 + $0x10] sm:$0xff]  ;;  %v550_v48 = vld [vmem:[#allocation2] sm:$0xff]  ;;  %v551_v49 = vld [vmem:[#allocation2 + $0x8] sm:$0xff] }
  0xad   : > { %569 = vrot.lane.b32.xlu1 %v552_v47, %s7695_s23  ;;  %561 = vrot.lane.b32.xlu0 %v550_v48, %s7695_s23  ;;  %v1057_v50 = vcombine.high %v550_v48, %v550_v48  ;;  %v1058_v51 = vcombine.high %v551_v49, %v551_v49  ;;  %v1059_v52 = vcombine.high %v552_v47, %v552_v47 }
  0xb1   : > { %565 = vrot.lane.b32.xlu1 %v551_v49, %s7695_s23  ;;  %806 = vrot.lane.b32.xlu0 %v550_v48, %s6778_s24 }
  0xb5   : > { %814 = vrot.lane.b32.xlu1 %v552_v47, %s6778_s24  ;;  %1060 = vrot.lane.b32.xlu0 %v550_v48, %s7696_s30 }
  0xb9   : > { %810 = vrot.lane.b32.xlu1 %v551_v49, %s6778_s24  ;;  %563 = vrot.lane.b32.xlu0 %v1057_v50, %s7695_s23 }
  0xbd   : > { %1068 = vrot.lane.b32.xlu1 %v552_v47, %s7696_s30  ;;  %1319 = vrot.lane.b32.xlu0 %v550_v48, %s7691_s15 }
  0xc1   : > { %1064 = vrot.lane.b32.xlu1 %v551_v49, %s7696_s30  ;;  %812 = vrot.lane.b32.xlu0 %v1058_v51, %s6778_s24 }
  0xc5   : > { %567 = vrot.lane.b32.xlu1 %v1058_v51, %s7695_s23  ;;  %808 = vrot.lane.b32.xlu0 %v1057_v50, %s6778_s24 }
  0xc9   : > { %1327 = vrot.lane.b32.xlu1 %v552_v47, %s7691_s15  ;;  %1066 = vrot.lane.b32.xlu0 %v1058_v51, %s7696_s30 }
  0xcd   : > { %571 = vrot.lane.b32.xlu1 %v1059_v52, %s7695_s23  ;;  %1062 = vrot.lane.b32.xlu0 %v1057_v50, %s7696_s30 }
  0xd1   : > { %1323 = vrot.lane.b32.xlu1 %v551_v49, %s7691_s15  ;;  %1818 = vrot.lane.b32.xlu0 %v6961_v45, %s7687_s16 }
  0xd5   : > { %816 = vrot.lane.b32.xlu1 %v1059_v52, %s6778_s24  ;;  %1325 = vrot.lane.b32.xlu0 %v1058_v51, %s7691_s15 }
  0xd9   : > { %1826 = vrot.lane.b32.xlu1 %v1811_v53, %s7687_s16  ;;  %1321 = vrot.lane.b32.xlu0 %v1057_v50, %s7691_s15 }
  0xdd   : > { %1070 = vrot.lane.b32.xlu1 %v1059_v52, %s7696_s30  ;;  %2077 = vrot.lane.b32.xlu0 %v6961_v45, %s7689_s20 }
  0xe1   : > { %1822 = vrot.lane.b32.xlu1 %v6963_v46, %s7687_s16  ;;  %2336 = vrot.lane.b32.xlu0 %v6961_v45, %s7698_s21 }
  0xe5   : > { %1329 = vrot.lane.b32.xlu1 %v1059_v52, %s7691_s15  ;;  %1824 = vrot.lane.b32.xlu0 %v6999_v54, %s7687_s16  ;;  %v6183_v52 = vld [vmem:[%s7709_s1 + $0x18] sm:$0xff]  ;;  %s7710_s15 = smov 1  }
  0xe9   : > { %1828 = vrot.lane.b32.xlu1 %v1817_v56, %s7687_s16  ;;  %1820 = vrot.lane.b32.xlu0 %v7004_v55, %s7687_s16  ;;  %s7693_s16 = smov 95  }
  0xed   : > { %2085 = vrot.lane.b32.xlu1 %v1811_v53, %s7689_s20  ;;  %2083 = vrot.lane.b32.xlu0 %v6999_v54, %s7689_s20 }
  0xf1   : > { %2081 = vrot.lane.b32.xlu1 %v6963_v46, %s7689_s20  ;;  %2079 = vrot.lane.b32.xlu0 %v7004_v55, %s7689_s20 }
  0xf5   : > { %2087 = vrot.lane.b32.xlu1 %v1817_v56, %s7689_s20  ;;  %2342 = vrot.lane.b32.xlu0 %v6999_v54, %s7698_s21  ;;  %s7711_s20 = smov 127  }
  0xf9   : > { %2344 = vrot.lane.b32.xlu1 %v1811_v53, %s7698_s21  ;;  %2338 = vrot.lane.b32.xlu0 %v7004_v55, %s7698_s21 }
  0xfd   : > { %2340 = vrot.lane.b32.xlu1 %v6963_v46, %s7698_s21  ;;  %2601 = vrot.lane.b32.xlu0 %v6999_v54, %s7693_s16 }
 0x101   : > { %2346 = vrot.lane.b32.xlu1 %v1817_v56, %s7698_s21  ;;  %2597 = vrot.lane.b32.xlu0 %v7004_v55, %s7693_s16 }
 0x105   : > { %2603 = vrot.lane.b32.xlu1 %v1811_v53, %s7693_s16  ;;  %2595 = vrot.lane.b32.xlu0 %v6961_v45, %s7693_s16 }
 0x109   : > { %2599 = vrot.lane.b32.xlu1 %v6963_v46, %s7693_s16  ;;  %2845 = vperm.xlu0 %6665, %v456_v57  }
 0x10d   : > { %2605 = vrot.lane.b32.xlu1 %v1817_v56, %s7693_s16  ;;  %s7712_s16 = smov 97  }
 0x111   : > { %2883 = vrot.lane.b32.xlu1 %v6775_v3, %s7695_s23 }
 0x115   : > { %3121 = vrot.lane.b32.xlu1 %v6775_v3, %s6778_s24 }
 0x119   : > { %3360 = vrot.lane.b32.xlu1 %v6775_v3, %s7696_s30 }
 0x11f   : > { %v570_v58 = vpop.permute.xlu1 %569  ;;  %v562_v59 = vpop.permute.xlu0 %561 }
 0x123   : > { %v566_v60 = vpop.permute.xlu1 %565  ;;  %v807_v61 = vpop.permute.xlu0 %806 }
 0x127   : > { %v815_v62 = vpop.permute.xlu1 %814  ;;  %v1061_v63 = vpop.permute.xlu0 %1060 }
 0x12b   : > { %v811_v0 = vpop.permute.xlu1 %810  ;;  %v564_v1 = vpop.permute.xlu0 %563 }
 0x12c   : > { %v575_v2 = vsel %vm573_vm6, %v564_v1, %v566_v60  ;;  %v574_v4 = vsel %vm573_vm6, %v562_v59, %v564_v1  ;;  %v6192_v59 = vld [vmem:[%s7709_s1 + $0x20] sm:$0xff] }
 0x12d   : > { %6158 = vmatprep.subr.msk.mxu0 %vm583_vm7, %v575_v2  ;;  %v6201_v2 = vld [vmem:[%s7709_s1 + $0x28] sm:$0xff] }
 0x12e   : > { %6159 = vmatpush1.msk.msra.mxu0 %vm583_vm7, %v574_v4 }
 0x12f   : > { %v7051_v6 = vpop.permute.xlu1 %1068  ;;  %v7053_v7 = vpop.permute.xlu0 %1319  ;;  %6160 = vmatmul.mubr.msk.f32.vlgmr.msra.gmra.mrb[0].mxu0 %vm7700_vm8, %v6157_v5  ;;  %6360 = vmatprep.subr.mxu0 %v6775_v3 }
 0x130   : > { %6362 = vmatprep.mubr.msk.f32.mxu0 %vm6785_vm9, %v6775_v3 }
 0x133   : > { %v1065_v8 = vpop.permute.xlu1 %1064  ;;  %v813_v9 = vpop.permute.xlu0 %812 }
 0x134   : > { %v822_v14 = vsel %vm818_vm10, %v813_v9, %v815_v62  ;;  %v821_v15 = vsel %vm818_vm10, %v811_v0, %v813_v9 }
 0x137   : > { %v568_v10 = vpop.permute.xlu1 %567  ;;  %v809_v11 = vpop.permute.xlu0 %808 }
 0x138   : > { %v577_v12 = vsel %vm573_vm6, %v568_v10, %v570_v58  ;;  %v576_v13 = vsel %vm573_vm6, %v566_v60, %v568_v10  ;;  %v820_v21 = vsel %vm818_vm10, %v809_v11, %v811_v0  ;;  %v819_v24 = vsel %vm818_vm10, %v807_v61, %v809_v11 }
 0x139   : > { %6161 = vmatprep.subr.msk.mxu1 %vm583_vm7, %v577_v12 }
 0x13a   : > { %6162 = vmatpush1.msk.msra.mxu1 %vm583_vm7, %v576_v13  ;;  %v6210_v13 = vld [vmem:[%s7709_s1 + $0x30] sm:$0xff] }
 0x13b   : > { %v7065_v16 = vpop.permute.xlu1 %1327  ;;  %6169 = vmatprep.subr.msk.mxu1 %vm583_vm7, %v822_v14  ;;  %v1067_v17 = vpop.permute.xlu0 %1066  ;;  %6163 = vmatmul.mubr.msk.f32.vlgmr.msra.gmra.mrb[0].mxu1 %vm7700_vm8, %v6157_v5 }
 0x13c   : > { %6170 = vmatpush1.msk.msra.mxu1 %vm583_vm7, %v821_v15  ;;  %972 = vmatprep.mubr.f32.mxu1 %v6775_v3  ;;  %v1076_v36 = vsel %vm1072_vm11, %v1067_v17, %v7051_v6  ;;  %v1075_v37 = vsel %vm1072_vm11, %v1065_v8, %v1067_v17 }
 0x13d   : > { %6365 = vmatprep.subr.mxu1 %v6775_v3 }
 0x13f   : > { %v572_v18 = vpop.permute.xlu1 %571  ;;  %v1063_v19 = vpop.permute.xlu0 %1062 }
 0x140   : > { %v578_v20 = vsel %vm573_vm6, %v570_v58, %v572_v18  ;;  %v1074_v27 = vsel %vm1072_vm11, %v1063_v19, %v1065_v8  ;;  %v1073_v32 = vsel %vm1072_vm11, %v1061_v63, %v1063_v19 }
 0x141   : > { %6361 = vmatpush3.msk.msra.mxu0 %vm583_vm7, %v578_v20 }
 0x142   : > { %6363 = vmatmul.mubr.msk.f32.vlgmr.msra.gmra.mrb[2].mxu0 %vm7700_vm8, %v6157_v5  ;;  %6166 = vmatprep.subr.msk.mxu0 %vm583_vm7, %v820_v21 }
 0x143   : > { %v1324_v25 = vpop.permute.xlu1 %1323  ;;  %6167 = vmatpush1.msk.msra.mxu0 %vm583_vm7, %v819_v24  ;;  %v7082_v26 = vpop.permute.xlu0 %1818  ;;  %901 = vmatprep.mubr.f32.mxu0 %v6775_v3 }
 0x144   : > { %6175 = vmatprep.subr.msk.mxu0 %vm583_vm7, %v1074_v27  ;;  %6171 = vmatmul.mubr.msk.f32.vlgmr.msra.gmra.mrb[0].mxu1 %vm7700_vm8, %v549_v23 }
 0x145   : > { %6367 = vmatprep.mubr.msk.f32.mxu1 %vm6785_vm9, %v6775_v3 }
 0x146   : > { %6168 = vmatmul.mubr.msk.f32.vlgmr.msra.gmra.mrb[0].mxu0 %vm7700_vm8, %v549_v23 }
 0x147   : > { %6176 = vmatpush1.msk.msra.mxu0 %vm583_vm7, %v1073_v32  ;;  %v817_v33 = vpop.permute.xlu1 %816  ;;  %v1326_v34 = vpop.permute.xlu0 %1325  ;;  %1155 = vmatprep.mubr.f32.mxu0 %v6775_v3 }
 0x148   : > { %v823_v35 = vsel %vm818_vm10, %v815_v62, %v817_v33  ;;  %6370 = vmatprep.subr.mxu0 %v6775_v3  ;;  %v1335_v40 = vsel %vm1331_vm12, %v1326_v34, %v7065_v16  ;;  %v1334_v42 = vsel %vm1331_vm12, %v1324_v25, %v1326_v34  ;;  %v6228_v34 = vld [vmem:[%s7709_s1 + $0x40] sm:$0xff] }
 0x149   : > { %6366 = vmatpush3.msk.msra.mxu1 %vm583_vm7, %v823_v35 }
 0x14a   : > { %6368 = vmatmul.mubr.msk.f32.vlgmr.msra.gmra.mrb[2].mxu1 %vm7700_vm8, %v549_v23  ;;  %6178 = vmatprep.subr.msk.mxu1 %vm583_vm7, %v1076_v36  ;;  %v6219_v23 = vld [vmem:[%s7709_s1 + $0x38] sm:$0xff] }
 0x14b   : > { %v7102_v38 = vpop.permute.xlu1 %1826  ;;  %6179 = vmatpush1.msk.msra.mxu1 %vm583_vm7, %v1075_v37  ;;  %v1322_v39 = vpop.permute.xlu0 %1321  ;;  %1226 = vmatprep.mubr.f32.mxu1 %v6775_v3 }
 0x14c   : > { %6187 = vmatprep.subr.msk.mxu1 %vm583_vm7, %v1335_v40  ;;  %v1333_v48 = vsel %vm1331_vm12, %v1322_v39, %v1324_v25  ;;  %v1332_v49 = vsel %vm1331_vm12, %v7053_v7, %v1322_v39 }
 0x14e   : > { %6177 = vmatmul.mubr.msk.f32.vlgmr.msra.gmra.mrb[0].mxu0 %vm7700_vm8, %v6174_v41  ;;  %6180 = vmatmul.mubr.msk.f32.vlgmr.msra.gmra.mrb[0].mxu1 %vm7700_vm8, %v6174_v41 }
 0x14f   : > { %6188 = vmatpush1.msk.msra.mxu1 %vm583_vm7, %v1334_v42  ;;  %v1071_v43 = vpop.permute.xlu1 %1070  ;;  %v2078_v44 = vpop.permute.xlu0 %2077  ;;  %6372 = vmatprep.mubr.msk.f32.mxu0 %vm6785_vm9, %v6775_v3 }
 0x150   : > { %v1077_v47 = vsel %vm1072_vm11, %v7051_v6, %v1071_v43  ;;  %1485 = vmatprep.mubr.f32.mxu1 %v6775_v3  ;;  %6375 = vmatprep.subr.mxu1 %v6775_v3 }
 0x151   : > { %6371 = vmatpush3.msk.msra.mxu0 %vm583_vm7, %v1077_v47 }
 0x152   : > { %6373 = vmatmul.mubr.msk.f32.vlgmr.msra.gmra.mrb[4].mxu0 %vm7700_vm8, %v6174_v41  ;;  %6184 = vmatprep.subr.msk.mxu0 %vm583_vm7, %v1333_v48 }
 0x153   : > { %v1823_v50 = vpop.permute.xlu1 %1822  ;;  %6185 = vmatpush1.msk.msra.mxu0 %vm583_vm7, %v1332_v49  ;;  %v7129_v51 = vpop.permute.xlu0 %2336  ;;  %1414 = vmatprep.mubr.f32.mxu0 %v6775_v3 }
 0x154   : > { %6193 = vmatprep.subr.msk.mxu0 %vm583_vm7, %v7004_v55 }
 0x156   : > { %6186 = vmatmul.mubr.msk.f32.vlgmr.msra.gmra.mrb[0].mxu0 %vm7700_vm8, %v6183_v52  ;;  %6189 = vmatmul.mubr.msk.f32.vlgmr.msra.gmra.mrb[0].mxu1 %vm7700_vm8, %v6183_v52 }
 0x157   : > { %6194 = vmatpush1.msk.msra.mxu0 %vm583_vm7, %v6961_v45  ;;  %v1330_v53 = vpop.permute.xlu1 %1329  ;;  %v1825_v56 = vpop.permute.xlu0 %1824  ;;  %6377 = vmatprep.mubr.msk.f32.mxu1 %vm6785_vm9, %v6775_v3 }
 0x158   : > { %v1336_v57 = vsel %vm1331_vm12, %v7065_v16, %v1330_v53  ;;  %1654 = vmatprep.mubr.f32.mxu0 %v6775_v3  ;;  %6380 = vmatprep.subr.mxu0 %v6775_v3  ;;  %v1834_v45 = vsel %vm1830_vm13, %v1825_v56, %v7102_v38  ;;  %v1833_v60 = vsel %vm1830_vm13, %v1823_v50, %v1825_v56 }
 0x159   : > { %6376 = vmatpush3.msk.msra.mxu1 %vm583_vm7, %v1336_v57 }
 0x15a   : > { %6378 = vmatmul.mubr.msk.f32.vlgmr.msra.gmra.mrb[4].mxu1 %vm7700_vm8, %v6183_v52  ;;  %6196 = vmatprep.subr.msk.mxu1 %vm583_vm7, %v6999_v54  ;;  %v1571_v54 = vld [vmem:[#allocation2 + $0x14] sm:$0xf] }
 0x15b   : > { %v1829_v55 = vpop.permute.xlu1 %1828  ;;  %6197 = vmatpush1.msk.msra.mxu1 %vm583_vm7, %v6963_v46  ;;  %v1821_v58 = vpop.permute.xlu0 %1820  ;;  %1725 = vmatprep.mubr.f32.mxu1 %v6775_v3 }
 0x15c   : > { %6205 = vmatprep.subr.msk.mxu1 %vm583_vm7, %v1834_v45  ;;  %v1832_v61 = vsel %vm1830_vm13, %v1821_v58, %v1823_v50  ;;  %v1831_v63 = vsel %vm1830_vm13, %v7082_v26, %v1821_v58  ;;  %v1835_v6 = vsel %vm1830_vm13, %v7102_v38, %v1829_v55 }
 0x15e   : > { %6195 = vmatmul.mubr.msk.f32.vlgmr.msra.gmra.mrb[0].mxu0 %vm7700_vm8, %v6192_v59  ;;  %6198 = vmatmul.mubr.msk.f32.vlgmr.msra.gmra.mrb[0].mxu1 %vm7700_vm8, %v6192_v59 }
 0x15f   : > { %6381 = vmatpush3.msk.msra.mxu0 %vm583_vm7, %v1571_v54  ;;  %6206 = vmatpush1.msk.msra.mxu1 %vm583_vm7, %v1833_v60  ;;  %v2086_v46 = vpop.permute.xlu1 %2085  ;;  %v2084_v62 = vpop.permute.xlu0 %2083 }
 0x160   : > { %6202 = vmatprep.subr.msk.mxu0 %vm583_vm7, %v1832_v61  ;;  %6382 = vmatprep.mubr.msk.f32.mxu0 %vm6785_vm9, %v6775_v3  ;;  %v2093_v7 = vsel %vm2089_vm14, %v2084_v62, %v2086_v46 }
 0x161   : > { %1984 = vmatprep.mubr.f32.mxu1 %v6775_v3  ;;  %6385 = vmatprep.subr.mxu1 %v6775_v3 }
 0x162   : > { %6383 = vmatmul.mubr.msk.f32.vlgmr.msra.gmra.mrb[6].mxu0 %vm7700_vm8, %v6192_v59 }
 0x163   : > { %6203 = vmatpush1.msk.msra.mxu0 %vm583_vm7, %v1831_v63  ;;  %v2082_v0 = vpop.permute.xlu1 %2081  ;;  %v2080_v1 = vpop.permute.xlu0 %2079  ;;  %1913 = vmatprep.mubr.f32.mxu0 %v6775_v3 }
 0x164   : > { %v2090_v4 = vsel %vm2089_vm14, %v2078_v44, %v2080_v1  ;;  %v2091_v5 = vsel %vm2089_vm14, %v2080_v1, %v2082_v0  ;;  %v2092_v10 = vsel %vm2089_vm14, %v2082_v0, %v2084_v62 }
 0x165   : > { %6211 = vmatprep.subr.msk.mxu0 %vm583_vm7, %v2091_v5 }
 0x166   : > { %6204 = vmatmul.mubr.msk.f32.vlgmr.msra.gmra.mrb[0].mxu0 %vm7700_vm8, %v6201_v2  ;;  %6207 = vmatmul.mubr.msk.f32.vlgmr.msra.gmra.mrb[0].mxu1 %vm7700_vm8, %v6201_v2 }
 0x167   : > { %6386 = vmatpush3.msk.msra.mxu1 %vm583_vm7, %v1835_v6  ;;  %6212 = vmatpush1.msk.msra.mxu0 %vm583_vm7, %v2090_v4  ;;  %v2088_v8 = vpop.permute.xlu1 %2087  ;;  %v2343_v9 = vpop.permute.xlu0 %2342 }
 0x168   : > { %6214 = vmatprep.subr.msk.mxu1 %vm583_vm7, %v2093_v7  ;;  %6387 = vmatprep.mubr.msk.f32.mxu1 %vm6785_vm9, %v6775_v3  ;;  %v2094_v15 = vsel %vm2089_vm14, %v2086_v46, %v2088_v8 }
 0x169   : > { %2172 = vmatprep.mubr.f32.mxu0 %v6775_v3  ;;  %6390 = vmatprep.subr.mxu0 %v6775_v3 }
 0x16a   : > { %6388 = vmatmul.mubr.msk.f32.vlgmr.msra.gmra.mrb[6].mxu1 %vm7700_vm8, %v6201_v2 }
 0x16b   : > { %6215 = vmatpush1.msk.msra.mxu1 %vm583_vm7, %v2092_v10  ;;  %v2345_v11 = vpop.permute.xlu1 %2344  ;;  %v2339_v12 = vpop.permute.xlu0 %2338  ;;  %2243 = vmatprep.mubr.f32.mxu1 %v6775_v3 }
 0x16c   : > { %v2352_v14 = vsel %vm2348_vm15, %v2343_v9, %v2345_v11  ;;  %v2349_v20 = vsel %vm2348_vm15, %v7129_v51, %v2339_v12 }
 0x16d   : > { %6223 = vmatprep.subr.msk.mxu1 %vm583_vm7, %v2352_v14 }
 0x16e   : > { %6213 = vmatmul.mubr.msk.f32.vlgmr.msra.gmra.mrb[0].mxu0 %vm7700_vm8, %v6210_v13  ;;  %6216 = vmatmul.mubr.msk.f32.vlgmr.msra.gmra.mrb[0].mxu1 %vm7700_vm8, %v6210_v13 }
 0x16f   : > { %6391 = vmatpush3.msk.msra.mxu0 %vm583_vm7, %v2094_v15  ;;  %v2341_v16 = vpop.permute.xlu1 %2340  ;;  %v2602_v17 = vpop.permute.xlu0 %2601  ;;  %6392 = vmatprep.mubr.msk.f32.mxu0 %vm6785_vm9, %v6775_v3 }
 0x170   : > { %v2350_v18 = vsel %vm2348_vm15, %v2339_v12, %v2341_v16  ;;  %v2351_v19 = vsel %vm2348_vm15, %v2341_v16, %v2343_v9  ;;  %2502 = vmatprep.mubr.f32.mxu1 %v6775_v3 }
 0x171   : > { %6220 = vmatprep.subr.msk.mxu0 %vm583_vm7, %v2350_v18  ;;  %6224 = vmatpush1.msk.msra.mxu1 %vm583_vm7, %v2351_v19 }
 0x172   : > { %6393 = vmatmul.mubr.msk.f32.vlgmr.msra.gmra.mrb[8].mxu0 %vm7700_vm8, %v6210_v13  ;;  %6395 = vmatprep.subr.mxu1 %v6775_v3 }
 0x173   : > { %6221 = vmatpush1.msk.msra.mxu0 %vm583_vm7, %v2349_v20  ;;  %v2347_v21 = vpop.permute.xlu1 %2346  ;;  %2431 = vmatprep.mubr.f32.mxu0 %v6775_v3  ;;  %v2598_v25 = vpop.permute.xlu0 %2597 }
 0x174   : > { %v2353_v24 = vsel %vm2348_vm15, %v2345_v11, %v2347_v21 }
 0x176   : > { %6225 = vmatmul.mubr.msk.f32.vlgmr.msra.gmra.mrb[0].mxu1 %vm7700_vm8, %v6219_v23  ;;  %6222 = vmatmul.mubr.msk.f32.vlgmr.msra.gmra.mrb[0].mxu0 %vm7700_vm8, %v6219_v23 }
 0x177   : > { %6396 = vmatpush3.msk.msra.mxu1 %vm583_vm7, %v2353_v24  ;;  %v2604_v26 = vpop.permute.xlu1 %2603  ;;  %6397 = vmatprep.mubr.msk.f32.mxu1 %vm6785_vm9, %v6775_v3  ;;  %v2596_v32 = vpop.permute.xlu0 %2595  ;;  %v462_v24 = vld [vmem:[%s7682_s9] sm:$0xff] }
 0x178   : > { %v2611_v27 = vsel %vm2607_vm0, %v2602_v17, %v2604_v26  ;;  %2690 = vmatprep.mubr.f32.mxu0 %v6775_v3  ;;  %v2608_v37 = vsel %vm2607_vm0, %v2596_v32, %v2598_v25 }
 0x179   : > { %6232 = vmatprep.subr.msk.mxu1 %vm583_vm7, %v2611_v27  ;;  %v457_v27 = vld [vmem:[%s7677_s4] sm:$0xff] }
 0x17a   : > { %6398 = vmatmul.mubr.msk.f32.vlgmr.msra.gmra.mrb[8].mxu1 %vm7700_vm8, %v6219_v23 }
 0x17b   : > { %v2600_v33 = vpop.permute.xlu1 %2599  ;;  %2761 = vmatprep.mubr.f32.mxu1 %v6775_v3 }
 0x17c   : > { %v2609_v35 = vsel %vm2607_vm0, %v2598_v25, %v2600_v33  ;;  %v2610_v36 = vsel %vm2607_vm0, %v2600_v33, %v2602_v17 }
 0x17d   : > { %6229 = vmatprep.subr.msk.mxu0 %vm583_vm7, %v2609_v35  ;;  %6233 = vmatpush1.msk.msra.mxu1 %vm583_vm7, %v2610_v36 }
 0x17e   : > { %6230 = vmatpush1.msk.msra.mxu0 %vm583_vm7, %v2608_v37  ;;  %6234 = vmatmul.mubr.msk.f32.vlgmr.msra.gmra.mrb[0].mxu1 %vm7700_vm8, %v6228_v34 }
 0x17f   : > { %v2606_v38 = vpop.permute.xlu1 %2605  ;;  %6231 = vmatmul.mubr.msk.f32.vlgmr.msra.gmra.mrb[0].mxu0 %vm7700_vm8, %v6228_v34  ;;  %6400 = vmatprep.subr.mxu0 %v6775_v3 }
 0x180   : > { %v2612_v39 = vsel %vm2607_vm0, %v2604_v26, %v2606_v38  ;;  %6402 = vmatprep.mubr.msk.f32.mxu0 %vm6785_vm9, %v6775_v3  ;;  %2973 = vmatprep.mubr.f32.mxu1 %v6775_v3  ;;  %v461_v26 = vld [vmem:[%s7681_s8] sm:$0xff] }
 0x181   : > { %6401 = vmatpush3.msk.msra.mxu0 %vm583_vm7, %v2612_v39  ;;  %v6237_v39 = vld [vmem:[%s7714_s3 + $0x8] sm:$0xff] }
 0x183   : > { %6403 = vmatmul.mubr.msk.f32.vlgmr.msra.gmra.mrb[10].mxu0 %vm7700_vm8, %v6228_v34  ;;  %v2884_v25 = vpop.permute.xlu1 %2883  ;;  %vm2905_vm8 = vcmask 64512  }
 0x184   : > { %3044 = vmatprep.mubr.f32.mxu0 %v6775_v3 }
 0x187   : > { %v3122_v32 = vpop.permute.xlu1 %3121 }
 0x188   : > { %v2846_v63 = vpop.permute.xlu0 %2845 }
 0x18b   : > { %v3361_v33 = vpop.permute.xlu1 %3360 }
 0x215   : > { %v802_v40 = vpop.f32.mrb[2].mxu0 }
 0x216   : > { %v6364_v41 = vpop.f32.mrb[3].mxu0 }
 0x21d   : > { %v1045_v42 = vpop.f32.mrb[2].mxu1 }
 0x21e   : > { %v1046_v43 = vadd.f32 %v1045_v42, %v802_v40  ;;  %v6369_v44 = vpop.f32.mrb[3].mxu1 }
 0x225   : > { %v1299_v47 = vpop.f32.mrb[4].mxu0 }
 0x226   : > { %v1307_v48 = vadd.f32 %v1299_v47, %v1046_v43  ;;  %v6374_v49 = vpop.f32.mrb[5].mxu0 }
 0x22d   : > { %v1558_v50 = vpop.f32.mrb[4].mxu1 }
 0x22e   : > { %v1566_v51 = vadd.f32 %v1558_v50, %v1307_v48  ;;  %v6379_v52 = vpop.f32.mrb[5].mxu1  ;;  %v2868_v50 = vld [vmem:[%s7714_s3] sm:$0xff] }
 0x235   : > { %v1798_v53 = vpop.f32.mrb[6].mxu0 }
 0x236   : > { %v1806_v56 = vadd.f32 %v1798_v53, %v1566_v51  ;;  %v6384_v57 = vpop.f32.mrb[7].mxu0 }
 0x23d   : > { %v2057_v45 = vpop.f32.mrb[6].mxu1 }
 0x23e   : > { %v2065_v55 = vadd.f32 %v2057_v45, %v1806_v56  ;;  %v6389_v58 = vpop.f32.mrb[7].mxu1 }
 0x245   : > { %v2316_v59 = vpop.f32.mrb[8].mxu0 }
 0x246   : > { %v2324_v60 = vadd.f32 %v2316_v59, %v2065_v55  ;;  %v6394_v54 = vpop.f32.mrb[9].mxu0 }
 0x24d   : > { %v2575_v61 = vpop.f32.mrb[8].mxu1 }
 0x24e   : > { %v2583_v46 = vadd.f32 %v2575_v61, %v2324_v60  ;;  %v6399_v62 = vpop.f32.mrb[9].mxu1 }
 0x251   : > { %v2763_v0 = vpop.f32.mrb[0].mxu1 }
 0x252   : > { %v7253_v1 = vadd.f32 %v2846_v63, %v2763_v0  ;;  %v2692_v2 = vpop.f32.mrb[0].mxu0  ;;  %v2765_v4 = vpop.f32.mrb[1].mxu1 }
 0x253   : > { %v7255_v5 = vadd.f32 %v2846_v63, %v2692_v2  ;;  %v7257_v6 = vadd.f32 %v2846_v63, %v2765_v4  ;;  %v2694_v7 = vpop.f32.mrb[1].mxu0 }
 0x254   : > { %v2855_v8 = vmax.f32 %v7253_v1, 0.0  ;;  %v7260_v9 = vadd.f32 %v2846_v63, %v2694_v7 }
 0x255   : > { %v2856_v10 = vmax.f32 %v7257_v6, 0.0  ;;  %v2853_v12 = vmax.f32 %v7255_v5, 0.0  ;;  %v6252_v5 = vld [vmem:[%s7714_s3 + $0x20] sm:$0xff] }
 0x256   : > { %v2860_v11 = vsel %vm524_vm4, %v2855_v8, 0.0  ;;  %v2834_v13 = vpop.f32.mrb[10].mxu0  ;;  %v2854_v15 = vmax.f32 %v7260_v9, 0.0 }
 0x257   : > { %v2861_v14 = vsel %vm525_vm5, %v2856_v10, 0.0  ;;  %v2842_v16 = vadd.f32 %v2834_v13, %v2583_v46  ;;  %2889 = vrot.lane.b32.xlu1 %v2860_v11, %s7695_s23  ;;  %v6404_v17 = vpop.f32.mrb[11].mxu0  ;;  %v2858_v18 = vsel %vm522_vm2, %v2853_v12, 0.0 }
 0x258   : > { %2891 = vrot.lane.b32.xlu0 %v2861_v14, %s7695_s23  ;;  %v2859_v19 = vsel %vm523_vm3, %v2854_v15, 0.0 }
 0x259   : > { %v7291_v20 = vadd.f32 %v2846_v63, %v2842_v16 }
 0x25b   : > { %2885 = vrot.lane.b32.xlu1 %v2858_v18, %s7695_s23  ;;  %v2857_v21 = vmax.f32 %v7291_v20, 0.0  ;;  %v6256_v20 = vld [vmem:[%s7714_s3 + $0x28] sm:$0xff] }
 0x25c   : > { %2887 = vrot.lane.b32.xlu0 %v2859_v19, %s7695_s23 }
 0x25d   : > { %v2862_v23 = vsel %vm526_vm1, %v2857_v21, 0.0 }
 0x25f   : > { %3127 = vrot.lane.b32.xlu1 %v2860_v11, %s6778_s24 }
 0x260   : > { %3129 = vrot.lane.b32.xlu0 %v2861_v14, %s6778_s24 }
 0x263   : > { %3123 = vrot.lane.b32.xlu1 %v2858_v18, %s6778_s24 }
 0x264   : > { %3125 = vrot.lane.b32.xlu0 %v2859_v19, %s6778_s24 }
 0x267   : > { %3366 = vrot.lane.b32.xlu1 %v2860_v11, %s7696_s30 }
 0x268   : > { %3368 = vrot.lane.b32.xlu0 %v2861_v14, %s7696_s30 }
 0x26b   : > { %3362 = vrot.lane.b32.xlu1 %v2858_v18, %s7696_s30 }
 0x26c   : > { %3364 = vrot.lane.b32.xlu0 %v2859_v19, %s7696_s30 }
 0x26f   : > { %3610 = vrot.lane.b32.xlu1 %v2860_v11, %s7710_s15 }
 0x270   : > { %3612 = vrot.lane.b32.xlu0 %v2861_v14, %s7710_s15 }
 0x273   : > { %3606 = vrot.lane.b32.xlu1 %v2858_v18, %s7710_s15 }
 0x274   : > { %2893 = vrot.lane.b32.xlu0 %v2862_v23, %s7695_s23 }
 0x277   : > { %3604 = vrot.lane.b32.xlu1 %v6775_v3, %s7710_s15 }
 0x278   : > { %3608 = vrot.lane.b32.xlu0 %v2859_v19, %s7710_s15 }
 0x27b   : > { %4088 = vrot.lane.b32.xlu1 %v2861_v14, %s7711_s20 }
 0x27c   : > { %3131 = vrot.lane.b32.xlu0 %v2862_v23, %s6778_s24  ;;  %s7713_s24 = smov 95  }
 0x27f   : > { %4084 = vrot.lane.b32.xlu1 %v2859_v19, %s7711_s20 }
 0x280   : > { %4086 = vrot.lane.b32.xlu0 %v2860_v11, %s7711_s20 }
 0x283   : > { %4082 = vrot.lane.b32.xlu1 %v2858_v18, %s7711_s20 }
 0x284   : > { %3370 = vrot.lane.b32.xlu0 %v2862_v23, %s7696_s30  ;;  %s7718_s30 = smov 96  }
 0x287   : > { %4332 = vrot.lane.b32.xlu1 %v2861_v14, %s7712_s16 }
 0x288   : > { %4092 = vrot.lane.b32.xlu0 %v6775_v3, %s7711_s20 }
 0x28b   : > { %4328 = vrot.lane.b32.xlu1 %v2859_v19, %s7712_s16 }
 0x28c   : > { %3614 = vrot.lane.b32.xlu0 %v2862_v23, %s7710_s15 }
 0x28f   : > { %4326 = vrot.lane.b32.xlu1 %v2858_v18, %s7712_s16 }
 0x290   : > { %4330 = vrot.lane.b32.xlu0 %v2860_v11, %s7712_s16 }
 0x293   : > { %4576 = vrot.lane.b32.xlu1 %v2861_v14, %s7698_s21 }
 0x294   : > { %4090 = vrot.lane.b32.xlu0 %v2862_v23, %s7711_s20 }
 0x297   : > { %4572 = vrot.lane.b32.xlu1 %v2859_v19, %s7698_s21 }
 0x298   : > { %4336 = vrot.lane.b32.xlu0 %v6775_v3, %s7712_s16 }
 0x29b   : > { %4570 = vrot.lane.b32.xlu1 %v2858_v18, %s7698_s21 }
 0x29c   : > { %4334 = vrot.lane.b32.xlu0 %v2862_v23, %s7712_s16 }
 0x29f   : > { %4820 = vrot.lane.b32.xlu1 %v2861_v14, %s7713_s24 }
 0x2a0   : > { %4574 = vrot.lane.b32.xlu0 %v2860_v11, %s7698_s21 }
 0x2a3   : > { %4816 = vrot.lane.b32.xlu1 %v2859_v19, %s7713_s24 }
 0x2a4   : > { %4578 = vrot.lane.b32.xlu0 %v2862_v23, %s7698_s21 }
 0x2a7   : > { %4814 = vrot.lane.b32.xlu1 %v2858_v18, %s7713_s24  ;;  %v6244_v18 = vld [vmem:[%s7714_s3 + $0x10] sm:$0xff] }
 0x2a8   : > { %4580 = vrot.lane.b32.xlu0 %v6775_v3, %s7698_s21 }
 0x2ab   : > { %5288 = vperm.xlu1 %6666, %v461_v26  }
 0x2ac   : > { %4822 = vrot.lane.b32.xlu0 %v2862_v23, %s7713_s24 }
 0x2af   : > { %5308 = vperm.xlu1 %6666, %v457_v27  }
 0x2b0   : > { %4818 = vrot.lane.b32.xlu0 %v2860_v11, %s7713_s24 }
 0x2b4   : > { %4824 = vrot.lane.b32.xlu0 %v6775_v3, %s7713_s24 }
 0x2b8   : > { %5298 = vperm.xlu0 %6665, %v462_v24  }
 0x2c9   : > { %v2890_v34 = vpop.permute.xlu1 %2889 }
 0x2ca   : > { %v2892_v35 = vpop.permute.xlu0 %2891 }
 0x2cb   : > { %v2898_v36 = vsel %vm573_vm6, %v2890_v34, %v2892_v35 }
 0x2cc   : > { %2980 = vmatprep.subr.mxu0 %v2898_v36 }
 0x2cd   : > { %v2886_v37 = vpop.permute.xlu1 %2885 }
 0x2ce   : > { %v2888_v38 = vpop.permute.xlu0 %2887  ;;  %v2895_v42 = vsel %vm573_vm6, %v2884_v25, %v2886_v37 }
 0x2cf   : > { %v2897_v40 = vsel %vm573_vm6, %v2888_v38, %v2890_v34  ;;  %v2896_v41 = vsel %vm573_vm6, %v2886_v37, %v2888_v38  ;;  %v6248_v34 = vld [vmem:[%s7714_s3 + $0x18] sm:$0xff] }
 0x2d0   : > { %2909 = vmatprep.subr.mxu1 %v2896_v41  ;;  %2981 = vmatpush1.msra.mxu0 %v2897_v40 }
 0x2d1   : > { %2910 = vmatpush1.msra.mxu1 %v2895_v42  ;;  %v3128_v43 = vpop.permute.xlu1 %3127  ;;  %6239 = vmatmul.mubr.msk.f32.vlgmr.msra.gmra.mrb[12].mxu0 %vm2905_vm8, %v6237_v39 }
 0x2d2   : > { %v3130_v44 = vpop.permute.xlu0 %3129  ;;  %6238 = vmatmul.mubr.msk.f32.vlgmr.msra.gmra.mrb[10].mxu1 %vm2905_vm8, %v6237_v39  ;;  %6405 = vmatprep.subr.mxu1 %v6775_v3 }
 0x2d3   : > { %v3136_v47 = vsel %vm818_vm10, %v3128_v43, %v3130_v44  ;;  %6407 = vmatprep.mubr.msk.f32.mxu1 %vm6785_vm9, %v6775_v3  ;;  %3281 = vmatprep.mubr.f32.mxu0 %v6775_v3 }
 0x2d4   : > { %3217 = vmatprep.subr.mxu0 %v3136_v47 }
 0x2d5   : > { %v3124_v48 = vpop.permute.xlu1 %3123 }
 0x2d6   : > { %v3126_v49 = vpop.permute.xlu0 %3125  ;;  %v3133_v61 = vsel %vm818_vm10, %v3122_v32, %v3124_v48 }
 0x2d7   : > { %v3135_v51 = vsel %vm818_vm10, %v3126_v49, %v3128_v43  ;;  %v3134_v54 = vsel %vm818_vm10, %v3124_v48, %v3126_v49  ;;  %v6260_v43 = vld [vmem:[%s7714_s3 + $0x30] sm:$0xff] }
 0x2d8   : > { %3218 = vmatpush1.msra.mxu0 %v3135_v51 }
 0x2d9   : > { %v3367_v52 = vpop.permute.xlu1 %3366  ;;  %6242 = vmatmul.mubr.msk.f32.vlgmr.msra.gmra.mrb[12].mxu0 %vm2905_vm8, %v2868_v50  ;;  %6410 = vmatprep.subr.mxu0 %v6775_v3 }
 0x2da   : > { %v3369_v53 = vpop.permute.xlu0 %3368  ;;  %6412 = vmatprep.mubr.msk.f32.mxu0 %vm6785_vm9, %v6775_v3 }
 0x2db   : > { %v3375_v11 = vsel %vm1072_vm11, %v3367_v52, %v3369_v53 }
 0x2dd   : > { %v3363_v56 = vpop.permute.xlu1 %3362 }
 0x2de   : > { %v3365_v57 = vpop.permute.xlu0 %3364  ;;  %v3372_v0 = vsel %vm1072_vm11, %v3361_v33, %v3363_v56 }
 0x2df   : > { %v3373_v63 = vsel %vm1072_vm11, %v3363_v56, %v3365_v57  ;;  %v3374_v13 = vsel %vm1072_vm11, %v3365_v57, %v3367_v52  ;;  %v6264_v56 = vld [vmem:[%s7714_s3 + $0x38] sm:$0xff] }
 0x2e1   : > { %v3611_v45 = vpop.permute.xlu1 %3610 }
 0x2e2   : > { %v7369_v55 = vpop.permute.xlu0 %3612 }
 0x2e3   : > { %v3619_v17 = vsel %vm1331_vm12, %v3611_v45, %v7369_v55 }
 0x2e5   : > { %v3607_v58 = vpop.permute.xlu1 %3606 }
 0x2e6   : > { %v2894_v59 = vpop.permute.xlu0 %2893 }
 0x2e7   : > { %v2899_v60 = vsel %vm573_vm6, %v2892_v35, %v2894_v59 }
 0x2e8   : > { %6406 = vmatpush3.msra.mxu1 %v2899_v60 }
 0x2e9   : > { %6408 = vmatmul.mubr.msk.f32.vlgmr.msra.gmra.mrb[12].mxu1 %vm2905_vm8, %v6237_v39  ;;  %3146 = vmatprep.subr.mxu1 %v3134_v54  ;;  %v3605_v46 = vpop.permute.xlu1 %3604  ;;  %v6268_v54 = vld [vmem:[%s7714_s3 + $0x40] sm:$0xff] }
 0x2ea   : > { %v3609_v62 = vpop.permute.xlu0 %3608  ;;  %3147 = vmatpush1.msra.mxu1 %v3133_v61  ;;  %3210 = vmatprep.mubr.f32.mxu1 %v6775_v3  ;;  %v3616_v27 = vsel %vm1331_vm12, %v3605_v46, %v3607_v58 }
 0x2eb   : > { %3385 = vmatprep.subr.mxu1 %v3373_v63  ;;  %v3618_v19 = vsel %vm1331_vm12, %v3609_v62, %v3611_v45  ;;  %v3617_v26 = vsel %vm1331_vm12, %v3607_v58, %v3609_v62  ;;  %v6673_v62 = vld [vmem:[%s6931_s22] sm:$0xff] }
 0x2ec   : > { %v5059_v63 = vcombine.high %v6673_v62, %v6673_v62 }
 0x2ed   : > { %6241 = vmatmul.mubr.msk.f32.vlgmr.msra.gmra.mrb[10].mxu1 %vm2905_vm8, %v2868_v50  ;;  %v7379_v2 = vpop.permute.xlu1 %4088 }
 0x2ee   : > { %3386 = vmatpush1.msra.mxu1 %v3372_v0  ;;  %v3132_v4 = vpop.permute.xlu0 %3131  ;;  %3449 = vmatprep.mubr.f32.mxu1 %v6775_v3 }
 0x2ef   : > { %v3137_v7 = vsel %vm818_vm10, %v3130_v44, %v3132_v4  ;;  %6415 = vmatprep.subr.mxu1 %v6775_v3  ;;  %v458_v4 = vld [vmem:[%s7678_s5] sm:$0xff] }
 0x2f0   : > { %6411 = vmatpush3.msra.mxu0 %v3137_v7 }
 0x2f1   : > { %6413 = vmatmul.mubr.msk.f32.vlgmr.msra.gmra.mrb[14].mxu0 %vm2905_vm8, %v2868_v50  ;;  %3456 = vmatprep.subr.mxu0 %v3375_v11  ;;  %v4085_v14 = vpop.permute.xlu1 %4084  ;;  %v6674_v11 = vld [vmem:[%s6931_s22 + $0x8] sm:$0xff] }
 0x2f2   : > { %v4087_v16 = vpop.permute.xlu0 %4086  ;;  %3457 = vmatpush1.msra.mxu0 %v3374_v13  ;;  %3520 = vmatprep.mubr.f32.mxu0 %v6775_v3  ;;  %v5060_v13 = vcombine.high %v6674_v11, %v6674_v11 }
 0x2f3   : > { %3700 = vmatprep.subr.mxu0 %v3619_v17  ;;  %v4095_v30 = vsel %vm1830_vm13, %v4085_v14, %v4087_v16 }
 0x2f5   : > { %6245 = vmatmul.mubr.msk.f32.vlgmr.msra.gmra.mrb[10].mxu1 %vm2905_vm8, %v6244_v18  ;;  %6246 = vmatmul.mubr.msk.f32.vlgmr.msra.gmra.mrb[12].mxu0 %vm2905_vm8, %v6244_v18  ;;  %v4083_v23 = vpop.permute.xlu1 %4082 }
 0x2f6   : > { %3701 = vmatpush1.msra.mxu0 %v3618_v19  ;;  %v3371_v24 = vpop.permute.xlu0 %3370  ;;  %6417 = vmatprep.mubr.msk.f32.mxu1 %vm6785_vm9, %v6775_v3 }
 0x2f7   : > { %v3376_v25 = vsel %vm1072_vm11, %v3369_v53, %v3371_v24  ;;  %3764 = vmatprep.mubr.f32.mxu0 %v6775_v3  ;;  %6420 = vmatprep.subr.mxu0 %v6775_v3 }
 0x2f8   : > { %6416 = vmatpush3.msra.mxu1 %v3376_v25 }
 0x2f9   : > { %6418 = vmatmul.mubr.msk.f32.vlgmr.msra.gmra.mrb[14].mxu1 %vm2905_vm8, %v6244_v18  ;;  %3629 = vmatprep.subr.mxu1 %v3617_v26  ;;  %v4333_v32 = vpop.permute.xlu1 %4332 }
 0x2fa   : > { %v4093_v33 = vpop.permute.xlu0 %4092  ;;  %3630 = vmatpush1.msra.mxu1 %v3616_v27  ;;  %3693 = vmatprep.mubr.f32.mxu1 %v6775_v3 }
 0x2fb   : > { %6293 = vmatprep.subr.msk.mxu1 %vm523_vm3, %v2854_v15 }
 0x2fd   : > { %6249 = vmatmul.mubr.msk.f32.vlgmr.msra.gmra.mrb[10].mxu1 %vm2905_vm8, %v6248_v34  ;;  %6250 = vmatmul.mubr.msk.f32.vlgmr.msra.gmra.mrb[12].mxu0 %vm2905_vm8, %v6248_v34  ;;  %v4329_v35 = vpop.permute.xlu1 %4328 }
 0x2fe   : > { %6294 = vmatpush1.msk.msra.mxu1 %vm522_vm2, %v2853_v12  ;;  %v3615_v36 = vpop.permute.xlu0 %3614  ;;  %6422 = vmatprep.mubr.msk.f32.mxu0 %vm6785_vm9, %v6775_v3 }
 0x2ff   : > { %v3620_v9 = vsel %vm1331_vm12, %v7369_v55, %v3615_v36  ;;  %3915 = vmatprep.mubr.f32.mxu1 %v6775_v3  ;;  %6425 = vmatprep.subr.mxu1 %v6775_v3 }
 0x300   : > { %6421 = vmatpush3.msra.mxu0 %v3620_v9 }
 0x301   : > { %6423 = vmatmul.mubr.msk.f32.vlgmr.msra.gmra.mrb[16].mxu0 %vm2905_vm8, %v6248_v34  ;;  %6295 = vmatprep.subr.msk.mxu0 %vm525_vm5, %v2856_v10  ;;  %v4327_v28 = vpop.permute.xlu1 %4326  ;;  %v4094_v10 = vsel %vm1830_vm13, %v4083_v23, %v4085_v14  ;;  %v6675_v14 = vld [vmem:[%s6931_s22 + $0x10] sm:$0xf]  ;;  %s7536_s22 = sand.u32 1, %s6764_s26  }
 0x302   : > { %v4331_v29 = vpop.permute.xlu0 %4330  ;;  %6296 = vmatpush1.msk.msra.mxu0 %vm524_vm4, %v2855_v8  ;;  %3986 = vmatprep.mubr.f32.mxu0 %v6775_v3  ;;  %v4096_v8 = vsel %vm1830_vm13, %v4087_v16, %v7379_v2  ;;  %s6599_s0 = smul.u32 40, %s7536_s22  ;;  %vm5340_vm4 = vcmask 130048   ;;  %s6028_s1 = scalar_lea.sflag [#allocation5], %s7536_s22 }
 0x303   : > { %v4339_v15 = vsel %vm2089_vm14, %v4329_v35, %v4331_v29  ;;  %v4340_v41 = vsel %vm2089_vm14, %v4331_v29, %v4333_v32 }
 0x304   : > { %s7539_s23 = scalar_lea.vmem [#allocation4], %s6599_s0 }
 0x305   : > { %6253 = vmatmul.mubr.msk.f32.vlgmr.msra.gmra.mrb[10].mxu1 %vm2905_vm8, %v6252_v5  ;;  %6254 = vmatmul.mubr.msk.f32.vlgmr.msra.gmra.mrb[12].mxu0 %vm2905_vm8, %v6252_v5  ;;  %v4577_v6 = vpop.permute.xlu1 %4576  ;;  %s6047_s21 = sshll.u32 %s7539_s23, 4  ;;  %s7597_s21 = int_to_ptr.vmem [resolvable:$true] %s6047_s21 }
 0x306   : > { %6426 = vmatpush3.msk.msra.mxu1 %vm526_vm1, %v2857_v21  ;;  %v4091_v31 = vpop.permute.xlu0 %4090  ;;  %6427 = vmatprep.mubr.msk.f32.mxu1 %vm6785_vm9, %v6775_v3  ;;  %v4338_v21 = vsel %vm2089_vm14, %v4327_v28, %v4329_v35  ;;  %vm7715_vm1 = vcmask 31744   ;;  %s6678_s2 = scalar_lea.vmem %s7597_s21, 640 }
 0x307   : > { %4107 = vmatprep.subr.mxu1 %v4095_v30  ;;  %v4097_v1 = vsel %vm1830_vm13, %v7379_v2, %v4091_v31  ;;  %4242 = vmatprep.mubr.f32.mxu0 %v6775_v3  ;;  %v4098_v37 = vsel %vm1830_vm13, %v4091_v31, %v4093_v33  ;;  %vm7716_vm2 = vmmov %vm7715_vm1  ;;  %p6679_p11 = scmp.ne.s32.totalorder %s7597_s21, %s6678_s2 }
 0x308   : > { %4178 = vmatprep.subr.mxu0 %v4097_v1  ;;  %vm7717_vm3 = vmmov %vm7715_vm1 }
 0x309   : > { %6428 = vmatmul.mubr.msk.f32.vlgmr.msra.gmra.mrb[16].mxu1 %vm2905_vm8, %v6252_v5  ;;  %4179 = vmatpush1.msra.mxu0 %v4096_v8  ;;  %v4573_v22 = vpop.permute.xlu1 %4572  ;;  %p6680_p12 = pnand %p6679_p11, %p6903_p5 }
 0x30a   : > { %4108 = vmatpush1.msra.mxu1 %v4094_v10  ;;  %v4337_v12 = vpop.permute.xlu0 %4336  ;;  %4171 = vmatprep.mubr.f32.mxu1 %v6775_v3 }
 0x30b   : > { %4351 = vmatprep.subr.mxu1 %v4339_v15  ;;  %6430 = vmatprep.subr.mxu0 %v6775_v3  ;;  %p6681_p13 = pneg %p6680_p12 }
 0x30d   : > { %6257 = vmatmul.mubr.msk.f32.vlgmr.msra.gmra.mrb[10].mxu1 %vm2905_vm8, %v6256_v20  ;;  %6258 = vmatmul.mubr.msk.f32.vlgmr.msra.gmra.mrb[12].mxu0 %vm2905_vm8, %v6256_v20  ;;  %v4571_v39 = vpop.permute.xlu1 %4570 }
 0x30e   : > { %6431 = vmatpush3.msra.mxu0 %v4098_v37  ;;  %4352 = vmatpush1.msra.mxu1 %v4338_v21  ;;  %v4335_v38 = vpop.permute.xlu0 %4334  ;;  %v4582_v52 = vsel %vm2348_vm15, %v4571_v39, %v4573_v22 }
 0x30f   : > { %6432 = vmatprep.mubr.msk.f32.mxu0 %vm6785_vm9, %v6775_v3  ;;  %v4341_v40 = vsel %vm2089_vm14, %v4333_v32, %v4335_v38  ;;  %4415 = vmatprep.mubr.f32.mxu1 %v6775_v3  ;;  %v4342_v44 = vsel %vm2089_vm14, %v4335_v38, %v4337_v12 }
 0x310   : > { %4422 = vmatprep.subr.mxu0 %v4341_v40  ;;  %6435 = vmatprep.subr.mxu1 %v6775_v3 }
 0x311   : > { %6433 = vmatmul.mubr.msk.f32.vlgmr.msra.gmra.mrb[18].mxu0 %vm2905_vm8, %v6256_v20  ;;  %v4821_v47 = vpop.permute.xlu1 %4820 }
 0x312   : > { %4423 = vmatpush1.msra.mxu0 %v4340_v41  ;;  %v4575_v42 = vpop.permute.xlu0 %4574  ;;  %4486 = vmatprep.mubr.f32.mxu0 %v6775_v3 }
 0x313   : > { %v4583_v49 = vsel %vm2348_vm15, %v4573_v22, %v4575_v42  ;;  %v4584_v51 = vsel %vm2348_vm15, %v4575_v42, %v4577_v6 }
 0x315   : > { %6261 = vmatmul.mubr.msk.f32.vlgmr.msra.gmra.mrb[10].mxu1 %vm2905_vm8, %v6260_v43  ;;  %6262 = vmatmul.mubr.msk.f32.vlgmr.msra.gmra.mrb[12].mxu0 %vm2905_vm8, %v6260_v43  ;;  %v4817_v57 = vpop.permute.xlu1 %4816 }
 0x316   : > { %6436 = vmatpush3.msra.mxu1 %v4342_v44  ;;  %v4579_v48 = vpop.permute.xlu0 %4578  ;;  %6437 = vmatprep.mubr.msk.f32.mxu1 %vm6785_vm9, %v6775_v3 }
 0x317   : > { %4595 = vmatprep.subr.mxu1 %v4583_v49  ;;  %v4585_v50 = vsel %vm2348_vm15, %v4577_v6, %v4579_v48  ;;  %4730 = vmatprep.mubr.f32.mxu0 %v6775_v3 }
 0x318   : > { %4666 = vmatprep.subr.mxu0 %v4585_v50 }
 0x319   : > { %6438 = vmatmul.mubr.msk.f32.vlgmr.msra.gmra.mrb[18].mxu1 %vm2905_vm8, %v6260_v43  ;;  %4667 = vmatpush1.msra.mxu0 %v4584_v51  ;;  %v4815_v59 = vpop.permute.xlu1 %4814 }
 0x31a   : > { %4596 = vmatpush1.msra.mxu1 %v4582_v52  ;;  %v4581_v53 = vpop.permute.xlu0 %4580  ;;  %6440 = vmatprep.subr.mxu0 %v6775_v3  ;;  %v4826_v0 = vsel %vm2607_vm0, %v4815_v59, %v4817_v57 }
 0x31b   : > { %v4586_v45 = vsel %vm2348_vm15, %v4579_v48, %v4581_v53  ;;  %4659 = vmatprep.mubr.f32.mxu1 %v6775_v3 }
 0x31d   : > { %6266 = vmatmul.mubr.msk.f32.vlgmr.msra.gmra.mrb[12].mxu0 %vm2905_vm8, %v6264_v56  ;;  %6265 = vmatmul.mubr.msk.f32.vlgmr.msra.gmra.mrb[10].mxu1 %vm2905_vm8, %v6264_v56 }
 0x31e   : > { %6441 = vmatpush3.msra.mxu0 %v4586_v45  ;;  %v4823_v55 = vpop.permute.xlu0 %4822  ;;  %6442 = vmatprep.mubr.msk.f32.mxu0 %vm6785_vm9, %v6775_v3 }
 0x31f   : > { %v4829_v58 = vsel %vm2607_vm0, %v4821_v47, %v4823_v55  ;;  %4903 = vmatprep.mubr.f32.mxu1 %v6775_v3 }
 0x320   : > { %4910 = vmatprep.subr.mxu0 %v4829_v58 }
 0x321   : > { %6443 = vmatmul.mubr.msk.f32.vlgmr.msra.gmra.mrb[20].mxu0 %vm2905_vm8, %v6264_v56 }
 0x322   : > { %v4819_v60 = vpop.permute.xlu0 %4818  ;;  %4974 = vmatprep.mubr.f32.mxu0 %v6775_v3 }
 0x323   : > { %v4828_v61 = vsel %vm2607_vm0, %v4819_v60, %v4821_v47  ;;  %v4827_v46 = vsel %vm2607_vm0, %v4817_v57, %v4819_v60 }
 0x324   : > { %4839 = vmatprep.subr.mxu1 %v4827_v46  ;;  %4911 = vmatpush1.msra.mxu0 %v4828_v61 }
 0x325   : > { %4840 = vmatpush1.msra.mxu1 %v4826_v0  ;;  %6270 = vmatmul.mubr.msk.f32.vlgmr.msra.gmra.mrb[12].mxu0 %vm2905_vm8, %v6268_v54 }
 0x326   : > { %v4825_v2 = vpop.permute.xlu0 %4824  ;;  %6269 = vmatmul.mubr.msk.f32.vlgmr.msra.gmra.mrb[10].mxu1 %vm2905_vm8, %v6268_v54  ;;  %6445 = vmatprep.subr.mxu1 %v6775_v3 }
 0x327   : > { %v4830_v7 = vsel %vm2607_vm0, %v4823_v55, %v4825_v2  ;;  %6272 = vmatprep.subr.msk.mxu0 %vm583_vm7, %v5059_v63  ;;  %5138 = vmatprep.mubr.f32.mxu0 %v6775_v3 }
 0x328   : > { %6446 = vmatpush3.msra.mxu1 %v4830_v7  ;;  %6273 = vmatpush1.msk.msra.mxu0 %vm583_vm7, %v6673_v62 }
 0x329   : > { %6447 = vmatprep.mubr.msk.f32.mxu1 %vm6785_vm9, %v6775_v3  ;;  %6274 = vmatmul.mubr.msk.f32.vlgmr.msra.gmra.mrb[22].mxu0 %vm7715_vm1, %v458_v4 }
 0x32a   : > { %6448 = vmatmul.mubr.msk.f32.vlgmr.msra.gmra.mrb[20].mxu1 %vm2905_vm8, %v6268_v54  ;;  %6450 = vmatprep.subr.mxu0 %v6775_v3  ;;  %v5289_v10 = vpop.permute.xlu1 %5288 }
 0x32b   : > { %6275 = vmatprep.subr.msk.mxu1 %vm583_vm7, %v5060_v13  ;;  %6451 = vmatpush3.msk.msra.mxu0 %vm583_vm7, %v6675_v14 }
 0x32c   : > { %6452 = vmatprep.mubr.msk.f32.mxu0 %vm6785_vm9, %v6775_v3  ;;  %6276 = vmatpush1.msk.msra.mxu1 %vm583_vm7, %v6674_v11 }
 0x32d   : > { %5209 = vmatprep.mubr.f32.mxu1 %v6775_v3  ;;  %6453 = vmatmul.mubr.msk.f32.vlgmr.msra.gmra.mrb[24].mxu0 %vm7716_vm2, %v458_v4 }
 0x32e   : > { %6277 = vmatmul.mubr.msk.f32.vlgmr.msra.gmra.mrb[22].mxu1 %vm7717_vm3, %v458_v4  ;;  %6466 = vmatprep.mubr.msk.f32.mxu0 %vm6785_vm9, %v6775_v3  ;;  %v5309_v21 = vpop.permute.xlu1 %5308 }
 0x32f   : > { %6459 = vmatprep.mubr.msk.f32.mxu1 %vm6785_vm9, %v6775_v3 }
 0x337   : > { %v5299_v41 = vpop.permute.xlu0 %5298 }
 0x3bc   : > { %v3117_v16 = vpop.f32.mrb[12].mxu1 }
 0x3bd   : > { %v6409_v17 = vpop.f32.mrb[13].mxu1 }
 0x3be   : > { %v463_v17 = vld [vmem:[%s7684_s11] sm:$0xff] }
 0x3c4   : > { %v3354_v18 = vpop.f32.mrb[14].mxu0 }
 0x3c5   : > { %v3355_v19 = vadd.f32 %v3354_v18, %v3117_v16  ;;  %v6414_v23 = vpop.f32.mrb[15].mxu0  ;;  %v464_v18 = vld [vmem:[%s7684_s11 + $0x8] sm:$0xff] }
 0x3cc   : > { %v3593_v24 = vpop.f32.mrb[14].mxu1 }
 0x3cd   : > { %v3601_v25 = vadd.f32 %v3593_v24, %v3355_v19  ;;  %v6419_v26 = vpop.f32.mrb[15].mxu1  ;;  %v6786_v24 = vmov 0.0|0.0  }
 0x3ce   : > { %6511 = vmatprep.subr.bf16.mxu1 %v6786_v24  ;;  %6514 = vmatprep.subr.bf16.mxu0 %v6786_v24 }
 0x3d4   : > { %v3837_v27 = vpop.f32.mrb[16].mxu0 }
 0x3d5   : > { %v3845_v32 = vadd.f32 %v3837_v27, %v3601_v25  ;;  %v6424_v33 = vpop.f32.mrb[17].mxu0  ;;  %v6512_v25 = vpack.c.bf16 %v464_v18, %v463_v17 }
 0x3d7   : > { %6513 = vmatpush3.bf16.msra.mxu1 %v6512_v25  ;;  %6516 = vmatpush3.bf16.msra.mxu0 %v6512_v25 }
 0x3d8   : > { %6517 = vmatprep.subr.bf16.mxu1 %v6786_v24  ;;  %6520 = vmatprep.subr.bf16.mxu0 %v6786_v24 }
 0x3dc   : > { %v4059_v34 = vpop.f32.mrb[16].mxu1 }
 0x3dd   : > { %v4067_v35 = vadd.f32 %v4059_v34, %v3845_v32  ;;  %v6429_v36 = vpop.f32.mrb[17].mxu1 }
 0x3e4   : > { %v4315_v9 = vpop.f32.mrb[18].mxu0 }
 0x3e5   : > { %v4323_v28 = vadd.f32 %v4315_v9, %v4067_v35  ;;  %v6434_v29 = vpop.f32.mrb[19].mxu0 }
 0x3ec   : > { %v4559_v5 = vpop.f32.mrb[18].mxu1 }
 0x3ed   : > { %v4567_v6 = vadd.f32 %v4559_v5, %v4323_v28  ;;  %v6439_v31 = vpop.f32.mrb[19].mxu1 }
 0x3f4   : > { %v4803_v30 = vpop.f32.mrb[20].mxu0 }
 0x3f5   : > { %v4811_v1 = vadd.f32 %v4803_v30, %v4567_v6  ;;  %v6444_v8 = vpop.f32.mrb[21].mxu0 }
 0x3f8   : > { %v4976_v22 = vpop.f32.mrb[12].mxu0 }
 0x3f9   : > { %v4905_v12 = vpop.f32.mrb[10].mxu1  ;;  %v4978_v15 = vpop.f32.mrb[13].mxu0  ;;  %v5313_v46 = vadd.f32 %v5309_v21, %v4976_v22 }
 0x3fa   : > { %v4907_v20 = vpop.f32.mrb[11].mxu1  ;;  %v5311_v47 = vadd.f32 %v5309_v21, %v4905_v12  ;;  %v5314_v62 = vadd.f32 %v5309_v21, %v4978_v15 }
 0x3fb   : > { %v5312_v49 = vadd.f32 %v5309_v21, %v4907_v20 }
 0x3fc   : > { %v5140_v37 = vpop.f32.mrb[22].mxu0 }
 0x3fd   : > { %v5291_v38 = vmul.f32 %v5289_v10, %v5140_v37  ;;  %v5047_v39 = vpop.f32.mrb[20].mxu1  ;;  %v5142_v40 = vpop.f32.mrb[23].mxu0 }
 0x3fe   : > { %v5055_v42 = vadd.f32 %v5047_v39, %v4811_v1  ;;  %v5292_v43 = vmul.f32 %v5289_v10, %v5142_v40  ;;  %v6449_v44 = vpop.f32.mrb[21].mxu1 }
 0x3ff   : > { %v5301_v48 = vadd.f32 %v5299_v41, %v5291_v38 }
 0x400   : > { %v5302_v50 = vadd.f32 %v5299_v41, %v5292_v43  ;;  %v5282_v51 = vpop.f32.mrb[24].mxu0  ;;  %v5315_v59 = vadd.f32 %v5309_v21, %v5055_v42 }
 0x401   : > { %v5316_v52 = vadd.f32 %v5311_v47, %v5301_v48  ;;  %v5295_v53 = vmul.f32 %v5289_v10, %v5282_v51  ;;  %v5211_v56 = vpop.f32.mrb[22].mxu1  ;;  %v6454_v57 = vpop.f32.mrb[25].mxu0 }
 0x402   : > { %v5317_v45 = vadd.f32 %v5312_v49, %v5302_v50  ;;  %v5293_v55 = vmul.f32 %v5289_v10, %v5211_v56  ;;  %v5213_v58 = vpop.f32.mrb[23].mxu1 }
 0x403   : > { %5321 = vst [vmem:[%s7539_s23] sm:$0xff] %v5316_v52  ;;  %v5305_v60 = vadd.f32 %v5299_v41, %v5295_v53  ;;  %v5294_v54 = vmul.f32 %v5289_v10, %v5213_v58  ;;  %5328 = vrot.lane.b32.xlu0 %v5316_v52, %s7711_s20 }
 0x404   : > { %5322 = vst [vmem:[%s7539_s23 + $0x8] sm:$0xff] %v5317_v45  ;;  %v5303_v61 = vadd.f32 %v5299_v41, %v5293_v55  ;;  %5415 = vrot.lane.b32.xlu1 %v5317_v45, %s7711_s20 }
 0x405   : > { %v5320_v63 = vadd.f32 %v5315_v59, %v5305_v60  ;;  %v5304_v0 = vadd.f32 %v5299_v41, %v5294_v54 }
 0x406   : > { %v5318_v2 = vadd.f32 %v5313_v46, %v5303_v61 }
 0x407   : > { %5325 = vst [vmem:[%s7539_s23 + $0x20] sm:$0xff] %v5320_v63  ;;  %v5319_v4 = vadd.f32 %v5314_v62, %v5304_v0 }
 0x408   : > { %5323 = vst [vmem:[%s7539_s23 + $0x10] sm:$0xff] %v5318_v2  ;;  %5577 = vrot.lane.b32.xlu0 %v5318_v2, %s7711_s20 }
 0x409   : > { %5324 = vst [vmem:[%s7539_s23 + $0x18] sm:$0xff] %v5319_v4  ;;  %5739 = vrot.lane.b32.xlu1 %v5319_v4, %s7711_s20  ;;  %s6789_s23 = smov [#allocation4]  }
 0x40c   : > { %5901 = vrot.lane.b32.xlu0 %v5320_v63, %s7711_s20  ;;  %s7719_s20 = smov 31  }
 0x475   : > { %v5329_v7 = vpop.permute.xlu0 %5328 }
 0x476   : > { %v5331_v11 = vmax.f32 %v5316_v52, %v5329_v7  ;;  %v5416_v13 = vpop.permute.xlu1 %5415 }
 0x477   : > { %v5418_v14 = vmax.f32 %v5317_v45, %v5416_v13 }
 0x478   : > { %5333 = vrot.lane.b32.xlu1 %v5331_v11, %s7718_s30 }
 0x479   : > { %5420 = vrot.lane.b32.xlu0 %v5418_v14, %s7718_s30 }
 0x47a   : > { %v5578_v16 = vpop.permute.xlu0 %5577 }
 0x47b   : > { %v5580_v19 = vmax.f32 %v5318_v2, %v5578_v16  ;;  %v5740_v23 = vpop.permute.xlu1 %5739 }
 0x47c   : > { %v5742_v26 = vmax.f32 %v5319_v4, %v5740_v23 }
 0x47d   : > { %5582 = vrot.lane.b32.xlu1 %v5580_v19, %s7718_s30 }
 0x47e   : > { %5744 = vrot.lane.b32.xlu0 %v5742_v26, %s7718_s30  ;;  %v5902_v27 = vpop.permute.xlu0 %5901 }
 0x47f   : > { %v5904_v32 = vmax.f32 %v5320_v63, %v5902_v27 }
 0x481   : > { %5906 = vrot.lane.b32.xlu1 %v5904_v32, %s7718_s30  ;;  %s6601_s30 = smul.u32 640, %s6886_s29 }
 0x483   : > { %s7595_s0 = scalar_lea.hbm %s7685_s12, %s6601_s30 }
 0x4ea   : > { %v5334_v33 = vpop.permute.xlu1 %5333 }
 0x4eb   : > { %v5336_v34 = vmax.f32 %v5331_v11, %v5334_v33  ;;  %v5421_v35 = vpop.permute.xlu0 %5420 }
 0x4ec   : > { %v5423_v36 = vmax.f32 %v5331_v11, %v5421_v35  ;;  %v5499_v9 = vmax.f32 %v5418_v14, %v5421_v35 }
 0x4ed   : > { %5338 = vrot.lane.b32.xlu0 %v5336_v34, %s7713_s24 }
 0x4ee   : > { %5425 = vrot.lane.b32.xlu1 %v5423_v36, %s7719_s20 }
 0x4ef   : > { %v5583_v28 = vpop.permute.xlu1 %5582 }
 0x4f0   : > { %v5585_v29 = vmax.f32 %v5418_v14, %v5583_v28  ;;  %v5745_v5 = vpop.permute.xlu0 %5744  ;;  %v5661_v6 = vmax.f32 %v5580_v19, %v5583_v28 }
 0x4f1   : > { %5501 = vrot.lane.b32.xlu0 %v5499_v9, %s7713_s24  ;;  %v5747_v31 = vmax.f32 %v5580_v19, %v5745_v5  ;;  %v5823_v1 = vmax.f32 %v5742_v26, %v5745_v5 }
 0x4f2   : > { %5587 = vrot.lane.b32.xlu1 %v5585_v29, %s7719_s20 }
 0x4f3   : > { %v5907_v30 = vpop.permute.xlu1 %5906 }
 0x4f4   : > { %v5909_v8 = vmax.f32 %v5742_v26, %v5907_v30 }
 0x4f5   : > { %5663 = vrot.lane.b32.xlu0 %v5661_v6, %s7713_s24 }
 0x4f6   : > { %5749 = vrot.lane.b32.xlu1 %v5747_v31, %s7719_s20 }
 0x4f9   : > { %5825 = vrot.lane.b32.xlu0 %v5823_v1, %s7713_s24  ;;  %s6787_s24 = smov 8  }
 0x4fa   : > { %5911 = vrot.lane.b32.xlu1 %v5909_v8, %s7719_s20  ;;  %s6788_s20 = smov 16  }
 0x55f   : > { %v5339_v10 = vpop.permute.xlu0 %5338 }
 0x560   : > { %v5426_v22 = vpop.permute.xlu1 %5425  ;;  %6460 = vmatmul.mubr.msk.f32.vlgmr.msra.gmra.mrb[24].mxu1 %vm5340_vm4, %v5339_v10 }
 0x561   : > { %6467 = vmatmul.mubr.msk.f32.vlgmr.msra.gmra.mrb[26].mxu0 %vm5340_vm4, %v5426_v22  ;;  %6519 = vmatpush3.bf16.msra.mxu1 %v6512_v25 }
 0x562   : > { %6522 = vmatpush3.bf16.msra.mxu0 %v6512_v25  ;;  %6473 = vmatprep.mubr.msk.f32.mxu1 %vm6785_vm9, %v6775_v3 }
 0x563   : > { %v5502_v12 = vpop.permute.xlu0 %5501  ;;  %6480 = vmatprep.mubr.msk.f32.mxu0 %vm6785_vm9, %v6775_v3  ;;  %6523 = vmatprep.subr.bf16.mxu1 %v6786_v24 }
 0x564   : > { %v5588_v15 = vpop.permute.xlu1 %5587  ;;  %6474 = vmatmul.mubr.msk.f32.vlgmr.msra.gmra.mrb[26].mxu1 %vm5340_vm4, %v5502_v12  ;;  %6526 = vmatprep.subr.bf16.mxu0 %v6786_v24 }
 0x565   : > { %6481 = vmatmul.mubr.msk.f32.vlgmr.msra.gmra.mrb[28].mxu0 %vm5340_vm4, %v5588_v15  ;;  %6525 = vmatpush3.bf16.msra.mxu1 %v6512_v25 }
 0x566   : > { %6528 = vmatpush3.bf16.msra.mxu0 %v6512_v25  ;;  %6487 = vmatprep.mubr.msk.f32.mxu1 %vm6785_vm9, %v6775_v3 }
 0x567   : > { %v5664_v20 = vpop.permute.xlu0 %5663  ;;  %6494 = vmatprep.mubr.msk.f32.mxu0 %vm6785_vm9, %v6775_v3  ;;  %6529 = vmatprep.subr.bf16.mxu1 %v6786_v24 }
 0x568   : > { %v5750_v21 = vpop.permute.xlu1 %5749  ;;  %6488 = vmatmul.mubr.msk.f32.vlgmr.msra.gmra.mrb[28].mxu1 %vm5340_vm4, %v5664_v20  ;;  %6532 = vmatprep.subr.bf16.mxu0 %v6786_v24 }
 0x569   : > { %6495 = vmatmul.mubr.msk.f32.vlgmr.msra.gmra.mrb[30].mxu0 %vm5340_vm4, %v5750_v21  ;;  %6531 = vmatpush3.bf16.msra.mxu1 %v6512_v25 }
 0x56a   : > { %6534 = vmatpush3.bf16.msra.mxu0 %v6512_v25  ;;  %6501 = vmatprep.mubr.msk.f32.mxu1 %vm6785_vm9, %v6775_v3 }
 0x56b   : > { %v5826_v37 = vpop.permute.xlu0 %5825  ;;  %6508 = vmatprep.mubr.msk.f32.mxu0 %vm6785_vm9, %v6775_v3 }
 0x56c   : > { %v5912_v38 = vpop.permute.xlu1 %5911  ;;  %6502 = vmatmul.mubr.msk.f32.vlgmr.msra.gmra.mrb[30].mxu1 %vm5340_vm4, %v5826_v37 }
 0x56d   : > { %6509 = vmatmul.mubr.msk.f32.vlgmr.msra.gmra.mrb[32].mxu0 %vm5340_vm4, %v5912_v38 }
 0x633   : > { %v5409_v39 = vpop.f32.mrb[24].mxu1 }
 0x634   : > { %v6461_v40 = vpop.f32.mrb[25].mxu1  ;;  %v5495_v41 = vpop.f32.mrb[26].mxu0 }
 0x635   : > { %v6468_v42 = vpop.f32.mrb[27].mxu0  ;;  %5986 = vrot.lane.b32.xlu0 %v5495_v41, %s6787_s24  ;;  %s6682_s24 = sshll.u32 %s6789_s23, 4  ;;  %s6683_s24 = int_to_ptr.vmem [resolvable:$false] %s6682_s24 }
 0x636   : > { %s6684_s30 = scalar_lea.vmem %s6683_s24, 1280  ;;  %p6685_p0 = scmp.lt.s32.totalorder %s7597_s21, %s6683_s24 }
 0x637   : > { %v5571_v43 = vpop.f32.mrb[26].mxu1  ;;  %p6686_p1 = scmp.lt.s32.totalorder %s6684_s30, %s6678_s2 }
 0x638   : > { %v5657_v3 = vpop.f32.mrb[28].mxu0  ;;  %5990 = vrot.lane.b32.xlu1 %v5571_v43, %s6788_s20  ;;  %v6475_v44 = vpop.f32.mrb[27].mxu1 }
 0x639   : > { %p6687_p2 = por %p6686_p1, %p6685_p0 }
 0x63b   : > { %p6688_p3 = pnand %p6687_p2, %p6681_p13 }
 0x63d   : > { %6691 = shalt.err (!%p6688_p3)
}
 0x63e   : > { %s6692_s16 = scalar_lea.hbm %s7595_s0, 640  ;;  %s6696_s23 = scalar_lea.hbm %s7685_s12, 1280 }
 0x63f   : > { %p6693_p4 = scmp.ne.s32.totalorder %s7595_s0, %s6692_s16  ;;  %p6697_p9 = scmp.lt.u32.totalorder %s7595_s0, %s7685_s12 }
 0x640   : > { %p6698_p10 = scmp.lt.u32.totalorder %s6696_s23, %s6692_s16  ;;  %p6700_p12 = scmp.lt.u32.totalorder %s6692_s16, %s7595_s0 }
 0x641   : > { %p6694_p7 = pnand %p6693_p4, %p6903_p5 }
 0x642   : > { %p6699_p11 = por %p6698_p10, %p6697_p9 }
 0x643   : > { %p6695_p8 = pneg %p6694_p7 }
 0x644   : > { %p6701_p13 = por %p6700_p12, %p6699_p11 }
 0x646   : > { %p6702_p0 = pnand %p6701_p13, %p6695_p8 }
 0x648   : > { %6705 = shalt.err (!%p6702_p0)
}
 0x649   : > { %6602 = dma.vmem_to_hbm [thread:$0]  (%p6903_p5), %s7597_s21, 640, %s7595_s0, %s6028_s1   ;;  %v6482_v47 = vpop.f32.mrb[29].mxu0  ;;  %v5733_v48 = vpop.f32.mrb[28].mxu1  ;;  %vm6015_vm5 = vcmask 195584   ;;  %vm6018_vm7 = vcmask 326656   ;;  %vm6020_vm9 = vcmask 392192  }
 0x64a   : > { %s6790_s2 = smov 24   ;;  %v5819_v49 = vpop.f32.mrb[30].mxu0  ;;  %s7720_s30 = smov 32   ;;  %v6489_v50 = vpop.f32.mrb[29].mxu1  ;;  %vm6022_vm10 = vcmask 457728  }
 0x64b   : > { %5994 = vrot.lane.b32.xlu0 %v5657_v3, %s6790_s2  ;;  %5998 = vrot.lane.b32.xlu1 %v5733_v48, %s7720_s30  ;;  %s6791_s3 = smov 40   ;;  %v6496_v51 = vpop.f32.mrb[31].mxu0  ;;  %v5895_v52 = vpop.f32.mrb[30].mxu1  ;;  %s6792_s16 = smov 48  }
 0x64c   : > { %v5981_v53 = vpop.f32.mrb[32].mxu0  ;;  %v6503_v56 = vpop.f32.mrb[31].mxu1  ;;  %s6793_s15 = smov 56   ;;  %s6155_s1 = sshll.u32 %s7536_s22, 3 }
 0x64d   : > { %v6510_v57 = vpop.f32.mrb[33].mxu0  ;;  %s6290_s21 = sshll.u32 %s6886_s29, 7  ;;  %s444_s0 = scalar_lea.vmem [#allocation6], %s6155_s1 }
 0x64e   : > { %s6060_s20 = sshll.u32 %s444_s0, 4  ;;  %s7630_s2 = scalar_lea.hbm %s7686_s13, %s6290_s21  ;;  %s7632_s20 = int_to_ptr.vmem [resolvable:$true] %s6060_s20 }
 0x64f   : > { %6002 = vrot.lane.b32.xlu0 %v5819_v49, %s6791_s3  ;;  %6006 = vrot.lane.b32.xlu1 %v5895_v52, %s6792_s16  ;;  %s6033_s29 = scalar_lea.sflag [#allocation7], %s7536_s22  ;;  %s6706_s30 = scalar_lea.vmem %s7632_s20, 128 }
 0x650   : > { %p6707_p1 = scmp.ne.s32.totalorder %s7632_s20, %s6706_s30  ;;  %s6794_s3 = smov [#allocation6]  }
 0x651   : > { %s6710_s16 = sshll.u32 %s6794_s3, 4  ;;  %s6711_s16 = int_to_ptr.vmem [resolvable:$false] %s6710_s16 }
 0x652   : > { %p6708_p2 = pnand %p6707_p1, %p6903_p5  ;;  %p6713_p4 = scmp.lt.s32.totalorder %s7632_s20, %s6711_s16 }
 0x653   : > { %6010 = vrot.lane.b32.xlu0 %v5981_v53, %s6793_s15  ;;  %s6712_s15 = scalar_lea.vmem %s6711_s16, 256 }
 0x654   : > { %p6709_p3 = pneg %p6708_p2  ;;  %p6714_p7 = scmp.lt.s32.totalorder %s6712_s15, %s6706_s30 }
 0x656   : > { %p6715_p8 = por %p6714_p7, %p6713_p4 }
 0x658   : > { %p6716_p9 = pnand %p6715_p8, %p6709_p3 }
 0x6a7   : > { %v5987_v45 = vpop.permute.xlu0 %5986 }
 0x6a8   : > { %v6013_v55 = vsel %vm2905_vm8, %v5409_v39, %v5987_v45  ;;  %vm6024_vm8 = vcmask 523264  }
 0x6aa   : > { %v5991_v58 = vpop.permute.xlu1 %5990 }
 0x6ab   : > { %v6014_v59 = vsel %vm5340_vm4, %v6013_v55, %v5991_v58 }
 0x6bd   : > { %v5995_v60 = vpop.permute.xlu0 %5994  ;;  %v5999_v61 = vpop.permute.xlu1 %5998 }
 0x6be   : > { %v6016_v54 = vsel %vm6015_vm5, %v6014_v59, %v5995_v60 }
 0x6bf   : > { %v6017_v46 = vsel %vm573_vm6, %v6016_v54, %v5999_v61 }
 0x6c1   : > { %v6003_v62 = vpop.permute.xlu0 %6002  ;;  %v6007_v0 = vpop.permute.xlu1 %6006 }
 0x6c2   : > { %v6019_v63 = vsel %vm6018_vm7, %v6017_v46, %v6003_v62 }
 0x6c3   : > { %v6021_v2 = vsel %vm6020_vm9, %v6019_v63, %v6007_v0 }
 0x6c5   : > { %v6011_v4 = vpop.permute.xlu0 %6010 }
 0x6c6   : > { %v6023_v7 = vsel %vm6022_vm10, %v6021_v2, %v6011_v4 }
 0x6c7   : > { %v6025_v11 = vsel %vm6024_vm8, %v6023_v7, 0.0 }
 0x6c8   : > { %6026 = vst [vmem:[%s444_s0] sm:$0xff] %v6025_v11 }
 0x6c9   : > { %6719 = shalt.err (!%p6716_p9)
}
 0x6ca   : > { %s6720_s22 = scalar_lea.hbm %s7630_s2, 128  ;;  %s6724_s0 = scalar_lea.hbm %s7686_s13, 256 }
 0x6cb   : > { %p6721_p10 = scmp.ne.s32.totalorder %s7630_s2, %s6720_s22  ;;  %p6725_p13 = scmp.lt.u32.totalorder %s7630_s2, %s7686_s13 }
 0x6cc   : > { %p6726_p0 = scmp.lt.u32.totalorder %s6724_s0, %s6720_s22  ;;  %p6728_p2 = scmp.lt.u32.totalorder %s6720_s22, %s7630_s2 }
 0x6cd   : > { %p6722_p11 = pnand %p6721_p10, %p6903_p5 }
 0x6ce   : > { %p6727_p1 = por %p6726_p0, %p6725_p13 }
 0x6cf   : > { %p6723_p12 = pneg %p6722_p11 }
 0x6d0   : > { %p6729_p3 = por %p6728_p2, %p6727_p1 }
 0x6d2   : > { %p6730_p4 = pnand %p6729_p3, %p6723_p12 }
 0x6d4   : > { %6733 = shalt.err (!%p6730_p4)
}
 0x6d5   : > { %6603 = dma.vmem_to_hbm [thread:$0]  (%p6903_p5), %s7632_s20, 128, %s7630_s2, %s6033_s29  }
 0x6d6 PF: > { %p6613_p7 = scmp.ge.s32.totalorder %s6772_s28, 2  ;;  %s6072_s30 = sand.u32 1, %s6760_s25  }
 0x6d7   : > { %s6073_s3 = scalar_lea.sflag [#allocation5], %s6072_s30 }
 0x6d8   : > { %p6607_p8 = pnand %p6613_p7, %p6907_p6 }
 0x6da   : > { %6751 = dma.done.wait (!%p6607_p8), %s6073_s3, 640  }
 0x6db   : > { %6753 = vsyncadd (!%p6607_p8), %s6073_s3, 4294966656  ;;  %s6082_s16 = scalar_lea.sflag [#allocation7], %s6072_s30 }
 0x6dc   : > { %6755 = dma.done.wait (!%p6607_p8), %s6082_s16, 128  }
 0x6dd   : > { %6757 = vsyncadd (!%p6607_p8), %s6082_s16, 4294967168  ;;  %p27_p5 = scmp.ge.s32.totalorder %s6890_s14, 4   ;;  %s7721_s25 = smov %s6764_s26 }
 0x6de   : > { %s7722_s26 = smov %s6768_s27  ;;  %s7723_s27 = smov %s6901_s17 }
 0x6df   : > { %s7724_s28 = smov %s6890_s14  ;;  %29 = sbr.rel (!%p27_p5) target bundleno = 10 (0xa), region = 136 }
 0x6e6   :  { %6087 = vsyncpa [#allocation5], 1 }
 0x6e7   :  { %6089 = vsyncpa [#allocation5 + $0x1], 1 }
 0x6e8   :  { %6090 = vsyncpa [#allocation7], 1 }
 0x6e9   :  { %6092 = vsyncpa [#allocation7 + $0x1], 1 }

// kernel: tpu_custom_call.1
= control target key start
LH: loop header
LB: loop body
LE: loop exit
PB: predicated region body
PF: predicated region fallthrough
CT: control target
= control target key end

     0   :  { %s7673_s0 = inlined_call_operand.vmem [shape: f32[2,4,640], index: 0, kind: input, shape index: {}]   ;;  %s7674_s1 = inlined_call_operand.vmem [shape: f32[9,8,4], index: 1, kind: input, shape index: {}]   ;;  %s7675_s2 = inlined_call_operand.vmem [shape: f32[8,1], index: 2, kind: input, shape index: {}]   ;;  %s7676_s3 = inlined_call_operand.vmem [shape: f32[9,8,8], index: 3, kind: input, shape index: {}]   ;;  %s7677_s4 = inlined_call_operand.vmem [shape: f32[8,1], index: 4, kind: input, shape index: {}]   ;;  %s7678_s5 = inlined_call_operand.vmem [shape: f32[8,4], index: 5, kind: input, shape index: {}]   ;;  %s7679_s6 = inlined_call_operand.vmem [shape: f32[4,1], index: 6, kind: input, shape index: {}]   ;;  %s7680_s7 = inlined_call_operand.vmem [shape: f32[4,1], index: 7, kind: input, shape index: {}]   ;;  %s7681_s8 = inlined_call_operand.vmem [shape: f32[8,1], index: 8, kind: input, shape index: {}]   ;;  %s7682_s9 = inlined_call_operand.vmem [shape: f32[8,1], index: 9, kind: input, shape index: {}]   ;;  %s7683_s10 = inlined_call_operand.vmem [shape: f32[1,640], index: 10, kind: input, shape index: {}]   ;;  %s7684_s11 = inlined_call_operand.vmem [shape: f32[16,8], index: 11, kind: input, shape index: {}]   ;;  %s7685_s12 = inlined_call_operand.hbm [shape: f32[2,8,640], index: 12, kind: output, shape index: {0}]   ;;  %s7686_s13 = inlined_call_operand.hbm [shape: f32[2,8,128], index: 13, kind: output, shape index: {1}]  }
   0x1   :  { %7701 = sst [smem:[#allocation10_spill]] %s7673_s0 }
   0x2   :  { %7702 = sst [smem:[#allocation11_spill]] %s7674_s1 }
   0x3   :  { %7703 = sst [smem:[#allocation12_spill]] %s7675_s2 }
   0x4   :  { %7704 = sst [smem:[#allocation13_spill]] %s7676_s3 }
   0x5   :  { %19 = vsyncpa [#allocation5], 0 }
   0x6   :  { %21 = vsyncpa [#allocation5 + $0x1], 0 }
   0x7   :  { %22 = vsyncpa [#allocation7], 0 }
   0x8   :  { %24 = vsyncpa [#allocation7 + $0x1], 0  ;;  %s6865_s25 = smov 0   ;;  %s6867_s26 = smov 0  }
   0x9   :  { %s6869_s27 = smov 0   ;;  %s6871_s28 = smov 0  }
   0xa LB: > { %s6886_s29 = sadd.s32 4294967295, %s6772_s28   ;;  %s6151_s30 = sadd.s32 4294967294, %s6772_s28   ;;  %s6772_s28 = sphi %s6871_s28, %s7724_s28   ;;  %s6768_s27 = sphi %s6869_s27, %s7723_s27   ;;  %s6764_s26 = sphi %s6867_s26, %s7722_s26   ;;  %s6760_s25 = sphi %s6865_s25, %s7721_s25  }
   0xb   : > { %s6890_s14 = sadd.s32 1, %s6772_s28   ;;  %s294_s15 = sadd.s32 1, %s6768_s27 }
   0xc   : > { %s291_s16 = ssub.s32 %s6772_s28, %s6890_s14  ;;  %p304_p0 = scmp.ne.s32.totalorder %s6768_s27, %s6764_s26 }
   0xd   : > { %p292_p1 = scmp.eq.s32.totalorder %s291_s16, 0  ;;  %p305_p2 = scmp.eq.s32.totalorder %s6886_s29, 1 }
   0xe   : > { %p310_p3 = scmp.ne.s32.totalorder %s6764_s26, %s6760_s25  ;;  %p311_p4 = scmp.eq.s32.totalorder %s6151_s30, 1 }
   0xf   : > { %s6901_s17 = scalar_select %p292_p1, %s6768_s27, %s294_s15  }
  0x10   : > { %p6903_p5 = por %p305_p2, %p304_p0  ;;  %p6907_p6 = por %p311_p4, %p310_p3 }
  0x11   : > { %p6154_p7 = scmp.ge.s32.totalorder %s6772_s28, 1  ;;  %p396_p8 = scmp.lt.s32.totalorder %s6772_s28, 3 }
  0x13   : > { %p397_p9 = pnand %p6154_p7, %p396_p8 }
  0x14   : > { %v459_v0 = vld [vmem:[%s7679_s6] sm:$0xf] (!%p397_p9)  ;;  %v6774_v1 = vmov (!%p397_p9), 0   ;;  %v6775_v3 = vmov (!%p397_p9), 0.0   ;;  %p445_p10 = scmp.lt.s32.totalorder (!%p397_p9), %s6886_s29, 1  ;;  %v475_v4 = vlaneseq (!%p397_p9)  ;;  %s7707_s0 = sld [smem:[#allocation10_spill]] (!%p397_p9) }
  0x15   : > { %400 = sbr.rel (%p397_p9) target bundleno = 1750 (0x6d6), region = 68  ;;  %6665 = vset.pattern.permute.xlu0 (!%p397_p9), %v6774_v1  ;;  %6666 = vset.pattern.permute.xlu1 (!%p397_p9), %v6774_v1  ;;  %v460_v2 = vld [vmem:[%s7680_s7] sm:$0xf] (!%p397_p9)  ;;  %450 = vst [vmem:[#allocation2] sm:$0xf] (!%p397_p9), %v6775_v3  ;;  %s7695_s23 = smov (!%p397_p9), 32  }
  0x16   : > { %470 = vperm.xlu0 (!%p397_p9), %6665, %v459_v0   ;;  %451 = vst [vmem:[#allocation2 + $0x18] sm:$0xf] (!%p397_p9), %v6775_v3  ;;  %729 = vmatprep.mubr.f32.mxu1 (!%p397_p9), %v6775_v3  ;;  %v6776_v5 = vmov (!%p397_p9), 839922192   ;;  %v476_v7 = vshrl.u32 (!%p397_p9), %v475_v4, 7  ;;  %s7696_s30 = smov (!%p397_p9), 31  }
  0x17   : > { %658 = vmatprep.mubr.f32.mxu0 (!%p397_p9), %v6775_v3  ;;  %v473_v6 = vunpack.c.l.s4 (!%p397_p9), %v6776_v5  ;;  %v454_v9 = vld [vmem:[%s7683_s10] sm:$0x1f] (!%p397_p9)  ;;  %s7691_s15 = smov (!%p397_p9), 1   ;;  %s7689_s20 = smov (!%p397_p9), 97   ;;  %vm573_vm6 = vcmask (!%p397_p9), 261120   ;;  %vm583_vm7 = vcmask (!%p397_p9), 1043456  }
  0x18   : > { %vm455_vm0 = vcmp.gt.f32.partialorder (!%p397_p9), %v454_v9, 0.5  ;;  %v520_v11 = vsub.s32 (!%p397_p9), 4, %v476_v7  ;;  %v504_v13 = vsub.s32 (!%p397_p9), 0, %v476_v7  ;;  %v508_v14 = vsub.s32 (!%p397_p9), 1, %v476_v7  ;;  %s7698_s21 = smov (!%p397_p9), 96   ;;  %s7708_s2 = sld [smem:[#allocation12_spill]] (!%p397_p9) }
  0x19   : > { %v474_v8 = vunpack.c.0.s8 (!%p397_p9), %v473_v6  ;;  %v501_v15 = vsel (!%p397_p9), %vm455_vm0, 1, %v6774_v1  ;;  %v512_v17 = vsub.s32 (!%p397_p9), 2, %v476_v7  ;;  %v516_v18 = vsub.s32 (!%p397_p9), 3, %v476_v7  ;;  %s7709_s1 = sld [smem:[#allocation11_spill]] (!%p397_p9)  ;;  %s7714_s3 = sld [smem:[#allocation13_spill]] (!%p397_p9) }
  0x1a   : > { %485 = vperm.xlu0 (!%p397_p9), %6665, %v460_v2   ;;  %v6936_v22 = vrot.slane (!%p397_p9), %v501_v15, %v520_v11  ;;  %v6938_v28 = vrot.slane (!%p397_p9), %v501_v15, %v504_v13  ;;  %v6940_v29 = vrot.slane (!%p397_p9), %v501_v15, %v508_v14  ;;  %vm7700_vm8 = vcmask (!%p397_p9), 31744  }
  0x1b   : > { %v477_v10 = vsub.s32 (!%p397_p9), %v474_v8, %v476_v7  ;;  %v6942_v30 = vrot.slane (!%p397_p9), %v501_v15, %v512_v17  ;;  %v6944_v31 = vrot.slane (!%p397_p9), %v501_v15, %v516_v18  ;;  %vm6785_vm9 = vmmov (!%p397_p9), 0  }
  0x1c   : > { %s446_s24 = scalar_select %p445_p10, %s6886_s29, 1  ;;  %vm526_vm1 = vcmp.eq.s32.totalorder %v6936_v22, 1  ;;  %vm522_vm2 = vcmp.eq.s32.totalorder %v6938_v28, 1  ;;  %vm523_vm3 = vcmp.eq.s32.totalorder %v6940_v29, 1  ;;  %vm818_vm10 = vcmask 269312  }
  0x1d   : > { %vm524_vm4 = vcmp.eq.s32.totalorder %v6942_v30, 1  ;;  %vm525_vm5 = vcmp.eq.s32.totalorder %v6944_v31, 1  ;;  %vm1072_vm11 = vcmask 252928   ;;  %vm1331_vm12 = vcmask 7168  }
  0x1e   : > { %s6600_s16 = smul.u32 20, %s446_s24  ;;  %s6778_s24 = smov 33   ;;  %v456_v57 = vld [vmem:[%s7708_s2] sm:$0xff]  ;;  %vm1830_vm13 = vcmask 1039360   ;;  %vm2089_vm14 = vcmask 793600   ;;  %vm2348_vm15 = vcmask 785408  }
  0x1f   : > { %v6157_v5 = vld [vmem:[%s7709_s1 + $0x8] sm:$0xff]  ;;  %vm2607_vm0 = vcmask 777216  }
  0x20   : > { %s6931_s22 = scalar_lea.vmem %s7707_s0, %s6600_s16  ;;  %s7687_s16 = smov 127  }
  0x21   : > { %v465_v19 = vld [vmem:[%s6931_s22] sm:$0xff]  ;;  %v466_v20 = vld [vmem:[%s6931_s22 + $0x8] sm:$0xff]  ;;  %v467_v21 = vld [vmem:[%s6931_s22 + $0x10] sm:$0xf] }
  0x95   : > { %v471_v12 = vpop.permute.xlu0 %470 }
  0x96   : > { %v478_v16 = vrot.slane %v471_v12, %v477_v10 }
  0x98   : > { %v480_v24 = vmul.f32 %v478_v16, %v465_v19  ;;  %v481_v25 = vmul.f32 %v478_v16, %v466_v20  ;;  %v482_v26 = vmul.f32 %v478_v16, %v467_v21 }
  0x99   : > { %v486_v23 = vpop.permute.xlu0 %485 }
  0x9a   : > { %v493_v27 = vrot.slane %v486_v23, %v477_v10  ;;  %v549_v23 = vld [vmem:[%s7709_s1] sm:$0xff] }
  0x9c   : > { %v495_v32 = vadd.f32 %v493_v27, %v480_v24  ;;  %v496_v33 = vadd.f32 %v493_v27, %v481_v25  ;;  %v497_v34 = vadd.f32 %v493_v27, %v482_v26 }
  0x9e   : > { %v498_v35 = vmax.f32 %v495_v32, 0.0  ;;  %v499_v36 = vmax.f32 %v496_v33, 0.0  ;;  %v500_v37 = vmax.f32 %v497_v34, 0.0 }
  0xa0   : > { %v529_v38 = vcombine.high %v498_v35, %v498_v35  ;;  %v530_v39 = vcombine.high %v499_v36, %v499_v36  ;;  %v537_v40 = vsel %vm526_vm1, %v500_v37, 0.0  ;;  %v533_v41 = vsel %vm522_vm2, %v498_v35, 0.0 }
  0xa1   : > { %v535_v43 = vsel %vm524_vm4, %v499_v36, 0.0  ;;  %548 = vst [vmem:[#allocation2 + $0x14] sm:$0xf] %v537_v40 }
  0xa2   : > { %v534_v42 = vsel %vm523_vm3, %v529_v38, 0.0  ;;  %v536_v44 = vsel %vm525_vm5, %v530_v39, 0.0 }
  0xa3   : > { %v6961_v45 = vcombine.low %v533_v41, %v534_v42  ;;  %v6963_v46 = vcombine.low %v535_v43, %v536_v44  ;;  %v6999_v54 = vcombine.low %v536_v44, %v536_v44  ;;  %v7004_v55 = vcombine.low %v534_v42, %v534_v42  ;;  %v6174_v41 = vld [vmem:[%s7709_s1 + $0x10] sm:$0xff] }
  0xa5   : > { %546 = vst [vmem:[#allocation2 + $0x4] sm:$0xff] %v6961_v45  ;;  %547 = vst [vmem:[#allocation2 + $0xc] sm:$0xff] %v6963_v46 }
  0xa8   : > { %v1811_v53 = vld [vmem:[#allocation2 + $0x14] sm:$0xff] }
  0xa9   : > { %v1817_v56 = vcombine.high %v1811_v53, %v1811_v53 }
  0xac   : > { %v552_v47 = vld [vmem:[#allocation2 + $0x10] sm:$0xff]  ;;  %v550_v48 = vld [vmem:[#allocation2] sm:$0xff]  ;;  %v551_v49 = vld [vmem:[#allocation2 + $0x8] sm:$0xff] }
  0xad   : > { %569 = vrot.lane.b32.xlu1 %v552_v47, %s7695_s23  ;;  %561 = vrot.lane.b32.xlu0 %v550_v48, %s7695_s23  ;;  %v1057_v50 = vcombine.high %v550_v48, %v550_v48  ;;  %v1058_v51 = vcombine.high %v551_v49, %v551_v49  ;;  %v1059_v52 = vcombine.high %v552_v47, %v552_v47 }
  0xb1   : > { %565 = vrot.lane.b32.xlu1 %v551_v49, %s7695_s23  ;;  %806 = vrot.lane.b32.xlu0 %v550_v48, %s6778_s24 }
  0xb5   : > { %814 = vrot.lane.b32.xlu1 %v552_v47, %s6778_s24  ;;  %1060 = vrot.lane.b32.xlu0 %v550_v48, %s7696_s30 }
  0xb9   : > { %810 = vrot.lane.b32.xlu1 %v551_v49, %s6778_s24  ;;  %563 = vrot.lane.b32.xlu0 %v1057_v50, %s7695_s23 }
  0xbd   : > { %1068 = vrot.lane.b32.xlu1 %v552_v47, %s7696_s30  ;;  %1319 = vrot.lane.b32.xlu0 %v550_v48, %s7691_s15 }
  0xc1   : > { %1064 = vrot.lane.b32.xlu1 %v551_v49, %s7696_s30  ;;  %812 = vrot.lane.b32.xlu0 %v1058_v51, %s6778_s24 }
  0xc5   : > { %567 = vrot.lane.b32.xlu1 %v1058_v51, %s7695_s23  ;;  %808 = vrot.lane.b32.xlu0 %v1057_v50, %s6778_s24 }
  0xc9   : > { %1327 = vrot.lane.b32.xlu1 %v552_v47, %s7691_s15  ;;  %1066 = vrot.lane.b32.xlu0 %v1058_v51, %s7696_s30 }
  0xcd   : > { %571 = vrot.lane.b32.xlu1 %v1059_v52, %s7695_s23  ;;  %1062 = vrot.lane.b32.xlu0 %v1057_v50, %s7696_s30 }
  0xd1   : > { %1323 = vrot.lane.b32.xlu1 %v551_v49, %s7691_s15  ;;  %1818 = vrot.lane.b32.xlu0 %v6961_v45, %s7687_s16 }
  0xd5   : > { %816 = vrot.lane.b32.xlu1 %v1059_v52, %s6778_s24  ;;  %1325 = vrot.lane.b32.xlu0 %v1058_v51, %s7691_s15 }
  0xd9   : > { %1826 = vrot.lane.b32.xlu1 %v1811_v53, %s7687_s16  ;;  %1321 = vrot.lane.b32.xlu0 %v1057_v50, %s7691_s15 }
  0xdd   : > { %1070 = vrot.lane.b32.xlu1 %v1059_v52, %s7696_s30  ;;  %2077 = vrot.lane.b32.xlu0 %v6961_v45, %s7689_s20 }
  0xe1   : > { %1822 = vrot.lane.b32.xlu1 %v6963_v46, %s7687_s16  ;;  %2336 = vrot.lane.b32.xlu0 %v6961_v45, %s7698_s21 }
  0xe5   : > { %1329 = vrot.lane.b32.xlu1 %v1059_v52, %s7691_s15  ;;  %1824 = vrot.lane.b32.xlu0 %v6999_v54, %s7687_s16  ;;  %v6183_v52 = vld [vmem:[%s7709_s1 + $0x18] sm:$0xff]  ;;  %s7710_s15 = smov 1  }
  0xe9   : > { %1828 = vrot.lane.b32.xlu1 %v1817_v56, %s7687_s16  ;;  %1820 = vrot.lane.b32.xlu0 %v7004_v55, %s7687_s16  ;;  %s7693_s16 = smov 95  }
  0xed   : > { %2085 = vrot.lane.b32.xlu1 %v1811_v53, %s7689_s20  ;;  %2083 = vrot.lane.b32.xlu0 %v6999_v54, %s7689_s20 }
  0xf1   : > { %2081 = vrot.lane.b32.xlu1 %v6963_v46, %s7689_s20  ;;  %2079 = vrot.lane.b32.xlu0 %v7004_v55, %s7689_s20 }
  0xf5   : > { %2087 = vrot.lane.b32.xlu1 %v1817_v56, %s7689_s20  ;;  %2342 = vrot.lane.b32.xlu0 %v6999_v54, %s7698_s21  ;;  %s7711_s20 = smov 127  }
  0xf9   : > { %2344 = vrot.lane.b32.xlu1 %v1811_v53, %s7698_s21  ;;  %2338 = vrot.lane.b32.xlu0 %v7004_v55, %s7698_s21 }
  0xfd   : > { %2340 = vrot.lane.b32.xlu1 %v6963_v46, %s7698_s21  ;;  %2601 = vrot.lane.b32.xlu0 %v6999_v54, %s7693_s16 }
 0x101   : > { %2346 = vrot.lane.b32.xlu1 %v1817_v56, %s7698_s21  ;;  %2597 = vrot.lane.b32.xlu0 %v7004_v55, %s7693_s16 }
 0x105   : > { %2603 = vrot.lane.b32.xlu1 %v1811_v53, %s7693_s16  ;;  %2595 = vrot.lane.b32.xlu0 %v6961_v45, %s7693_s16 }
 0x109   : > { %2599 = vrot.lane.b32.xlu1 %v6963_v46, %s7693_s16  ;;  %2845 = vperm.xlu0 %6665, %v456_v57  }
 0x10d   : > { %2605 = vrot.lane.b32.xlu1 %v1817_v56, %s7693_s16  ;;  %s7712_s16 = smov 97  }
 0x111   : > { %2883 = vrot.lane.b32.xlu1 %v6775_v3, %s7695_s23 }
 0x115   : > { %3121 = vrot.lane.b32.xlu1 %v6775_v3, %s6778_s24 }
 0x119   : > { %3360 = vrot.lane.b32.xlu1 %v6775_v3, %s7696_s30 }
 0x11f   : > { %v570_v58 = vpop.permute.xlu1 %569  ;;  %v562_v59 = vpop.permute.xlu0 %561 }
 0x123   : > { %v566_v60 = vpop.permute.xlu1 %565  ;;  %v807_v61 = vpop.permute.xlu0 %806 }
 0x127   : > { %v815_v62 = vpop.permute.xlu1 %814  ;;  %v1061_v63 = vpop.permute.xlu0 %1060 }
 0x12b   : > { %v811_v0 = vpop.permute.xlu1 %810  ;;  %v564_v1 = vpop.permute.xlu0 %563 }
 0x12c   : > { %v575_v2 = vsel %vm573_vm6, %v564_v1, %v566_v60  ;;  %v574_v4 = vsel %vm573_vm6, %v562_v59, %v564_v1  ;;  %v6192_v59 = vld [vmem:[%s7709_s1 + $0x20] sm:$0xff] }
 0x12d   : > { %6158 = vmatprep.subr.msk.mxu0 %vm583_vm7, %v575_v2  ;;  %v6201_v2 = vld [vmem:[%s7709_s1 + $0x28] sm:$0xff] }
 0x12e   : > { %6159 = vmatpush1.msk.msra.mxu0 %vm583_vm7, %v574_v4 }
 0x12f   : > { %v7051_v6 = vpop.permute.xlu1 %1068  ;;  %v7053_v7 = vpop.permute.xlu0 %1319  ;;  %6160 = vmatmul.mubr.msk.f32.vlgmr.msra.gmra.mrb[0].mxu0 %vm7700_vm8, %v6157_v5  ;;  %6360 = vmatprep.subr.mxu0 %v6775_v3 }
 0x130   : > { %6362 = vmatprep.mubr.msk.f32.mxu0 %vm6785_vm9, %v6775_v3 }
 0x133   : > { %v1065_v8 = vpop.permute.xlu1 %1064  ;;  %v813_v9 = vpop.permute.xlu0 %812 }
 0x134   : > { %v822_v14 = vsel %vm818_vm10, %v813_v9, %v815_v62  ;;  %v821_v15 = vsel %vm818_vm10, %v811_v0, %v813_v9 }
 0x137   : > { %v568_v10 = vpop.permute.xlu1 %567  ;;  %v809_v11 = vpop.permute.xlu0 %808 }
 0x138   : > { %v577_v12 = vsel %vm573_vm6, %v568_v10, %v570_v58  ;;  %v576_v13 = vsel %vm573_vm6, %v566_v60, %v568_v10  ;;  %v820_v21 = vsel %vm818_vm10, %v809_v11, %v811_v0  ;;  %v819_v24 = vsel %vm818_vm10, %v807_v61, %v809_v11 }
 0x139   : > { %6161 = vmatprep.subr.msk.mxu1 %vm583_vm7, %v577_v12 }
 0x13a   : > { %6162 = vmatpush1.msk.msra.mxu1 %vm583_vm7, %v576_v13  ;;  %v6210_v13 = vld [vmem:[%s7709_s1 + $0x30] sm:$0xff] }
 0x13b   : > { %v7065_v16 = vpop.permute.xlu1 %1327  ;;  %6169 = vmatprep.subr.msk.mxu1 %vm583_vm7, %v822_v14  ;;  %v1067_v17 = vpop.permute.xlu0 %1066  ;;  %6163 = vmatmul.mubr.msk.f32.vlgmr.msra.gmra.mrb[0].mxu1 %vm7700_vm8, %v6157_v5 }
 0x13c   : > { %6170 = vmatpush1.msk.msra.mxu1 %vm583_vm7, %v821_v15  ;;  %972 = vmatprep.mubr.f32.mxu1 %v6775_v3  ;;  %v1076_v36 = vsel %vm1072_vm11, %v1067_v17, %v7051_v6  ;;  %v1075_v37 = vsel %vm1072_vm11, %v1065_v8, %v1067_v17 }
 0x13d   : > { %6365 = vmatprep.subr.mxu1 %v6775_v3 }
 0x13f   : > { %v572_v18 = vpop.permute.xlu1 %571  ;;  %v1063_v19 = vpop.permute.xlu0 %1062 }
 0x140   : > { %v578_v20 = vsel %vm573_vm6, %v570_v58, %v572_v18  ;;  %v1074_v27 = vsel %vm1072_vm11, %v1063_v19, %v1065_v8  ;;  %v1073_v32 = vsel %vm1072_vm11, %v1061_v63, %v1063_v19 }
 0x141   : > { %6361 = vmatpush3.msk.msra.mxu0 %vm583_vm7, %v578_v20 }
 0x142   : > { %6363 = vmatmul.mubr.msk.f32.vlgmr.msra.gmra.mrb[2].mxu0 %vm7700_vm8, %v6157_v5  ;;  %6166 = vmatprep.subr.msk.mxu0 %vm583_vm7, %v820_v21 }
 0x143   : > { %v1324_v25 = vpop.permute.xlu1 %1323  ;;  %6167 = vmatpush1.msk.msra.mxu0 %vm583_vm7, %v819_v24  ;;  %v7082_v26 = vpop.permute.xlu0 %1818  ;;  %901 = vmatprep.mubr.f32.mxu0 %v6775_v3 }
 0x144   : > { %6175 = vmatprep.subr.msk.mxu0 %vm583_vm7, %v1074_v27  ;;  %6171 = vmatmul.mubr.msk.f32.vlgmr.msra.gmra.mrb[0].mxu1 %vm7700_vm8, %v549_v23 }
 0x145   : > { %6367 = vmatprep.mubr.msk.f32.mxu1 %vm6785_vm9, %v6775_v3 }
 0x146   : > { %6168 = vmatmul.mubr.msk.f32.vlgmr.msra.gmra.mrb[0].mxu0 %vm7700_vm8, %v549_v23 }
 0x147   : > { %6176 = vmatpush1.msk.msra.mxu0 %vm583_vm7, %v1073_v32  ;;  %v817_v33 = vpop.permute.xlu1 %816  ;;  %v1326_v34 = vpop.permute.xlu0 %1325  ;;  %1155 = vmatprep.mubr.f32.mxu0 %v6775_v3 }
 0x148   : > { %v823_v35 = vsel %vm818_vm10, %v815_v62, %v817_v33  ;;  %6370 = vmatprep.subr.mxu0 %v6775_v3  ;;  %v1335_v40 = vsel %vm1331_vm12, %v1326_v34, %v7065_v16  ;;  %v1334_v42 = vsel %vm1331_vm12, %v1324_v25, %v1326_v34  ;;  %v6228_v34 = vld [vmem:[%s7709_s1 + $0x40] sm:$0xff] }
 0x149   : > { %6366 = vmatpush3.msk.msra.mxu1 %vm583_vm7, %v823_v35 }
 0x14a   : > { %6368 = vmatmul.mubr.msk.f32.vlgmr.msra.gmra.mrb[2].mxu1 %vm7700_vm8, %v549_v23  ;;  %6178 = vmatprep.subr.msk.mxu1 %vm583_vm7, %v1076_v36  ;;  %v6219_v23 = vld [vmem:[%s7709_s1 + $0x38] sm:$0xff] }
 0x14b   : > { %v7102_v38 = vpop.permute.xlu1 %1826  ;;  %6179 = vmatpush1.msk.msra.mxu1 %vm583_vm7, %v1075_v37  ;;  %v1322_v39 = vpop.permute.xlu0 %1321  ;;  %1226 = vmatprep.mubr.f32.mxu1 %v6775_v3 }
 0x14c   : > { %6187 = vmatprep.subr.msk.mxu1 %vm583_vm7, %v1335_v40  ;;  %v1333_v48 = vsel %vm1331_vm12, %v1322_v39, %v1324_v25  ;;  %v1332_v49 = vsel %vm1331_vm12, %v7053_v7, %v1322_v39 }
 0x14e   : > { %6177 = vmatmul.mubr.msk.f32.vlgmr.msra.gmra.mrb[0].mxu0 %vm7700_vm8, %v6174_v41  ;;  %6180 = vmatmul.mubr.msk.f32.vlgmr.msra.gmra.mrb[0].mxu1 %vm7700_vm8, %v6174_v41 }
 0x14f   : > { %6188 = vmatpush1.msk.msra.mxu1 %vm583_vm7, %v1334_v42  ;;  %v1071_v43 = vpop.permute.xlu1 %1070  ;;  %v2078_v44 = vpop.permute.xlu0 %2077  ;;  %6372 = vmatprep.mubr.msk.f32.mxu0 %vm6785_vm9, %v6775_v3 }
 0x150   : > { %v1077_v47 = vsel %vm1072_vm11, %v7051_v6, %v1071_v43  ;;  %1485 = vmatprep.mubr.f32.mxu1 %v6775_v3  ;;  %6375 = vmatprep.subr.mxu1 %v6775_v3 }
 0x151   : > { %6371 = vmatpush3.msk.msra.mxu0 %vm583_vm7, %v1077_v47 }
 0x152   : > { %6373 = vmatmul.mubr.msk.f32.vlgmr.msra.gmra.mrb[4].mxu0 %vm7700_vm8, %v6174_v41  ;;  %6184 = vmatprep.subr.msk.mxu0 %vm583_vm7, %v1333_v48 }
 0x153   : > { %v1823_v50 = vpop.permute.xlu1 %1822  ;;  %6185 = vmatpush1.msk.msra.mxu0 %vm583_vm7, %v1332_v49  ;;  %v7129_v51 = vpop.permute.xlu0 %2336  ;;  %1414 = vmatprep.mubr.f32.mxu0 %v6775_v3 }
 0x154   : > { %6193 = vmatprep.subr.msk.mxu0 %vm583_vm7, %v7004_v55 }
 0x156   : > { %6186 = vmatmul.mubr.msk.f32.vlgmr.msra.gmra.mrb[0].mxu0 %vm7700_vm8, %v6183_v52  ;;  %6189 = vmatmul.mubr.msk.f32.vlgmr.msra.gmra.mrb[0].mxu1 %vm7700_vm8, %v6183_v52 }
 0x157   : > { %6194 = vmatpush1.msk.msra.mxu0 %vm583_vm7, %v6961_v45  ;;  %v1330_v53 = vpop.permute.xlu1 %1329  ;;  %v1825_v56 = vpop.permute.xlu0 %1824  ;;  %6377 = vmatprep.mubr.msk.f32.mxu1 %vm6785_vm9, %v6775_v3 }
 0x158   : > { %v1336_v57 = vsel %vm1331_vm12, %v7065_v16, %v1330_v53  ;;  %1654 = vmatprep.mubr.f32.mxu0 %v6775_v3  ;;  %6380 = vmatprep.subr.mxu0 %v6775_v3  ;;  %v1834_v45 = vsel %vm1830_vm13, %v1825_v56, %v7102_v38  ;;  %v1833_v60 = vsel %vm1830_vm13, %v1823_v50, %v1825_v56 }
 0x159   : > { %6376 = vmatpush3.msk.msra.mxu1 %vm583_vm7, %v1336_v57 }
 0x15a   : > { %6378 = vmatmul.mubr.msk.f32.vlgmr.msra.gmra.mrb[4].mxu1 %vm7700_vm8, %v6183_v52  ;;  %6196 = vmatprep.subr.msk.mxu1 %vm583_vm7, %v6999_v54  ;;  %v1571_v54 = vld [vmem:[#allocation2 + $0x14] sm:$0xf] }
 0x15b   : > { %v1829_v55 = vpop.permute.xlu1 %1828  ;;  %6197 = vmatpush1.msk.msra.mxu1 %vm583_vm7, %v6963_v46  ;;  %v1821_v58 = vpop.permute.xlu0 %1820  ;;  %1725 = vmatprep.mubr.f32.mxu1 %v6775_v3 }
 0x15c   : > { %6205 = vmatprep.subr.msk.mxu1 %vm583_vm7, %v1834_v45  ;;  %v1832_v61 = vsel %vm1830_vm13, %v1821_v58, %v1823_v50  ;;  %v1831_v63 = vsel %vm1830_vm13, %v7082_v26, %v1821_v58  ;;  %v1835_v6 = vsel %vm1830_vm13, %v7102_v38, %v1829_v55 }
 0x15e   : > { %6195 = vmatmul.mubr.msk.f32.vlgmr.msra.gmra.mrb[0].mxu0 %vm7700_vm8, %v6192_v59  ;;  %6198 = vmatmul.mubr.msk.f32.vlgmr.msra.gmra.mrb[0].mxu1 %vm7700_vm8, %v6192_v59 }
 0x15f   : > { %6381 = vmatpush3.msk.msra.mxu0 %vm583_vm7, %v1571_v54  ;;  %6206 = vmatpush1.msk.msra.mxu1 %vm583_vm7, %v1833_v60  ;;  %v2086_v46 = vpop.permute.xlu1 %2085  ;;  %v2084_v62 = vpop.permute.xlu0 %2083 }
 0x160   : > { %6202 = vmatprep.subr.msk.mxu0 %vm583_vm7, %v1832_v61  ;;  %6382 = vmatprep.mubr.msk.f32.mxu0 %vm6785_vm9, %v6775_v3  ;;  %v2093_v7 = vsel %vm2089_vm14, %v2084_v62, %v2086_v46 }
 0x161   : > { %1984 = vmatprep.mubr.f32.mxu1 %v6775_v3  ;;  %6385 = vmatprep.subr.mxu1 %v6775_v3 }
 0x162   : > { %6383 = vmatmul.mubr.msk.f32.vlgmr.msra.gmra.mrb[6].mxu0 %vm7700_vm8, %v6192_v59 }
 0x163   : > { %6203 = vmatpush1.msk.msra.mxu0 %vm583_vm7, %v1831_v63  ;;  %v2082_v0 = vpop.permute.xlu1 %2081  ;;  %v2080_v1 = vpop.permute.xlu0 %2079  ;;  %1913 = vmatprep.mubr.f32.mxu0 %v6775_v3 }
 0x164   : > { %v2090_v4 = vsel %vm2089_vm14, %v2078_v44, %v2080_v1  ;;  %v2091_v5 = vsel %vm2089_vm14, %v2080_v1, %v2082_v0  ;;  %v2092_v10 = vsel %vm2089_vm14, %v2082_v0, %v2084_v62 }
 0x165   : > { %6211 = vmatprep.subr.msk.mxu0 %vm583_vm7, %v2091_v5 }
 0x166   : > { %6204 = vmatmul.mubr.msk.f32.vlgmr.msra.gmra.mrb[0].mxu0 %vm7700_vm8, %v6201_v2  ;;  %6207 = vmatmul.mubr.msk.f32.vlgmr.msra.gmra.mrb[0].mxu1 %vm7700_vm8, %v6201_v2 }
 0x167   : > { %6386 = vmatpush3.msk.msra.mxu1 %vm583_vm7, %v1835_v6  ;;  %6212 = vmatpush1.msk.msra.mxu0 %vm583_vm7, %v2090_v4  ;;  %v2088_v8 = vpop.permute.xlu1 %2087  ;;  %v2343_v9 = vpop.permute.xlu0 %2342 }
 0x168   : > { %6214 = vmatprep.subr.msk.mxu1 %vm583_vm7, %v2093_v7  ;;  %6387 = vmatprep.mubr.msk.f32.mxu1 %vm6785_vm9, %v6775_v3  ;;  %v2094_v15 = vsel %vm2089_vm14, %v2086_v46, %v2088_v8 }
 0x169   : > { %2172 = vmatprep.mubr.f32.mxu0 %v6775_v3  ;;  %6390 = vmatprep.subr.mxu0 %v6775_v3 }
 0x16a   : > { %6388 = vmatmul.mubr.msk.f32.vlgmr.msra.gmra.mrb[6].mxu1 %vm7700_vm8, %v6201_v2 }
 0x16b   : > { %6215 = vmatpush1.msk.msra.mxu1 %vm583_vm7, %v2092_v10  ;;  %v2345_v11 = vpop.permute.xlu1 %2344  ;;  %v2339_v12 = vpop.permute.xlu0 %2338  ;;  %2243 = vmatprep.mubr.f32.mxu1 %v6775_v3 }
 0x16c   : > { %v2352_v14 = vsel %vm2348_vm15, %v2343_v9, %v2345_v11  ;;  %v2349_v20 = vsel %vm2348_vm15, %v7129_v51, %v2339_v12 }
 0x16d   : > { %6223 = vmatprep.subr.msk.mxu1 %vm583_vm7, %v2352_v14 }
 0x16e   : > { %6213 = vmatmul.mubr.msk.f32.vlgmr.msra.gmra.mrb[0].mxu0 %vm7700_vm8, %v6210_v13  ;;  %6216 = vmatmul.mubr.msk.f32.vlgmr.msra.gmra.mrb[0].mxu1 %vm7700_vm8, %v6210_v13 }
 0x16f   : > { %6391 = vmatpush3.msk.msra.mxu0 %vm583_vm7, %v2094_v15  ;;  %v2341_v16 = vpop.permute.xlu1 %2340  ;;  %v2602_v17 = vpop.permute.xlu0 %2601  ;;  %6392 = vmatprep.mubr.msk.f32.mxu0 %vm6785_vm9, %v6775_v3 }
 0x170   : > { %v2350_v18 = vsel %vm2348_vm15, %v2339_v12, %v2341_v16  ;;  %v2351_v19 = vsel %vm2348_vm15, %v2341_v16, %v2343_v9  ;;  %2502 = vmatprep.mubr.f32.mxu1 %v6775_v3 }
 0x171   : > { %6220 = vmatprep.subr.msk.mxu0 %vm583_vm7, %v2350_v18  ;;  %6224 = vmatpush1.msk.msra.mxu1 %vm583_vm7, %v2351_v19 }
 0x172   : > { %6393 = vmatmul.mubr.msk.f32.vlgmr.msra.gmra.mrb[8].mxu0 %vm7700_vm8, %v6210_v13  ;;  %6395 = vmatprep.subr.mxu1 %v6775_v3 }
 0x173   : > { %6221 = vmatpush1.msk.msra.mxu0 %vm583_vm7, %v2349_v20  ;;  %v2347_v21 = vpop.permute.xlu1 %2346  ;;  %2431 = vmatprep.mubr.f32.mxu0 %v6775_v3  ;;  %v2598_v25 = vpop.permute.xlu0 %2597 }
 0x174   : > { %v2353_v24 = vsel %vm2348_vm15, %v2345_v11, %v2347_v21 }
 0x176   : > { %6225 = vmatmul.mubr.msk.f32.vlgmr.msra.gmra.mrb[0].mxu1 %vm7700_vm8, %v6219_v23  ;;  %6222 = vmatmul.mubr.msk.f32.vlgmr.msra.gmra.mrb[0].mxu0 %vm7700_vm8, %v6219_v23 }
 0x177   : > { %6396 = vmatpush3.msk.msra.mxu1 %vm583_vm7, %v2353_v24  ;;  %v2604_v26 = vpop.permute.xlu1 %2603  ;;  %6397 = vmatprep.mubr.msk.f32.mxu1 %vm6785_vm9, %v6775_v3  ;;  %v2596_v32 = vpop.permute.xlu0 %2595  ;;  %v462_v24 = vld [vmem:[%s7682_s9] sm:$0xff] }
 0x178   : > { %v2611_v27 = vsel %vm2607_vm0, %v2602_v17, %v2604_v26  ;;  %2690 = vmatprep.mubr.f32.mxu0 %v6775_v3  ;;  %v2608_v37 = vsel %vm2607_vm0, %v2596_v32, %v2598_v25 }
 0x179   : > { %6232 = vmatprep.subr.msk.mxu1 %vm583_vm7, %v2611_v27  ;;  %v457_v27 = vld [vmem:[%s7677_s4] sm:$0xff] }
 0x17a   : > { %6398 = vmatmul.mubr.msk.f32.vlgmr.msra.gmra.mrb[8].mxu1 %vm7700_vm8, %v6219_v23 }
 0x17b   : > { %v2600_v33 = vpop.permute.xlu1 %2599  ;;  %2761 = vmatprep.mubr.f32.mxu1 %v6775_v3 }
 0x17c   : > { %v2609_v35 = vsel %vm2607_vm0, %v2598_v25, %v2600_v33  ;;  %v2610_v36 = vsel %vm2607_vm0, %v2600_v33, %v2602_v17 }
 0x17d   : > { %6229 = vmatprep.subr.msk.mxu0 %vm583_vm7, %v2609_v35  ;;  %6233 = vmatpush1.msk.msra.mxu1 %vm583_vm7, %v2610_v36 }
 0x17e   : > { %6230 = vmatpush1.msk.msra.mxu0 %vm583_vm7, %v2608_v37  ;;  %6234 = vmatmul.mubr.msk.f32.vlgmr.msra.gmra.mrb[0].mxu1 %vm7700_vm8, %v6228_v34 }
 0x17f   : > { %v2606_v38 = vpop.permute.xlu1 %2605  ;;  %6231 = vmatmul.mubr.msk.f32.vlgmr.msra.gmra.mrb[0].mxu0 %vm7700_vm8, %v6228_v34  ;;  %6400 = vmatprep.subr.mxu0 %v6775_v3 }
 0x180   : > { %v2612_v39 = vsel %vm2607_vm0, %v2604_v26, %v2606_v38  ;;  %6402 = vmatprep.mubr.msk.f32.mxu0 %vm6785_vm9, %v6775_v3  ;;  %2973 = vmatprep.mubr.f32.mxu1 %v6775_v3  ;;  %v461_v26 = vld [vmem:[%s7681_s8] sm:$0xff] }
 0x181   : > { %6401 = vmatpush3.msk.msra.mxu0 %vm583_vm7, %v2612_v39  ;;  %v6237_v39 = vld [vmem:[%s7714_s3 + $0x8] sm:$0xff] }
 0x183   : > { %6403 = vmatmul.mubr.msk.f32.vlgmr.msra.gmra.mrb[10].mxu0 %vm7700_vm8, %v6228_v34  ;;  %v2884_v25 = vpop.permute.xlu1 %2883  ;;  %vm2905_vm8 = vcmask 64512  }
 0x184   : > { %3044 = vmatprep.mubr.f32.mxu0 %v6775_v3 }
 0x187   : > { %v3122_v32 = vpop.permute.xlu1 %3121 }
 0x188   : > { %v2846_v63 = vpop.permute.xlu0 %2845 }
 0x18b   : > { %v3361_v33 = vpop.permute.xlu1 %3360 }
 0x215   : > { %v802_v40 = vpop.f32.mrb[2].mxu0 }
 0x216   : > { %v6364_v41 = vpop.f32.mrb[3].mxu0 }
 0x21d   : > { %v1045_v42 = vpop.f32.mrb[2].mxu1 }
 0x21e   : > { %v1046_v43 = vadd.f32 %v1045_v42, %v802_v40  ;;  %v6369_v44 = vpop.f32.mrb[3].mxu1 }
 0x225   : > { %v1299_v47 = vpop.f32.mrb[4].mxu0 }
 0x226   : > { %v1307_v48 = vadd.f32 %v1299_v47, %v1046_v43  ;;  %v6374_v49 = vpop.f32.mrb[5].mxu0 }
 0x22d   : > { %v1558_v50 = vpop.f32.mrb[4].mxu1 }
 0x22e   : > { %v1566_v51 = vadd.f32 %v1558_v50, %v1307_v48  ;;  %v6379_v52 = vpop.f32.mrb[5].mxu1  ;;  %v2868_v50 = vld [vmem:[%s7714_s3] sm:$0xff] }
 0x235   : > { %v1798_v53 = vpop.f32.mrb[6].mxu0 }
 0x236   : > { %v1806_v56 = vadd.f32 %v1798_v53, %v1566_v51  ;;  %v6384_v57 = vpop.f32.mrb[7].mxu0 }
 0x23d   : > { %v2057_v45 = vpop.f32.mrb[6].mxu1 }
 0x23e   : > { %v2065_v55 = vadd.f32 %v2057_v45, %v1806_v56  ;;  %v6389_v58 = vpop.f32.mrb[7].mxu1 }
 0x245   : > { %v2316_v59 = vpop.f32.mrb[8].mxu0 }
 0x246   : > { %v2324_v60 = vadd.f32 %v2316_v59, %v2065_v55  ;;  %v6394_v54 = vpop.f32.mrb[9].mxu0 }
 0x24d   : > { %v2575_v61 = vpop.f32.mrb[8].mxu1 }
 0x24e   : > { %v2583_v46 = vadd.f32 %v2575_v61, %v2324_v60  ;;  %v6399_v62 = vpop.f32.mrb[9].mxu1 }
 0x251   : > { %v2763_v0 = vpop.f32.mrb[0].mxu1 }
 0x252   : > { %v7253_v1 = vadd.f32 %v2846_v63, %v2763_v0  ;;  %v2692_v2 = vpop.f32.mrb[0].mxu0  ;;  %v2765_v4 = vpop.f32.mrb[1].mxu1 }
 0x253   : > { %v7255_v5 = vadd.f32 %v2846_v63, %v2692_v2  ;;  %v7257_v6 = vadd.f32 %v2846_v63, %v2765_v4  ;;  %v2694_v7 = vpop.f32.mrb[1].mxu0 }
 0x254   : > { %v2855_v8 = vmax.f32 %v7253_v1, 0.0  ;;  %v7260_v9 = vadd.f32 %v2846_v63, %v2694_v7 }
 0x255   : > { %v2856_v10 = vmax.f32 %v7257_v6, 0.0  ;;  %v2853_v12 = vmax.f32 %v7255_v5, 0.0  ;;  %v6252_v5 = vld [vmem:[%s7714_s3 + $0x20] sm:$0xff] }
 0x256   : > { %v2860_v11 = vsel %vm524_vm4, %v2855_v8, 0.0  ;;  %v2834_v13 = vpop.f32.mrb[10].mxu0  ;;  %v2854_v15 = vmax.f32 %v7260_v9, 0.0 }
 0x257   : > { %v2861_v14 = vsel %vm525_vm5, %v2856_v10, 0.0  ;;  %v2842_v16 = vadd.f32 %v2834_v13, %v2583_v46  ;;  %2889 = vrot.lane.b32.xlu1 %v2860_v11, %s7695_s23  ;;  %v6404_v17 = vpop.f32.mrb[11].mxu0  ;;  %v2858_v18 = vsel %vm522_vm2, %v2853_v12, 0.0 }
 0x258   : > { %2891 = vrot.lane.b32.xlu0 %v2861_v14, %s7695_s23  ;;  %v2859_v19 = vsel %vm523_vm3, %v2854_v15, 0.0 }
 0x259   : > { %v7291_v20 = vadd.f32 %v2846_v63, %v2842_v16 }
 0x25b   : > { %2885 = vrot.lane.b32.xlu1 %v2858_v18, %s7695_s23  ;;  %v2857_v21 = vmax.f32 %v7291_v20, 0.0  ;;  %v6256_v20 = vld [vmem:[%s7714_s3 + $0x28] sm:$0xff] }
 0x25c   : > { %2887 = vrot.lane.b32.xlu0 %v2859_v19, %s7695_s23 }
 0x25d   : > { %v2862_v23 = vsel %vm526_vm1, %v2857_v21, 0.0 }
 0x25f   : > { %3127 = vrot.lane.b32.xlu1 %v2860_v11, %s6778_s24 }
 0x260   : > { %3129 = vrot.lane.b32.xlu0 %v2861_v14, %s6778_s24 }
 0x263   : > { %3123 = vrot.lane.b32.xlu1 %v2858_v18, %s6778_s24 }
 0x264   : > { %3125 = vrot.lane.b32.xlu0 %v2859_v19, %s6778_s24 }
 0x267   : > { %3366 = vrot.lane.b32.xlu1 %v2860_v11, %s7696_s30 }
 0x268   : > { %3368 = vrot.lane.b32.xlu0 %v2861_v14, %s7696_s30 }
 0x26b   : > { %3362 = vrot.lane.b32.xlu1 %v2858_v18, %s7696_s30 }
 0x26c   : > { %3364 = vrot.lane.b32.xlu0 %v2859_v19, %s7696_s30 }
 0x26f   : > { %3610 = vrot.lane.b32.xlu1 %v2860_v11, %s7710_s15 }
 0x270   : > { %3612 = vrot.lane.b32.xlu0 %v2861_v14, %s7710_s15 }
 0x273   : > { %3606 = vrot.lane.b32.xlu1 %v2858_v18, %s7710_s15 }
 0x274   : > { %2893 = vrot.lane.b32.xlu0 %v2862_v23, %s7695_s23 }
 0x277   : > { %3604 = vrot.lane.b32.xlu1 %v6775_v3, %s7710_s15 }
 0x278   : > { %3608 = vrot.lane.b32.xlu0 %v2859_v19, %s7710_s15 }
 0x27b   : > { %4088 = vrot.lane.b32.xlu1 %v2861_v14, %s7711_s20 }
 0x27c   : > { %3131 = vrot.lane.b32.xlu0 %v2862_v23, %s6778_s24  ;;  %s7713_s24 = smov 95  }
 0x27f   : > { %4084 = vrot.lane.b32.xlu1 %v2859_v19, %s7711_s20 }
 0x280   : > { %4086 = vrot.lane.b32.xlu0 %v2860_v11, %s7711_s20 }
 0x283   : > { %4082 = vrot.lane.b32.xlu1 %v2858_v18, %s7711_s20 }
 0x284   : > { %3370 = vrot.lane.b32.xlu0 %v2862_v23, %s7696_s30  ;;  %s7718_s30 = smov 96  }
 0x287   : > { %4332 = vrot.lane.b32.xlu1 %v2861_v14, %s7712_s16 }
 0x288   : > { %4092 = vrot.lane.b32.xlu0 %v6775_v3, %s7711_s20 }
 0x28b   : > { %4328 = vrot.lane.b32.xlu1 %v2859_v19, %s7712_s16 }
 0x28c   : > { %3614 = vrot.lane.b32.xlu0 %v2862_v23, %s7710_s15 }
 0x28f   : > { %4326 = vrot.lane.b32.xlu1 %v2858_v18, %s7712_s16 }
 0x290   : > { %4330 = vrot.lane.b32.xlu0 %v2860_v11, %s7712_s16 }
 0x293   : > { %4576 = vrot.lane.b32.xlu1 %v2861_v14, %s7698_s21 }
 0x294   : > { %4090 = vrot.lane.b32.xlu0 %v2862_v23, %s7711_s20 }
 0x297   : > { %4572 = vrot.lane.b32.xlu1 %v2859_v19, %s7698_s21 }
 0x298   : > { %4336 = vrot.lane.b32.xlu0 %v6775_v3, %s7712_s16 }
 0x29b   : > { %4570 = vrot.lane.b32.xlu1 %v2858_v18, %s7698_s21 }
 0x29c   : > { %4334 = vrot.lane.b32.xlu0 %v2862_v23, %s7712_s16 }
 0x29f   : > { %4820 = vrot.lane.b32.xlu1 %v2861_v14, %s7713_s24 }
 0x2a0   : > { %4574 = vrot.lane.b32.xlu0 %v2860_v11, %s7698_s21 }
 0x2a3   : > { %4816 = vrot.lane.b32.xlu1 %v2859_v19, %s7713_s24 }
 0x2a4   : > { %4578 = vrot.lane.b32.xlu0 %v2862_v23, %s7698_s21 }
 0x2a7   : > { %4814 = vrot.lane.b32.xlu1 %v2858_v18, %s7713_s24  ;;  %v6244_v18 = vld [vmem:[%s7714_s3 + $0x10] sm:$0xff] }
 0x2a8   : > { %4580 = vrot.lane.b32.xlu0 %v6775_v3, %s7698_s21 }
 0x2ab   : > { %5288 = vperm.xlu1 %6666, %v461_v26  }
 0x2ac   : > { %4822 = vrot.lane.b32.xlu0 %v2862_v23, %s7713_s24 }
 0x2af   : > { %5308 = vperm.xlu1 %6666, %v457_v27  }
 0x2b0   : > { %4818 = vrot.lane.b32.xlu0 %v2860_v11, %s7713_s24 }
 0x2b4   : > { %4824 = vrot.lane.b32.xlu0 %v6775_v3, %s7713_s24 }
 0x2b8   : > { %5298 = vperm.xlu0 %6665, %v462_v24  }
 0x2c9   : > { %v2890_v34 = vpop.permute.xlu1 %2889 }
 0x2ca   : > { %v2892_v35 = vpop.permute.xlu0 %2891 }
 0x2cb   : > { %v2898_v36 = vsel %vm573_vm6, %v2890_v34, %v2892_v35 }
 0x2cc   : > { %2980 = vmatprep.subr.mxu0 %v2898_v36 }
 0x2cd   : > { %v2886_v37 = vpop.permute.xlu1 %2885 }
 0x2ce   : > { %v2888_v38 = vpop.permute.xlu0 %2887  ;;  %v2895_v42 = vsel %vm573_vm6, %v2884_v25, %v2886_v37 }
 0x2cf   : > { %v2897_v40 = vsel %vm573_vm6, %v2888_v38, %v2890_v34  ;;  %v2896_v41 = vsel %vm573_vm6, %v2886_v37, %v2888_v38  ;;  %v6248_v34 = vld [vmem:[%s7714_s3 + $0x18] sm:$0xff] }
 0x2d0   : > { %2909 = vmatprep.subr.mxu1 %v2896_v41  ;;  %2981 = vmatpush1.msra.mxu0 %v2897_v40 }
 0x2d1   : > { %2910 = vmatpush1.msra.mxu1 %v2895_v42  ;;  %v3128_v43 = vpop.permute.xlu1 %3127  ;;  %6239 = vmatmul.mubr.msk.f32.vlgmr.msra.gmra.mrb[12].mxu0 %vm2905_vm8, %v6237_v39 }
 0x2d2   : > { %v3130_v44 = vpop.permute.xlu0 %3129  ;;  %6238 = vmatmul.mubr.msk.f32.vlgmr.msra.gmra.mrb[10].mxu1 %vm2905_vm8, %v6237_v39  ;;  %6405 = vmatprep.subr.mxu1 %v6775_v3 }
 0x2d3   : > { %v3136_v47 = vsel %vm818_vm10, %v3128_v43, %v3130_v44  ;;  %6407 = vmatprep.mubr.msk.f32.mxu1 %vm6785_vm9, %v6775_v3  ;;  %3281 = vmatprep.mubr.f32.mxu0 %v6775_v3 }
 0x2d4   : > { %3217 = vmatprep.subr.mxu0 %v3136_v47 }
 0x2d5   : > { %v3124_v48 = vpop.permute.xlu1 %3123 }
 0x2d6   : > { %v3126_v49 = vpop.permute.xlu0 %3125  ;;  %v3133_v61 = vsel %vm818_vm10, %v3122_v32, %v3124_v48 }
 0x2d7   : > { %v3135_v51 = vsel %vm818_vm10, %v3126_v49, %v3128_v43  ;;  %v3134_v54 = vsel %vm818_vm10, %v3124_v48, %v3126_v49  ;;  %v6260_v43 = vld [vmem:[%s7714_s3 + $0x30] sm:$0xff] }
 0x2d8   : > { %3218 = vmatpush1.msra.mxu0 %v3135_v51 }
 0x2d9   : > { %v3367_v52 = vpop.permute.xlu1 %3366  ;;  %6242 = vmatmul.mubr.msk.f32.vlgmr.msra.gmra.mrb[12].mxu0 %vm2905_vm8, %v2868_v50  ;;  %6410 = vmatprep.subr.mxu0 %v6775_v3 }
 0x2da   : > { %v3369_v53 = vpop.permute.xlu0 %3368  ;;  %6412 = vmatprep.mubr.msk.f32.mxu0 %vm6785_vm9, %v6775_v3 }
 0x2db   : > { %v3375_v11 = vsel %vm1072_vm11, %v3367_v52, %v3369_v53 }
 0x2dd   : > { %v3363_v56 = vpop.permute.xlu1 %3362 }
 0x2de   : > { %v3365_v57 = vpop.permute.xlu0 %3364  ;;  %v3372_v0 = vsel %vm1072_vm11, %v3361_v33, %v3363_v56 }
 0x2df   : > { %v3373_v63 = vsel %vm1072_vm11, %v3363_v56, %v3365_v57  ;;  %v3374_v13 = vsel %vm1072_vm11, %v3365_v57, %v3367_v52  ;;  %v6264_v56 = vld [vmem:[%s7714_s3 + $0x38] sm:$0xff] }
 0x2e1   : > { %v3611_v45 = vpop.permute.xlu1 %3610 }
 0x2e2   : > { %v7369_v55 = vpop.permute.xlu0 %3612 }
 0x2e3   : > { %v3619_v17 = vsel %vm1331_vm12, %v3611_v45, %v7369_v55 }
 0x2e5   : > { %v3607_v58 = vpop.permute.xlu1 %3606 }
 0x2e6   : > { %v2894_v59 = vpop.permute.xlu0 %2893 }
 0x2e7   : > { %v2899_v60 = vsel %vm573_vm6, %v2892_v35, %v2894_v59 }
 0x2e8   : > { %6406 = vmatpush3.msra.mxu1 %v2899_v60 }
 0x2e9   : > { %6408 = vmatmul.mubr.msk.f32.vlgmr.msra.gmra.mrb[12].mxu1 %vm2905_vm8, %v6237_v39  ;;  %3146 = vmatprep.subr.mxu1 %v3134_v54  ;;  %v3605_v46 = vpop.permute.xlu1 %3604  ;;  %v6268_v54 = vld [vmem:[%s7714_s3 + $0x40] sm:$0xff] }
 0x2ea   : > { %v3609_v62 = vpop.permute.xlu0 %3608  ;;  %3147 = vmatpush1.msra.mxu1 %v3133_v61  ;;  %3210 = vmatprep.mubr.f32.mxu1 %v6775_v3  ;;  %v3616_v27 = vsel %vm1331_vm12, %v3605_v46, %v3607_v58 }
 0x2eb   : > { %3385 = vmatprep.subr.mxu1 %v3373_v63  ;;  %v3618_v19 = vsel %vm1331_vm12, %v3609_v62, %v3611_v45  ;;  %v3617_v26 = vsel %vm1331_vm12, %v3607_v58, %v3609_v62  ;;  %v6673_v62 = vld [vmem:[%s6931_s22] sm:$0xff] }
 0x2ec   : > { %v5059_v63 = vcombine.high %v6673_v62, %v6673_v62 }
 0x2ed   : > { %6241 = vmatmul.mubr.msk.f32.vlgmr.msra.gmra.mrb[10].mxu1 %vm2905_vm8, %v2868_v50  ;;  %v7379_v2 = vpop.permute.xlu1 %4088 }
 0x2ee   : > { %3386 = vmatpush1.msra.mxu1 %v3372_v0  ;;  %v3132_v4 = vpop.permute.xlu0 %3131  ;;  %3449 = vmatprep.mubr.f32.mxu1 %v6775_v3 }
 0x2ef   : > { %v3137_v7 = vsel %vm818_vm10, %v3130_v44, %v3132_v4  ;;  %6415 = vmatprep.subr.mxu1 %v6775_v3  ;;  %v458_v4 = vld [vmem:[%s7678_s5] sm:$0xff] }
 0x2f0   : > { %6411 = vmatpush3.msra.mxu0 %v3137_v7 }
 0x2f1   : > { %6413 = vmatmul.mubr.msk.f32.vlgmr.msra.gmra.mrb[14].mxu0 %vm2905_vm8, %v2868_v50  ;;  %3456 = vmatprep.subr.mxu0 %v3375_v11  ;;  %v4085_v14 = vpop.permute.xlu1 %4084  ;;  %v6674_v11 = vld [vmem:[%s6931_s22 + $0x8] sm:$0xff] }
 0x2f2   : > { %v4087_v16 = vpop.permute.xlu0 %4086  ;;  %3457 = vmatpush1.msra.mxu0 %v3374_v13  ;;  %3520 = vmatprep.mubr.f32.mxu0 %v6775_v3  ;;  %v5060_v13 = vcombine.high %v6674_v11, %v6674_v11 }
 0x2f3   : > { %3700 = vmatprep.subr.mxu0 %v3619_v17  ;;  %v4095_v30 = vsel %vm1830_vm13, %v4085_v14, %v4087_v16 }
 0x2f5   : > { %6245 = vmatmul.mubr.msk.f32.vlgmr.msra.gmra.mrb[10].mxu1 %vm2905_vm8, %v6244_v18  ;;  %6246 = vmatmul.mubr.msk.f32.vlgmr.msra.gmra.mrb[12].mxu0 %vm2905_vm8, %v6244_v18  ;;  %v4083_v23 = vpop.permute.xlu1 %4082 }
 0x2f6   : > { %3701 = vmatpush1.msra.mxu0 %v3618_v19  ;;  %v3371_v24 = vpop.permute.xlu0 %3370  ;;  %6417 = vmatprep.mubr.msk.f32.mxu1 %vm6785_vm9, %v6775_v3 }
 0x2f7   : > { %v3376_v25 = vsel %vm1072_vm11, %v3369_v53, %v3371_v24  ;;  %3764 = vmatprep.mubr.f32.mxu0 %v6775_v3  ;;  %6420 = vmatprep.subr.mxu0 %v6775_v3 }
 0x2f8   : > { %6416 = vmatpush3.msra.mxu1 %v3376_v25 }
 0x2f9   : > { %6418 = vmatmul.mubr.msk.f32.vlgmr.msra.gmra.mrb[14].mxu1 %vm2905_vm8, %v6244_v18  ;;  %3629 = vmatprep.subr.mxu1 %v3617_v26  ;;  %v4333_v32 = vpop.permute.xlu1 %4332 }
 0x2fa   : > { %v4093_v33 = vpop.permute.xlu0 %4092  ;;  %3630 = vmatpush1.msra.mxu1 %v3616_v27  ;;  %3693 = vmatprep.mubr.f32.mxu1 %v6775_v3 }
 0x2fb   : > { %6293 = vmatprep.subr.msk.mxu1 %vm523_vm3, %v2854_v15 }
 0x2fd   : > { %6249 = vmatmul.mubr.msk.f32.vlgmr.msra.gmra.mrb[10].mxu1 %vm2905_vm8, %v6248_v34  ;;  %6250 = vmatmul.mubr.msk.f32.vlgmr.msra.gmra.mrb[12].mxu0 %vm2905_vm8, %v6248_v34  ;;  %v4329_v35 = vpop.permute.xlu1 %4328 }
 0x2fe   : > { %6294 = vmatpush1.msk.msra.mxu1 %vm522_vm2, %v2853_v12  ;;  %v3615_v36 = vpop.permute.xlu0 %3614  ;;  %6422 = vmatprep.mubr.msk.f32.mxu0 %vm6785_vm9, %v6775_v3 }
 0x2ff   : > { %v3620_v9 = vsel %vm1331_vm12, %v7369_v55, %v3615_v36  ;;  %3915 = vmatprep.mubr.f32.mxu1 %v6775_v3  ;;  %6425 = vmatprep.subr.mxu1 %v6775_v3 }
 0x300   : > { %6421 = vmatpush3.msra.mxu0 %v3620_v9 }
 0x301   : > { %6423 = vmatmul.mubr.msk.f32.vlgmr.msra.gmra.mrb[16].mxu0 %vm2905_vm8, %v6248_v34  ;;  %6295 = vmatprep.subr.msk.mxu0 %vm525_vm5, %v2856_v10  ;;  %v4327_v28 = vpop.permute.xlu1 %4326  ;;  %v4094_v10 = vsel %vm1830_vm13, %v4083_v23, %v4085_v14  ;;  %v6675_v14 = vld [vmem:[%s6931_s22 + $0x10] sm:$0xf]  ;;  %s7536_s22 = sand.u32 1, %s6764_s26  }
 0x302   : > { %v4331_v29 = vpop.permute.xlu0 %4330  ;;  %6296 = vmatpush1.msk.msra.mxu0 %vm524_vm4, %v2855_v8  ;;  %3986 = vmatprep.mubr.f32.mxu0 %v6775_v3  ;;  %v4096_v8 = vsel %vm1830_vm13, %v4087_v16, %v7379_v2  ;;  %s6599_s0 = smul.u32 40, %s7536_s22  ;;  %vm5340_vm4 = vcmask 130048   ;;  %s6028_s1 = scalar_lea.sflag [#allocation5], %s7536_s22 }
 0x303   : > { %v4339_v15 = vsel %vm2089_vm14, %v4329_v35, %v4331_v29  ;;  %v4340_v41 = vsel %vm2089_vm14, %v4331_v29, %v4333_v32 }
 0x304   : > { %s7539_s23 = scalar_lea.vmem [#allocation4], %s6599_s0 }
 0x305   : > { %6253 = vmatmul.mubr.msk.f32.vlgmr.msra.gmra.mrb[10].mxu1 %vm2905_vm8, %v6252_v5  ;;  %6254 = vmatmul.mubr.msk.f32.vlgmr.msra.gmra.mrb[12].mxu0 %vm2905_vm8, %v6252_v5  ;;  %v4577_v6 = vpop.permute.xlu1 %4576  ;;  %s6047_s21 = sshll.u32 %s7539_s23, 4  ;;  %s7597_s21 = int_to_ptr.vmem [resolvable:$true] %s6047_s21 }
 0x306   : > { %6426 = vmatpush3.msk.msra.mxu1 %vm526_vm1, %v2857_v21  ;;  %v4091_v31 = vpop.permute.xlu0 %4090  ;;  %6427 = vmatprep.mubr.msk.f32.mxu1 %vm6785_vm9, %v6775_v3  ;;  %v4338_v21 = vsel %vm2089_vm14, %v4327_v28, %v4329_v35  ;;  %vm7715_vm1 = vcmask 31744   ;;  %s6678_s2 = scalar_lea.vmem %s7597_s21, 640 }
 0x307   : > { %4107 = vmatprep.subr.mxu1 %v4095_v30  ;;  %v4097_v1 = vsel %vm1830_vm13, %v7379_v2, %v4091_v31  ;;  %4242 = vmatprep.mubr.f32.mxu0 %v6775_v3  ;;  %v4098_v37 = vsel %vm1830_vm13, %v4091_v31, %v4093_v33  ;;  %vm7716_vm2 = vmmov %vm7715_vm1  ;;  %p6679_p11 = scmp.ne.s32.totalorder %s7597_s21, %s6678_s2 }
 0x308   : > { %4178 = vmatprep.subr.mxu0 %v4097_v1  ;;  %vm7717_vm3 = vmmov %vm7715_vm1 }
 0x309   : > { %6428 = vmatmul.mubr.msk.f32.vlgmr.msra.gmra.mrb[16].mxu1 %vm2905_vm8, %v6252_v5  ;;  %4179 = vmatpush1.msra.mxu0 %v4096_v8  ;;  %v4573_v22 = vpop.permute.xlu1 %4572  ;;  %p6680_p12 = pnand %p6679_p11, %p6903_p5 }
 0x30a   : > { %4108 = vmatpush1.msra.mxu1 %v4094_v10  ;;  %v4337_v12 = vpop.permute.xlu0 %4336  ;;  %4171 = vmatprep.mubr.f32.mxu1 %v6775_v3 }
 0x30b   : > { %4351 = vmatprep.subr.mxu1 %v4339_v15  ;;  %6430 = vmatprep.subr.mxu0 %v6775_v3  ;;  %p6681_p13 = pneg %p6680_p12 }
 0x30d   : > { %6257 = vmatmul.mubr.msk.f32.vlgmr.msra.gmra.mrb[10].mxu1 %vm2905_vm8, %v6256_v20  ;;  %6258 = vmatmul.mubr.msk.f32.vlgmr.msra.gmra.mrb[12].mxu0 %vm2905_vm8, %v6256_v20  ;;  %v4571_v39 = vpop.permute.xlu1 %4570 }
 0x30e   : > { %6431 = vmatpush3.msra.mxu0 %v4098_v37  ;;  %4352 = vmatpush1.msra.mxu1 %v4338_v21  ;;  %v4335_v38 = vpop.permute.xlu0 %4334  ;;  %v4582_v52 = vsel %vm2348_vm15, %v4571_v39, %v4573_v22 }
 0x30f   : > { %6432 = vmatprep.mubr.msk.f32.mxu0 %vm6785_vm9, %v6775_v3  ;;  %v4341_v40 = vsel %vm2089_vm14, %v4333_v32, %v4335_v38  ;;  %4415 = vmatprep.mubr.f32.mxu1 %v6775_v3  ;;  %v4342_v44 = vsel %vm2089_vm14, %v4335_v38, %v4337_v12 }
 0x310   : > { %4422 = vmatprep.subr.mxu0 %v4341_v40  ;;  %6435 = vmatprep.subr.mxu1 %v6775_v3 }
 0x311   : > { %6433 = vmatmul.mubr.msk.f32.vlgmr.msra.gmra.mrb[18].mxu0 %vm2905_vm8, %v6256_v20  ;;  %v4821_v47 = vpop.permute.xlu1 %4820 }
 0x312   : > { %4423 = vmatpush1.msra.mxu0 %v4340_v41  ;;  %v4575_v42 = vpop.permute.xlu0 %4574  ;;  %4486 = vmatprep.mubr.f32.mxu0 %v6775_v3 }
 0x313   : > { %v4583_v49 = vsel %vm2348_vm15, %v4573_v22, %v4575_v42  ;;  %v4584_v51 = vsel %vm2348_vm15, %v4575_v42, %v4577_v6 }
 0x315   : > { %6261 = vmatmul.mubr.msk.f32.vlgmr.msra.gmra.mrb[10].mxu1 %vm2905_vm8, %v6260_v43  ;;  %6262 = vmatmul.mubr.msk.f32.vlgmr.msra.gmra.mrb[12].mxu0 %vm2905_vm8, %v6260_v43  ;;  %v4817_v57 = vpop.permute.xlu1 %4816 }
 0x316   : > { %6436 = vmatpush3.msra.mxu1 %v4342_v44  ;;  %v4579_v48 = vpop.permute.xlu0 %4578  ;;  %6437 = vmatprep.mubr.msk.f32.mxu1 %vm6785_vm9, %v6775_v3 }
 0x317   : > { %4595 = vmatprep.subr.mxu1 %v4583_v49  ;;  %v4585_v50 = vsel %vm2348_vm15, %v4577_v6, %v4579_v48  ;;  %4730 = vmatprep.mubr.f32.mxu0 %v6775_v3 }
 0x318   : > { %4666 = vmatprep.subr.mxu0 %v4585_v50 }
 0x319   : > { %6438 = vmatmul.mubr.msk.f32.vlgmr.msra.gmra.mrb[18].mxu1 %vm2905_vm8, %v6260_v43  ;;  %4667 = vmatpush1.msra.mxu0 %v4584_v51  ;;  %v4815_v59 = vpop.permute.xlu1 %4814 }
 0x31a   : > { %4596 = vmatpush1.msra.mxu1 %v4582_v52  ;;  %v4581_v53 = vpop.permute.xlu0 %4580  ;;  %6440 = vmatprep.subr.mxu0 %v6775_v3  ;;  %v4826_v0 = vsel %vm2607_vm0, %v4815_v59, %v4817_v57 }
 0x31b   : > { %v4586_v45 = vsel %vm2348_vm15, %v4579_v48, %v4581_v53  ;;  %4659 = vmatprep.mubr.f32.mxu1 %v6775_v3 }
 0x31d   : > { %6266 = vmatmul.mubr.msk.f32.vlgmr.msra.gmra.mrb[12].mxu0 %vm2905_vm8, %v6264_v56  ;;  %6265 = vmatmul.mubr.msk.f32.vlgmr.msra.gmra.mrb[10].mxu1 %vm2905_vm8, %v6264_v56 }
 0x31e   : > { %6441 = vmatpush3.msra.mxu0 %v4586_v45  ;;  %v4823_v55 = vpop.permute.xlu0 %4822  ;;  %6442 = vmatprep.mubr.msk.f32.mxu0 %vm6785_vm9, %v6775_v3 }
 0x31f   : > { %v4829_v58 = vsel %vm2607_vm0, %v4821_v47, %v4823_v55  ;;  %4903 = vmatprep.mubr.f32.mxu1 %v6775_v3 }
 0x320   : > { %4910 = vmatprep.subr.mxu0 %v4829_v58 }
 0x321   : > { %6443 = vmatmul.mubr.msk.f32.vlgmr.msra.gmra.mrb[20].mxu0 %vm2905_vm8, %v6264_v56 }
 0x322   : > { %v4819_v60 = vpop.permute.xlu0 %4818  ;;  %4974 = vmatprep.mubr.f32.mxu0 %v6775_v3 }
 0x323   : > { %v4828_v61 = vsel %vm2607_vm0, %v4819_v60, %v4821_v47  ;;  %v4827_v46 = vsel %vm2607_vm0, %v4817_v57, %v4819_v60 }
 0x324   : > { %4839 = vmatprep.subr.mxu1 %v4827_v46  ;;  %4911 = vmatpush1.msra.mxu0 %v4828_v61 }
 0x325   : > { %4840 = vmatpush1.msra.mxu1 %v4826_v0  ;;  %6270 = vmatmul.mubr.msk.f32.vlgmr.msra.gmra.mrb[12].mxu0 %vm2905_vm8, %v6268_v54 }
 0x326   : > { %v4825_v2 = vpop.permute.xlu0 %4824  ;;  %6269 = vmatmul.mubr.msk.f32.vlgmr.msra.gmra.mrb[10].mxu1 %vm2905_vm8, %v6268_v54  ;;  %6445 = vmatprep.subr.mxu1 %v6775_v3 }
 0x327   : > { %v4830_v7 = vsel %vm2607_vm0, %v4823_v55, %v4825_v2  ;;  %6272 = vmatprep.subr.msk.mxu0 %vm583_vm7, %v5059_v63  ;;  %5138 = vmatprep.mubr.f32.mxu0 %v6775_v3 }
 0x328   : > { %6446 = vmatpush3.msra.mxu1 %v4830_v7  ;;  %6273 = vmatpush1.msk.msra.mxu0 %vm583_vm7, %v6673_v62 }
 0x329   : > { %6447 = vmatprep.mubr.msk.f32.mxu1 %vm6785_vm9, %v6775_v3  ;;  %6274 = vmatmul.mubr.msk.f32.vlgmr.msra.gmra.mrb[22].mxu0 %vm7715_vm1, %v458_v4 }
 0x32a   : > { %6448 = vmatmul.mubr.msk.f32.vlgmr.msra.gmra.mrb[20].mxu1 %vm2905_vm8, %v6268_v54  ;;  %6450 = vmatprep.subr.mxu0 %v6775_v3  ;;  %v5289_v10 = vpop.permute.xlu1 %5288 }
 0x32b   : > { %6275 = vmatprep.subr.msk.mxu1 %vm583_vm7, %v5060_v13  ;;  %6451 = vmatpush3.msk.msra.mxu0 %vm583_vm7, %v6675_v14 }
 0x32c   : > { %6452 = vmatprep.mubr.msk.f32.mxu0 %vm6785_vm9, %v6775_v3  ;;  %6276 = vmatpush1.msk.msra.mxu1 %vm583_vm7, %v6674_v11 }
 0x32d   : > { %5209 = vmatprep.mubr.f32.mxu1 %v6775_v3  ;;  %6453 = vmatmul.mubr.msk.f32.vlgmr.msra.gmra.mrb[24].mxu0 %vm7716_vm2, %v458_v4 }
 0x32e   : > { %6277 = vmatmul.mubr.msk.f32.vlgmr.msra.gmra.mrb[22].mxu1 %vm7717_vm3, %v458_v4  ;;  %6466 = vmatprep.mubr.msk.f32.mxu0 %vm6785_vm9, %v6775_v3  ;;  %v5309_v21 = vpop.permute.xlu1 %5308 }
 0x32f   : > { %6459 = vmatprep.mubr.msk.f32.mxu1 %vm6785_vm9, %v6775_v3 }
 0x337   : > { %v5299_v41 = vpop.permute.xlu0 %5298 }
 0x3bc   : > { %v3117_v16 = vpop.f32.mrb[12].mxu1 }
 0x3bd   : > { %v6409_v17 = vpop.f32.mrb[13].mxu1 }
 0x3be   : > { %v463_v17 = vld [vmem:[%s7684_s11] sm:$0xff] }
 0x3c4   : > { %v3354_v18 = vpop.f32.mrb[14].mxu0 }
 0x3c5   : > { %v3355_v19 = vadd.f32 %v3354_v18, %v3117_v16  ;;  %v6414_v23 = vpop.f32.mrb[15].mxu0  ;;  %v464_v18 = vld [vmem:[%s7684_s11 + $0x8] sm:$0xff] }
 0x3cc   : > { %v3593_v24 = vpop.f32.mrb[14].mxu1 }
 0x3cd   : > { %v3601_v25 = vadd.f32 %v3593_v24, %v3355_v19  ;;  %v6419_v26 = vpop.f32.mrb[15].mxu1  ;;  %v6786_v24 = vmov 0.0|0.0  }
 0x3ce   : > { %6511 = vmatprep.subr.bf16.mxu1 %v6786_v24  ;;  %6514 = vmatprep.subr.bf16.mxu0 %v6786_v24 }
 0x3d4   : > { %v3837_v27 = vpop.f32.mrb[16].mxu0 }
 0x3d5   : > { %v3845_v32 = vadd.f32 %v3837_v27, %v3601_v25  ;;  %v6424_v33 = vpop.f32.mrb[17].mxu0  ;;  %v6512_v25 = vpack.c.bf16 %v464_v18, %v463_v17 }
 0x3d7   : > { %6513 = vmatpush3.bf16.msra.mxu1 %v6512_v25  ;;  %6516 = vmatpush3.bf16.msra.mxu0 %v6512_v25 }
 0x3d8   : > { %6517 = vmatprep.subr.bf16.mxu1 %v6786_v24  ;;  %6520 = vmatprep.subr.bf16.mxu0 %v6786_v24 }
 0x3dc   : > { %v4059_v34 = vpop.f32.mrb[16].mxu1 }
 0x3dd   : > { %v4067_v35 = vadd.f32 %v4059_v34, %v3845_v32  ;;  %v6429_v36 = vpop.f32.mrb[17].mxu1 }
 0x3e4   : > { %v4315_v9 = vpop.f32.mrb[18].mxu0 }
 0x3e5   : > { %v4323_v28 = vadd.f32 %v4315_v9, %v4067_v35  ;;  %v6434_v29 = vpop.f32.mrb[19].mxu0 }
 0x3ec   : > { %v4559_v5 = vpop.f32.mrb[18].mxu1 }
 0x3ed   : > { %v4567_v6 = vadd.f32 %v4559_v5, %v4323_v28  ;;  %v6439_v31 = vpop.f32.mrb[19].mxu1 }
 0x3f4   : > { %v4803_v30 = vpop.f32.mrb[20].mxu0 }
 0x3f5   : > { %v4811_v1 = vadd.f32 %v4803_v30, %v4567_v6  ;;  %v6444_v8 = vpop.f32.mrb[21].mxu0 }
 0x3f8   : > { %v4976_v22 = vpop.f32.mrb[12].mxu0 }
 0x3f9   : > { %v4905_v12 = vpop.f32.mrb[10].mxu1  ;;  %v4978_v15 = vpop.f32.mrb[13].mxu0  ;;  %v5313_v46 = vadd.f32 %v5309_v21, %v4976_v22 }
 0x3fa   : > { %v4907_v20 = vpop.f32.mrb[11].mxu1  ;;  %v5311_v47 = vadd.f32 %v5309_v21, %v4905_v12  ;;  %v5314_v62 = vadd.f32 %v5309_v21, %v4978_v15 }
 0x3fb   : > { %v5312_v49 = vadd.f32 %v5309_v21, %v4907_v20 }
 0x3fc   : > { %v5140_v37 = vpop.f32.mrb[22].mxu0 }
 0x3fd   : > { %v5291_v38 = vmul.f32 %v5289_v10, %v5140_v37  ;;  %v5047_v39 = vpop.f32.mrb[20].mxu1  ;;  %v5142_v40 = vpop.f32.mrb[23].mxu0 }
 0x3fe   : > { %v5055_v42 = vadd.f32 %v5047_v39, %v4811_v1  ;;  %v5292_v43 = vmul.f32 %v5289_v10, %v5142_v40  ;;  %v6449_v44 = vpop.f32.mrb[21].mxu1 }
 0x3ff   : > { %v5301_v48 = vadd.f32 %v5299_v41, %v5291_v38 }
 0x400   : > { %v5302_v50 = vadd.f32 %v5299_v41, %v5292_v43  ;;  %v5282_v51 = vpop.f32.mrb[24].mxu0  ;;  %v5315_v59 = vadd.f32 %v5309_v21, %v5055_v42 }
 0x401   : > { %v5316_v52 = vadd.f32 %v5311_v47, %v5301_v48  ;;  %v5295_v53 = vmul.f32 %v5289_v10, %v5282_v51  ;;  %v5211_v56 = vpop.f32.mrb[22].mxu1  ;;  %v6454_v57 = vpop.f32.mrb[25].mxu0 }
 0x402   : > { %v5317_v45 = vadd.f32 %v5312_v49, %v5302_v50  ;;  %v5293_v55 = vmul.f32 %v5289_v10, %v5211_v56  ;;  %v5213_v58 = vpop.f32.mrb[23].mxu1 }
 0x403   : > { %5321 = vst [vmem:[%s7539_s23] sm:$0xff] %v5316_v52  ;;  %v5305_v60 = vadd.f32 %v5299_v41, %v5295_v53  ;;  %v5294_v54 = vmul.f32 %v5289_v10, %v5213_v58  ;;  %5328 = vrot.lane.b32.xlu0 %v5316_v52, %s7711_s20 }
 0x404   : > { %5322 = vst [vmem:[%s7539_s23 + $0x8] sm:$0xff] %v5317_v45  ;;  %v5303_v61 = vadd.f32 %v5299_v41, %v5293_v55  ;;  %5415 = vrot.lane.b32.xlu1 %v5317_v45, %s7711_s20 }
 0x405   : > { %v5320_v63 = vadd.f32 %v5315_v59, %v5305_v60  ;;  %v5304_v0 = vadd.f32 %v5299_v41, %v5294_v54 }
 0x406   : > { %v5318_v2 = vadd.f32 %v5313_v46, %v5303_v61 }
 0x407   : > { %5325 = vst [vmem:[%s7539_s23 + $0x20] sm:$0xff] %v5320_v63  ;;  %v5319_v4 = vadd.f32 %v5314_v62, %v5304_v0 }
 0x408   : > { %5323 = vst [vmem:[%s7539_s23 + $0x10] sm:$0xff] %v5318_v2  ;;  %5577 = vrot.lane.b32.xlu0 %v5318_v2, %s7711_s20 }
 0x409   : > { %5324 = vst [vmem:[%s7539_s23 + $0x18] sm:$0xff] %v5319_v4  ;;  %5739 = vrot.lane.b32.xlu1 %v5319_v4, %s7711_s20  ;;  %s6789_s23 = smov [#allocation4]  }
 0x40c   : > { %5901 = vrot.lane.b32.xlu0 %v5320_v63, %s7711_s20  ;;  %s7719_s20 = smov 31  }
 0x475   : > { %v5329_v7 = vpop.permute.xlu0 %5328 }
 0x476   : > { %v5331_v11 = vmax.f32 %v5316_v52, %v5329_v7  ;;  %v5416_v13 = vpop.permute.xlu1 %5415 }
 0x477   : > { %v5418_v14 = vmax.f32 %v5317_v45, %v5416_v13 }
 0x478   : > { %5333 = vrot.lane.b32.xlu1 %v5331_v11, %s7718_s30 }
 0x479   : > { %5420 = vrot.lane.b32.xlu0 %v5418_v14, %s7718_s30 }
 0x47a   : > { %v5578_v16 = vpop.permute.xlu0 %5577 }
 0x47b   : > { %v5580_v19 = vmax.f32 %v5318_v2, %v5578_v16  ;;  %v5740_v23 = vpop.permute.xlu1 %5739 }
 0x47c   : > { %v5742_v26 = vmax.f32 %v5319_v4, %v5740_v23 }
 0x47d   : > { %5582 = vrot.lane.b32.xlu1 %v5580_v19, %s7718_s30 }
 0x47e   : > { %5744 = vrot.lane.b32.xlu0 %v5742_v26, %s7718_s30  ;;  %v5902_v27 = vpop.permute.xlu0 %5901 }
 0x47f   : > { %v5904_v32 = vmax.f32 %v5320_v63, %v5902_v27 }
 0x481   : > { %5906 = vrot.lane.b32.xlu1 %v5904_v32, %s7718_s30  ;;  %s6601_s30 = smul.u32 640, %s6886_s29 }
 0x483   : > { %s7595_s0 = scalar_lea.hbm %s7685_s12, %s6601_s30 }
 0x4ea   : > { %v5334_v33 = vpop.permute.xlu1 %5333 }
 0x4eb   : > { %v5336_v34 = vmax.f32 %v5331_v11, %v5334_v33  ;;  %v5421_v35 = vpop.permute.xlu0 %5420 }
 0x4ec   : > { %v5423_v36 = vmax.f32 %v5331_v11, %v5421_v35  ;;  %v5499_v9 = vmax.f32 %v5418_v14, %v5421_v35 }
 0x4ed   : > { %5338 = vrot.lane.b32.xlu0 %v5336_v34, %s7713_s24 }
 0x4ee   : > { %5425 = vrot.lane.b32.xlu1 %v5423_v36, %s7719_s20 }
 0x4ef   : > { %v5583_v28 = vpop.permute.xlu1 %5582 }
 0x4f0   : > { %v5585_v29 = vmax.f32 %v5418_v14, %v5583_v28  ;;  %v5745_v5 = vpop.permute.xlu0 %5744  ;;  %v5661_v6 = vmax.f32 %v5580_v19, %v5583_v28 }
 0x4f1   : > { %5501 = vrot.lane.b32.xlu0 %v5499_v9, %s7713_s24  ;;  %v5747_v31 = vmax.f32 %v5580_v19, %v5745_v5  ;;  %v5823_v1 = vmax.f32 %v5742_v26, %v5745_v5 }
 0x4f2   : > { %5587 = vrot.lane.b32.xlu1 %v5585_v29, %s7719_s20 }
 0x4f3   : > { %v5907_v30 = vpop.permute.xlu1 %5906 }
 0x4f4   : > { %v5909_v8 = vmax.f32 %v5742_v26, %v5907_v30 }
 0x4f5   : > { %5663 = vrot.lane.b32.xlu0 %v5661_v6, %s7713_s24 }
 0x4f6   : > { %5749 = vrot.lane.b32.xlu1 %v5747_v31, %s7719_s20 }
 0x4f9   : > { %5825 = vrot.lane.b32.xlu0 %v5823_v1, %s7713_s24  ;;  %s6787_s24 = smov 8  }
 0x4fa   : > { %5911 = vrot.lane.b32.xlu1 %v5909_v8, %s7719_s20  ;;  %s6788_s20 = smov 16  }
 0x55f   : > { %v5339_v10 = vpop.permute.xlu0 %5338 }
 0x560   : > { %v5426_v22 = vpop.permute.xlu1 %5425  ;;  %6460 = vmatmul.mubr.msk.f32.vlgmr.msra.gmra.mrb[24].mxu1 %vm5340_vm4, %v5339_v10 }
 0x561   : > { %6467 = vmatmul.mubr.msk.f32.vlgmr.msra.gmra.mrb[26].mxu0 %vm5340_vm4, %v5426_v22  ;;  %6519 = vmatpush3.bf16.msra.mxu1 %v6512_v25 }
 0x562   : > { %6522 = vmatpush3.bf16.msra.mxu0 %v6512_v25  ;;  %6473 = vmatprep.mubr.msk.f32.mxu1 %vm6785_vm9, %v6775_v3 }
 0x563   : > { %v5502_v12 = vpop.permute.xlu0 %5501  ;;  %6480 = vmatprep.mubr.msk.f32.mxu0 %vm6785_vm9, %v6775_v3  ;;  %6523 = vmatprep.subr.bf16.mxu1 %v6786_v24 }
 0x564   : > { %v5588_v15 = vpop.permute.xlu1 %5587  ;;  %6474 = vmatmul.mubr.msk.f32.vlgmr.msra.gmra.mrb[26].mxu1 %vm5340_vm4, %v5502_v12  ;;  %6526 = vmatprep.subr.bf16.mxu0 %v6786_v24 }
 0x565   : > { %6481 = vmatmul.mubr.msk.f32.vlgmr.msra.gmra.mrb[28].mxu0 %vm5340_vm4, %v5588_v15  ;;  %6525 = vmatpush3.bf16.msra.mxu1 %v6512_v25 }
 0x566   : > { %6528 = vmatpush3.bf16.msra.mxu0 %v6512_v25  ;;  %6487 = vmatprep.mubr.msk.f32.mxu1 %vm6785_vm9, %v6775_v3 }
 0x567   : > { %v5664_v20 = vpop.permute.xlu0 %5663  ;;  %6494 = vmatprep.mubr.msk.f32.mxu0 %vm6785_vm9, %v6775_v3  ;;  %6529 = vmatprep.subr.bf16.mxu1 %v6786_v24 }
 0x568   : > { %v5750_v21 = vpop.permute.xlu1 %5749  ;;  %6488 = vmatmul.mubr.msk.f32.vlgmr.msra.gmra.mrb[28].mxu1 %vm5340_vm4, %v5664_v20  ;;  %6532 = vmatprep.subr.bf16.mxu0 %v6786_v24 }
 0x569   : > { %6495 = vmatmul.mubr.msk.f32.vlgmr.msra.gmra.mrb[30].mxu0 %vm5340_vm4, %v5750_v21  ;;  %6531 = vmatpush3.bf16.msra.mxu1 %v6512_v25 }
 0x56a   : > { %6534 = vmatpush3.bf16.msra.mxu0 %v6512_v25  ;;  %6501 = vmatprep.mubr.msk.f32.mxu1 %vm6785_vm9, %v6775_v3 }
 0x56b   : > { %v5826_v37 = vpop.permute.xlu0 %5825  ;;  %6508 = vmatprep.mubr.msk.f32.mxu0 %vm6785_vm9, %v6775_v3 }
 0x56c   : > { %v5912_v38 = vpop.permute.xlu1 %5911  ;;  %6502 = vmatmul.mubr.msk.f32.vlgmr.msra.gmra.mrb[30].mxu1 %vm5340_vm4, %v5826_v37 }
 0x56d   : > { %6509 = vmatmul.mubr.msk.f32.vlgmr.msra.gmra.mrb[32].mxu0 %vm5340_vm4, %v5912_v38 }
 0x633   : > { %v5409_v39 = vpop.f32.mrb[24].mxu1 }
 0x634   : > { %v6461_v40 = vpop.f32.mrb[25].mxu1  ;;  %v5495_v41 = vpop.f32.mrb[26].mxu0 }
 0x635   : > { %v6468_v42 = vpop.f32.mrb[27].mxu0  ;;  %5986 = vrot.lane.b32.xlu0 %v5495_v41, %s6787_s24  ;;  %s6682_s24 = sshll.u32 %s6789_s23, 4  ;;  %s6683_s24 = int_to_ptr.vmem [resolvable:$false] %s6682_s24 }
 0x636   : > { %s6684_s30 = scalar_lea.vmem %s6683_s24, 1280  ;;  %p6685_p0 = scmp.lt.s32.totalorder %s7597_s21, %s6683_s24 }
 0x637   : > { %v5571_v43 = vpop.f32.mrb[26].mxu1  ;;  %p6686_p1 = scmp.lt.s32.totalorder %s6684_s30, %s6678_s2 }
 0x638   : > { %v5657_v3 = vpop.f32.mrb[28].mxu0  ;;  %5990 = vrot.lane.b32.xlu1 %v5571_v43, %s6788_s20  ;;  %v6475_v44 = vpop.f32.mrb[27].mxu1 }
 0x639   : > { %p6687_p2 = por %p6686_p1, %p6685_p0 }
 0x63b   : > { %p6688_p3 = pnand %p6687_p2, %p6681_p13 }
 0x63d   : > { %6691 = shalt.err (!%p6688_p3)
}
 0x63e   : > { %s6692_s16 = scalar_lea.hbm %s7595_s0, 640  ;;  %s6696_s23 = scalar_lea.hbm %s7685_s12, 1280 }
 0x63f   : > { %p6693_p4 = scmp.ne.s32.totalorder %s7595_s0, %s6692_s16  ;;  %p6697_p9 = scmp.lt.u32.totalorder %s7595_s0, %s7685_s12 }
 0x640   : > { %p6698_p10 = scmp.lt.u32.totalorder %s6696_s23, %s6692_s16  ;;  %p6700_p12 = scmp.lt.u32.totalorder %s6692_s16, %s7595_s0 }
 0x641   : > { %p6694_p7 = pnand %p6693_p4, %p6903_p5 }
 0x642   : > { %p6699_p11 = por %p6698_p10, %p6697_p9 }
 0x643   : > { %p6695_p8 = pneg %p6694_p7 }
 0x644   : > { %p6701_p13 = por %p6700_p12, %p6699_p11 }
 0x646   : > { %p6702_p0 = pnand %p6701_p13, %p6695_p8 }
 0x648   : > { %6705 = shalt.err (!%p6702_p0)
}
 0x649   : > { %6602 = dma.vmem_to_hbm [thread:$0]  (%p6903_p5), %s7597_s21, 640, %s7595_s0, %s6028_s1   ;;  %v6482_v47 = vpop.f32.mrb[29].mxu0  ;;  %v5733_v48 = vpop.f32.mrb[28].mxu1  ;;  %vm6015_vm5 = vcmask 195584   ;;  %vm6018_vm7 = vcmask 326656   ;;  %vm6020_vm9 = vcmask 392192  }
 0x64a   : > { %s6790_s2 = smov 24   ;;  %v5819_v49 = vpop.f32.mrb[30].mxu0  ;;  %s7720_s30 = smov 32   ;;  %v6489_v50 = vpop.f32.mrb[29].mxu1  ;;  %vm6022_vm10 = vcmask 457728  }
 0x64b   : > { %5994 = vrot.lane.b32.xlu0 %v5657_v3, %s6790_s2  ;;  %5998 = vrot.lane.b32.xlu1 %v5733_v48, %s7720_s30  ;;  %s6791_s3 = smov 40   ;;  %v6496_v51 = vpop.f32.mrb[31].mxu0  ;;  %v5895_v52 = vpop.f32.mrb[30].mxu1  ;;  %s6792_s16 = smov 48  }
 0x64c   : > { %v5981_v53 = vpop.f32.mrb[32].mxu0  ;;  %v6503_v56 = vpop.f32.mrb[31].mxu1  ;;  %s6793_s15 = smov 56   ;;  %s6155_s1 = sshll.u32 %s7536_s22, 3 }
 0x64d   : > { %v6510_v57 = vpop.f32.mrb[33].mxu0  ;;  %s6290_s21 = sshll.u32 %s6886_s29, 7  ;;  %s444_s0 = scalar_lea.vmem [#allocation6], %s6155_s1 }
 0x64e   : > { %s6060_s20 = sshll.u32 %s444_s0, 4  ;;  %s7630_s2 = scalar_lea.hbm %s7686_s13, %s6290_s21  ;;  %s7632_s20 = int_to_ptr.vmem [resolvable:$true] %s6060_s20 }
 0x64f   : > { %6002 = vrot.lane.b32.xlu0 %v5819_v49, %s6791_s3  ;;  %6006 = vrot.lane.b32.xlu1 %v5895_v52, %s6792_s16  ;;  %s6033_s29 = scalar_lea.sflag [#allocation7], %s7536_s22  ;;  %s6706_s30 = scalar_lea.vmem %s7632_s20, 128 }
 0x650   : > { %p6707_p1 = scmp.ne.s32.totalorder %s7632_s20, %s6706_s30  ;;  %s6794_s3 = smov [#allocation6]  }
 0x651   : > { %s6710_s16 = sshll.u32 %s6794_s3, 4  ;;  %s6711_s16 = int_to_ptr.vmem [resolvable:$false] %s6710_s16 }
 0x652   : > { %p6708_p2 = pnand %p6707_p1, %p6903_p5  ;;  %p6713_p4 = scmp.lt.s32.totalorder %s7632_s20, %s6711_s16 }
 0x653   : > { %6010 = vrot.lane.b32.xlu0 %v5981_v53, %s6793_s15  ;;  %s6712_s15 = scalar_lea.vmem %s6711_s16, 256 }
 0x654   : > { %p6709_p3 = pneg %p6708_p2  ;;  %p6714_p7 = scmp.lt.s32.totalorder %s6712_s15, %s6706_s30 }
 0x656   : > { %p6715_p8 = por %p6714_p7, %p6713_p4 }
 0x658   : > { %p6716_p9 = pnand %p6715_p8, %p6709_p3 }
 0x6a7   : > { %v5987_v45 = vpop.permute.xlu0 %5986 }
 0x6a8   : > { %v6013_v55 = vsel %vm2905_vm8, %v5409_v39, %v5987_v45  ;;  %vm6024_vm8 = vcmask 523264  }
 0x6aa   : > { %v5991_v58 = vpop.permute.xlu1 %5990 }
 0x6ab   : > { %v6014_v59 = vsel %vm5340_vm4, %v6013_v55, %v5991_v58 }
 0x6bd   : > { %v5995_v60 = vpop.permute.xlu0 %5994  ;;  %v5999_v61 = vpop.permute.xlu1 %5998 }
 0x6be   : > { %v6016_v54 = vsel %vm6015_vm5, %v6014_v59, %v5995_v60 }
 0x6bf   : > { %v6017_v46 = vsel %vm573_vm6, %v6016_v54, %v5999_v61 }
 0x6c1   : > { %v6003_v62 = vpop.permute.xlu0 %6002  ;;  %v6007_v0 = vpop.permute.xlu1 %6006 }
 0x6c2   : > { %v6019_v63 = vsel %vm6018_vm7, %v6017_v46, %v6003_v62 }
 0x6c3   : > { %v6021_v2 = vsel %vm6020_vm9, %v6019_v63, %v6007_v0 }
 0x6c5   : > { %v6011_v4 = vpop.permute.xlu0 %6010 }
 0x6c6   : > { %v6023_v7 = vsel %vm6022_vm10, %v6021_v2, %v6011_v4 }
 0x6c7   : > { %v6025_v11 = vsel %vm6024_vm8, %v6023_v7, 0.0 }
 0x6c8   : > { %6026 = vst [vmem:[%s444_s0] sm:$0xff] %v6025_v11 }
 0x6c9   : > { %6719 = shalt.err (!%p6716_p9)
}
 0x6ca   : > { %s6720_s22 = scalar_lea.hbm %s7630_s2, 128  ;;  %s6724_s0 = scalar_lea.hbm %s7686_s13, 256 }
 0x6cb   : > { %p6721_p10 = scmp.ne.s32.totalorder %s7630_s2, %s6720_s22  ;;  %p6725_p13 = scmp.lt.u32.totalorder %s7630_s2, %s7686_s13 }
 0x6cc   : > { %p6726_p0 = scmp.lt.u32.totalorder %s6724_s0, %s6720_s22  ;;  %p6728_p2 = scmp.lt.u32.totalorder %s6720_s22, %s7630_s2 }
 0x6cd   : > { %p6722_p11 = pnand %p6721_p10, %p6903_p5 }
 0x6ce   : > { %p6727_p1 = por %p6726_p0, %p6725_p13 }
 0x6cf   : > { %p6723_p12 = pneg %p6722_p11 }
 0x6d0   : > { %p6729_p3 = por %p6728_p2, %p6727_p1 }
 0x6d2   : > { %p6730_p4 = pnand %p6729_p3, %p6723_p12 }
 0x6d4   : > { %6733 = shalt.err (!%p6730_p4)
}
 0x6d5   : > { %6603 = dma.vmem_to_hbm [thread:$0]  (%p6903_p5), %s7632_s20, 128, %s7630_s2, %s6033_s29  }
 0x6d6 PF: > { %p6613_p7 = scmp.ge.s32.totalorder %s6772_s28, 2  ;;  %s6072_s30 = sand.u32 1, %s6760_s25  }
 0x6d7   : > { %s6073_s3 = scalar_lea.sflag [#allocation5], %s6072_s30 }
 0x6d8   : > { %p6607_p8 = pnand %p6613_p7, %p6907_p6 }
 0x6da   : > { %6751 = dma.done.wait (!%p6607_p8), %s6073_s3, 640  }
 0x6db   : > { %6753 = vsyncadd (!%p6607_p8), %s6073_s3, 4294966656  ;;  %s6082_s16 = scalar_lea.sflag [#allocation7], %s6072_s30 }
 0x6dc   : > { %6755 = dma.done.wait (!%p6607_p8), %s6082_s16, 128  }
 0x6dd   : > { %6757 = vsyncadd (!%p6607_p8), %s6082_s16, 4294967168  ;;  %p27_p5 = scmp.ge.s32.totalorder %s6890_s14, 4   ;;  %s7721_s25 = smov %s6764_s26 }
 0x6de   : > { %s7722_s26 = smov %s6768_s27  ;;  %s7723_s27 = smov %s6901_s17 }
 0x6df   : > { %s7724_s28 = smov %s6890_s14  ;;  %29 = sbr.rel (!%p27_p5) target bundleno = 10 (0xa), region = 136 }
 0x6e6   :  { %6087 = vsyncpa [#allocation5], 1 }
 0x6e7   :  { %6089 = vsyncpa [#allocation5 + $0x1], 1 }
 0x6e8   :  { %6090 = vsyncpa [#allocation7], 1 }
 0x6e9   :  { %6092 = vsyncpa [#allocation7 + $0x1], 1 }

</bundles_post_ra>
